<compile_context>
chip_gen: v5e
topology: v5e:2x2
jax: 0.10.0
libtpu: 0.0.40
codegen_flags: <defaults>
</compile_context>

<pallas_src>
import functools

import numpy as np
import jax
import jax.numpy as jnp
from jax.experimental import pallas as pl
from jax.experimental.pallas import tpu as pltpu

NEG_SLOPE = 0.01   # nn.LeakyReLU default
BN_EPS = 1e-5      # nn.BatchNorm1d default


# ----------------------------- in-kernel helpers ----------------------------

def _lrelu(v):
    return jnp.where(v >= 0.0, v, NEG_SLOPE * v)


def _dot(a, b):
    return jnp.dot(a, b, preferred_element_type=jnp.float32)


def _conv1_banded(h, k_ref, b_ref):
    # Conv1d(1 -> C, k=3, pad=1) + folded BN + LeakyReLU, computed directly
    # from the (B, L) feature-expansion output into the l-major (L*B, C) slab.
    # k_ref: (L, L, C) banded tensor, K[l, m, c] = w[c, 0, m-l+1] (0 off-band).
    L = k_ref.shape[0]
    B = h.shape[0]
    rep = jnp.broadcast_to(h[None, :, :], (L, B, h.shape[1]))          # (L, B, L)
    y = jnp.einsum('lbm,lmc->lbc', rep, k_ref[...],
                   preferred_element_type=jnp.float32)                 # (L, B, C)
    return _lrelu(y.reshape(L * B, k_ref.shape[2]) + b_ref[...])       # (L*B, C)


def _conv(x, w_ref, b_ref, batch):
    # Conv1d(Cin -> Cout, k=3, pad=1) + folded BN + LeakyReLU on an l-major
    # (L*B, Cin) slab: three accumulating tap matmuls over 8-row-aligned slices
    # of a sublane-zero-padded copy (no lane-axis concat).
    n, cin = x.shape
    z = jnp.zeros((batch, cin), jnp.float32)
    xp = jnp.concatenate([z, x, z], axis=0)                            # ((L+2)*B, Cin)
    y = (_dot(xp[0:n, :], w_ref[0])
         + _dot(xp[batch:n + batch, :], w_ref[1])
         + _dot(xp[2 * batch:n + 2 * batch, :], w_ref[2]))
    return _lrelu(y + b_ref[...])                                      # (L*B, Cout)


# --------------------------------- kernel ------------------------------------

def dual_path_kernel(
        x_ref,
        # transient pathway
        t_fe_w, t_fe_b, t_c1_k, t_c1_b, t_c2_w, t_c2_b,
        t_rm_w, t_rm_b, t_at_w, t_at_b, t_out_w, t_out_b,
        # steady pathway
        s_fe_w, s_fe_b, s_c1_k, s_c1_b, s_c2_w, s_c2_b,
        s_c3_w, s_c3_b, s_fc_w, s_fc_b, s_at_w, s_at_b,
        # fusion + classifier
        f_w, f_b, c1_w, c1_b, c2_w, c2_b,
        o_ref):
    B = x_ref.shape[0]
    H = t_fe_w.shape[1]          # hidden_dim == conv length L
    din = t_fe_w.shape[0]        # 15
    x = x_ref[...]

    # TODO(synk): dropout layers and training-mode BatchNorm are inference-only
    # here (identity / folded running stats).

    # ---------------- transient pathway ----------------
    ht = _lrelu(_dot(x[:, 0:din], t_fe_w[...]) + t_fe_b[...])          # (B, H)
    y1 = _conv1_banded(ht, t_c1_k, t_c1_b)                             # (H*B, 32)
    y2 = _conv(y1, t_c2_w, t_c2_b, B)                                  # (H*B, 64)
    # feature_remap on the torch (c, l) flatten: batched matmul over l against
    # the offline (l, c, h)-permuted weight, then reduce over l.
    y2_3d = y2.reshape(H, B, y2.shape[1])                              # (L, B, 64)
    part = jnp.einsum('lbc,lch->lbh', y2_3d, t_rm_w[...],
                      preferred_element_type=jnp.float32)              # (L, B, H)
    mapped = _lrelu(jnp.sum(part, axis=0) + t_rm_b[...])               # (B, H)
    att_t = _dot(mapped, t_at_w[...]) + t_at_b[...]                    # folded length-1 attention
    feat_t = _lrelu(_dot(att_t, t_out_w[...]) + t_out_b[...])          # (B, H)

    # ---------------- steady pathway ----------------
    hs = _lrelu(_dot(x[:, din:2 * din], s_fe_w[...]) + s_fe_b[...])    # (B, H)
    z1 = _conv1_banded(hs, s_c1_k, s_c1_b)                             # (H*B, 32)
    z2 = _conv(z1, s_c2_w, s_c2_b, B)                                  # (H*B, 64)
    z3 = _conv(z2, s_c3_w, s_c3_b, B)                                  # (H*B, 128)
    pooled = jnp.mean(z3.reshape(H, B, z3.shape[1]), axis=0)           # AdaptiveAvgPool1d(1) -> (B, 128)
    fs = _lrelu(_dot(pooled, s_fc_w[...]) + s_fc_b[...])               # (B, H)
    feat_s = _dot(fs, s_at_w[...]) + s_at_b[...]                       # folded attention (no act.)

    # ---------------- fusion + classifier ----------------
    # cat([transient, steady]) @ Wf  ==  t @ Wf[:H] + s @ Wf[H:]
    fused = jnp.maximum(_dot(feat_t, f_w[0:H, :])
                        + _dot(feat_s, f_w[H:2 * H, :]) + f_b[...], 0.0)
    h1 = jnp.maximum(_dot(fused, c1_w[...]) + c1_b[...], 0.0)
    o_ref[...] = _dot(h1, c2_w[...]) + c2_b[...]                       # logits


# ------------------------------ call wrapper ---------------------------------

_VMEM = functools.partial(pl.BlockSpec, memory_space=pltpu.MemorySpace.VMEM)


@jax.jit
def dual_path_forward(x, params):
    B = x.shape[0]
    ncls = params[-1].shape[1]                  # cls2 bias: (1, num_classes)
    return pl.pallas_call(
        dual_path_kernel,
        out_shape=jax.ShapeDtypeStruct((B, ncls), jnp.float32),
        in_specs=[_VMEM()] * (1 + len(params)),
        out_specs=_VMEM(),
    )(x, *params)


# --------------------------- parameters (torch-like) --------------------------

def init_raw_params(key, hidden_dim=32, num_classes=4):
    H = hidden_dim
    keys = iter(jax.random.split(key, 128))

    def linear(din, dout):
        bnd = 1.0 / (din ** 0.5)
        return dict(w=jax.random.uniform(next(keys), (dout, din), jnp.float32, -bnd, bnd),
                    b=jax.random.uniform(next(keys), (dout,), jnp.float32, -bnd, bnd))

    def conv(cin, cout, k=3):
        bnd = 1.0 / ((cin * k) ** 0.5)
        return dict(w=jax.random.uniform(next(keys), (cout, cin, k), jnp.float32, -bnd, bnd),
                    b=jax.random.uniform(next(keys), (cout,), jnp.float32, -bnd, bnd))

    def bn(d):
        return dict(gamma=jax.random.uniform(next(keys), (d,), jnp.float32, 0.5, 1.5),
                    beta=jax.random.uniform(next(keys), (d,), jnp.float32, -0.1, 0.1),
                    mean=jax.random.uniform(next(keys), (d,), jnp.float32, -0.1, 0.1),
                    var=jax.random.uniform(next(keys), (d,), jnp.float32, 0.5, 1.5))

    def attn(d):
        return dict(q=linear(d, d), k=linear(d, d), v=linear(d, d), o=linear(d, d))

    return dict(
        transient=dict(fe=linear(15, H), fe_bn=bn(H),
                       c1=conv(1, 32), c1_bn=bn(32),
                       c2=conv(32, 64), c2_bn=bn(64),
                       remap=linear(64 * H, H), remap_bn=bn(H),
                       attn=attn(H),
                       out=linear(H, H), out_bn=bn(H)),
        steady=dict(fe=linear(15, H), fe_bn=bn(H),
                    c1=conv(1, 32), c1_bn=bn(32),
                    c2=conv(32, 64), c2_bn=bn(64),
                    c3=conv(64, 128), c3_bn=bn(128),
                    fc=linear(128, H), fc_bn=bn(H),
                    attn=attn(H)),
        fusion=linear(2 * H, H), fusion_bn=bn(H),
        cls1=linear(H, H // 2), cls1_bn=bn(H // 2),
        cls2=linear(H // 2, num_classes),
    )


def prepare_params(raw, hidden_dim):
    """Fold BN, band the 1-channel convs, stack k=3 taps, permute the remap
    weight to (l, c, h), and fold the length-1 self-attention."""
    H = hidden_dim

    def bn_fold(bn):
        scale = bn["gamma"] / jnp.sqrt(bn["var"] + BN_EPS)
        shift = bn["beta"] - bn["mean"] * scale
        return scale, shift

    def lin_bn(lin, bn):
        s, t = bn_fold(bn)
        return (lin["w"].T * s[None, :], (lin["b"] * s + t)[None, :])

    def lin_plain(lin):
        return (lin["w"].T, lin["b"][None, :])

    def conv_bn(conv, bn):
        # (cout, cin, 3) -> (3, cin, cout), BN scale folded along cout.
        s, t = bn_fold(bn)
        w = jnp.transpose(conv["w"], (2, 1, 0)) * s[None, None, :]
        return (w, (conv["b"] * s + t)[None, :])

    def conv1_band(conv, bn, L):
        # Conv1d(1 -> C, k=3, pad=1) + BN as a banded (L, L, C) tensor:
        #   y[l, b, c] = sum_m x[b, m] * K[l, m, c],  K[l, m, c] = w[c, 0, m-l+1]
        s, t = bn_fold(bn)
        w = np.asarray(conv["w"][:, 0, :] * s[:, None])        # (C, 3)
        C = w.shape[0]
        K = np.zeros((L, L, C), np.float32)
        for l in range(L):
            for k in range(3):
                m = l + k - 1
                if 0 <= m < L:
                    K[l, m, :] = w[:, k]
        return (jnp.asarray(K), (conv["b"] * s + t)[None, :])

    def remap_fold(lin, bn, c2out):
        # torch flatten of the (B, C2, L) conv output is (c, l)-major; reorder
        # the weight to (l, c, h) so the kernel contracts per-l blocks.
        s, t = bn_fold(bn)
        w = lin["w"].reshape(H, c2out, H)                      # (h_out, c, l)
        w = jnp.transpose(w, (2, 1, 0)) * s[None, None, :]     # (l, c, h_out)
        return (w, (lin["b"] * s + t)[None, :])

    def attn_fold(att):
        # softmax over a length-1 key axis == 1  =>  out = fc_out(value(x))
        wv, bv = att["v"]["w"], att["v"]["b"]
        wo, bo = att["o"]["w"], att["o"]["b"]
        return (wv.T @ wo.T, (bv @ wo.T + bo)[None, :])

    tp, sp = raw["transient"], raw["steady"]
    params = (
        # transient
        *lin_bn(tp["fe"], tp["fe_bn"]),
        *conv1_band(tp["c1"], tp["c1_bn"], H),
        *conv_bn(tp["c2"], tp["c2_bn"]),
        *remap_fold(tp["remap"], tp["remap_bn"], 64),
        *attn_fold(tp["attn"]),
        *lin_bn(tp["out"], tp["out_bn"]),
        # steady
        *lin_bn(sp["fe"], sp["fe_bn"]),
        *conv1_band(sp["c1"], sp["c1_bn"], H),
        *conv_bn(sp["c2"], sp["c2_bn"]),
        *conv_bn(sp["c3"], sp["c3_bn"]),
        *lin_bn(sp["fc"], sp["fc_bn"]),
        *attn_fold(sp["attn"]),
        # fusion + classifier
        *lin_bn(raw["fusion"], raw["fusion_bn"]),
        *lin_bn(raw["cls1"], raw["cls1_bn"]),
        *lin_plain(raw["cls2"]),
    )
    return params


# ----------------------------------- main -------------------------------------

if __name__ == "__main__":
    key = jax.random.PRNGKey(0)
    pkey, xkey = jax.random.split(key)

    HIDDEN = 32          # hidden_dim (conv length == HIDDEN)
    NUM_CLASSES = 4
    BATCH = 8

    raw = init_raw_params(pkey, hidden_dim=HIDDEN, num_classes=NUM_CLASSES)
    params = prepare_params(raw, HIDDEN)
    x = jax.random.normal(xkey, (BATCH, 30), jnp.float32)   # 15 transient + 15 steady PCs

    logits = dual_path_forward(x, params)
    jax.block_until_ready(logits)

    assert logits.shape == (BATCH, NUM_CLASSES)
    assert bool(jnp.all(jnp.isfinite(logits)))
    print("KERNEL_OK")
</pallas_src>

<mosaic_0001>
module attributes {stable_mosaic.version = 11 : i64} {
  func.func @dual_path_kernel(%arg0: memref<8x30xf32, #tpu.memory_space<vmem>>, %arg1: memref<15x32xf32, #tpu.memory_space<vmem>>, %arg2: memref<1x32xf32, #tpu.memory_space<vmem>>, %arg3: memref<32x32x32xf32, #tpu.memory_space<vmem>>, %arg4: memref<1x32xf32, #tpu.memory_space<vmem>>, %arg5: memref<3x32x64xf32, #tpu.memory_space<vmem>>, %arg6: memref<1x64xf32, #tpu.memory_space<vmem>>, %arg7: memref<32x64x32xf32, #tpu.memory_space<vmem>>, %arg8: memref<1x32xf32, #tpu.memory_space<vmem>>, %arg9: memref<32x32xf32, #tpu.memory_space<vmem>>, %arg10: memref<1x32xf32, #tpu.memory_space<vmem>>, %arg11: memref<32x32xf32, #tpu.memory_space<vmem>>, %arg12: memref<1x32xf32, #tpu.memory_space<vmem>>, %arg13: memref<15x32xf32, #tpu.memory_space<vmem>>, %arg14: memref<1x32xf32, #tpu.memory_space<vmem>>, %arg15: memref<32x32x32xf32, #tpu.memory_space<vmem>>, %arg16: memref<1x32xf32, #tpu.memory_space<vmem>>, %arg17: memref<3x32x64xf32, #tpu.memory_space<vmem>>, %arg18: memref<1x64xf32, #tpu.memory_space<vmem>>, %arg19: memref<3x64x128xf32, #tpu.memory_space<vmem>>, %arg20: memref<1x128xf32, #tpu.memory_space<vmem>>, %arg21: memref<128x32xf32, #tpu.memory_space<vmem>>, %arg22: memref<1x32xf32, #tpu.memory_space<vmem>>, %arg23: memref<32x32xf32, #tpu.memory_space<vmem>>, %arg24: memref<1x32xf32, #tpu.memory_space<vmem>>, %arg25: memref<64x32xf32, #tpu.memory_space<vmem>>, %arg26: memref<1x32xf32, #tpu.memory_space<vmem>>, %arg27: memref<32x16xf32, #tpu.memory_space<vmem>>, %arg28: memref<1x16xf32, #tpu.memory_space<vmem>>, %arg29: memref<16x4xf32, #tpu.memory_space<vmem>>, %arg30: memref<1x4xf32, #tpu.memory_space<vmem>>, %arg31: memref<8x4xf32, #tpu.memory_space<vmem>>) attributes {dimension_semantics = [], scalar_prefetch = 0 : i64, scratch_operands = 0 : i64, tpu.core_type = #tpu.core_type<tc>} {
    %c0 = arith.constant 0 : index
    %c0_0 = arith.constant 0 : index
    %0 = vector.load %arg0[%c0, %c0_0] : memref<8x30xf32, #tpu.memory_space<vmem>>, vector<8x30xf32>
    %1 = vector.extract_strided_slice %0 {offsets = [0, 0], sizes = [8, 15], strides = [1, 1]} : vector<8x30xf32> to vector<8x15xf32>
    %c0_1 = arith.constant 0 : index
    %c0_2 = arith.constant 0 : index
    %2 = vector.load %arg1[%c0_1, %c0_2] : memref<15x32xf32, #tpu.memory_space<vmem>>, vector<15x32xf32>
    %cst = arith.constant dense<0.000000e+00> : vector<8x32xf32>
    %3 = tpu.matmul %1, %2, %cst {dimension_numbers = #tpu.dot_dimension_numbers<[1], [0], [0], [1], [0, 0, 1, 1], [], []>} : vector<8x15xf32>, vector<15x32xf32>, vector<8x32xf32> -> vector<8x32xf32>
    %c0_3 = arith.constant 0 : index
    %c0_4 = arith.constant 0 : index
    %4 = vector.load %arg2[%c0_3, %c0_4] : memref<1x32xf32, #tpu.memory_space<vmem>>, vector<1x32xf32>
    %5 = vector.broadcast %4 : vector<1x32xf32> to vector<8x32xf32>
    %6 = arith.addf %3, %5 : vector<8x32xf32>
    %cst_5 = arith.constant 0.000000e+00 : f32
    %7 = vector.broadcast %cst_5 : f32 to vector<8x32xf32>
    %8 = arith.cmpf oge, %6, %7 : vector<8x32xf32>
    %cst_6 = arith.constant 0.00999999977 : f32
    %9 = vector.broadcast %cst_6 : f32 to vector<8x32xf32>
    %10 = arith.mulf %9, %6 : vector<8x32xf32>
    %11 = arith.select %8, %6, %10 : vector<8x32xi1>, vector<8x32xf32>
    %12 = vector.shape_cast %11 : vector<8x32xf32> to vector<1x8x32xf32>
    %13 = vector.shape_cast %12 : vector<1x8x32xf32> to vector<1x8x32xf32>
    %14 = vector.broadcast %13 : vector<1x8x32xf32> to vector<32x8x32xf32>
    %c0_7 = arith.constant 0 : index
    %c0_8 = arith.constant 0 : index
    %c0_9 = arith.constant 0 : index
    %15 = vector.load %arg3[%c0_7, %c0_8, %c0_9] : memref<32x32x32xf32, #tpu.memory_space<vmem>>, vector<32x32x32xf32>
    "tpu.trace_start"() <{level = 10 : i32, message = "lbm,lmc->lbc"}> : () -> ()
    %cst_10 = arith.constant dense<0.000000e+00> : vector<32x8x32xf32>
    %16 = tpu.matmul %14, %15, %cst_10 {dimension_numbers = #tpu.dot_dimension_numbers<[2], [1], [1], [2], [0, 0, 0, 1, 1, 2], [0], [0]>} : vector<32x8x32xf32>, vector<32x32x32xf32>, vector<32x8x32xf32> -> vector<32x8x32xf32>
    "tpu.trace_stop"() : () -> ()
    %17 = vector.shape_cast %16 : vector<32x8x32xf32> to vector<256x32xf32>
    %c0_11 = arith.constant 0 : index
    %c0_12 = arith.constant 0 : index
    %18 = vector.load %arg4[%c0_11, %c0_12] : memref<1x32xf32, #tpu.memory_space<vmem>>, vector<1x32xf32>
    %19 = vector.broadcast %18 : vector<1x32xf32> to vector<256x32xf32>
    %20 = arith.addf %17, %19 : vector<256x32xf32>
    %cst_13 = arith.constant 0.000000e+00 : f32
    %21 = vector.broadcast %cst_13 : f32 to vector<256x32xf32>
    %22 = arith.cmpf oge, %20, %21 : vector<256x32xf32>
    %cst_14 = arith.constant 0.00999999977 : f32
    %23 = vector.broadcast %cst_14 : f32 to vector<256x32xf32>
    %24 = arith.mulf %23, %20 : vector<256x32xf32>
    %25 = arith.select %22, %20, %24 : vector<256x32xi1>, vector<256x32xf32>
    %cst_15 = arith.constant 0.000000e+00 : f32
    %26 = vector.broadcast %cst_15 : f32 to vector<8x32xf32>
    %27 = tpu.concatenate %26, %25, %26 in 0 : vector<8x32xf32>, vector<256x32xf32>, vector<8x32xf32> -> vector<272x32xf32>
    %28 = vector.extract_strided_slice %27 {offsets = [0, 0], sizes = [256, 32], strides = [1, 1]} : vector<272x32xf32> to vector<256x32xf32>
    %c0_16 = arith.constant 0 : index
    %c0_17 = arith.constant 0 : index
    %c0_18 = arith.constant 0 : index
    %29 = vector.load %arg5[%c0_16, %c0_17, %c0_18] : memref<3x32x64xf32, #tpu.memory_space<vmem>>, vector<1x32x64xf32>
    %30 = vector.shape_cast %29 : vector<1x32x64xf32> to vector<32x64xf32>
    %cst_19 = arith.constant dense<0.000000e+00> : vector<256x64xf32>
    %31 = tpu.matmul %28, %30, %cst_19 {dimension_numbers = #tpu.dot_dimension_numbers<[1], [0], [0], [1], [0, 0, 1, 1], [], []>} : vector<256x32xf32>, vector<32x64xf32>, vector<256x64xf32> -> vector<256x64xf32>
    %32 = vector.extract_strided_slice %27 {offsets = [8, 0], sizes = [256, 32], strides = [1, 1]} : vector<272x32xf32> to vector<256x32xf32>
    %c1 = arith.constant 1 : index
    %c0_20 = arith.constant 0 : index
    %c0_21 = arith.constant 0 : index
    %33 = vector.load %arg5[%c1, %c0_20, %c0_21] : memref<3x32x64xf32, #tpu.memory_space<vmem>>, vector<1x32x64xf32>
    %34 = vector.shape_cast %33 : vector<1x32x64xf32> to vector<32x64xf32>
    %cst_22 = arith.constant dense<0.000000e+00> : vector<256x64xf32>
    %35 = tpu.matmul %32, %34, %cst_22 {dimension_numbers = #tpu.dot_dimension_numbers<[1], [0], [0], [1], [0, 0, 1, 1], [], []>} : vector<256x32xf32>, vector<32x64xf32>, vector<256x64xf32> -> vector<256x64xf32>
    %36 = arith.addf %31, %35 : vector<256x64xf32>
    %37 = vector.extract_strided_slice %27 {offsets = [16, 0], sizes = [256, 32], strides = [1, 1]} : vector<272x32xf32> to vector<256x32xf32>
    %c2 = arith.constant 2 : index
    %c0_23 = arith.constant 0 : index
    %c0_24 = arith.constant 0 : index
    %38 = vector.load %arg5[%c2, %c0_23, %c0_24] : memref<3x32x64xf32, #tpu.memory_space<vmem>>, vector<1x32x64xf32>
    %39 = vector.shape_cast %38 : vector<1x32x64xf32> to vector<32x64xf32>
    %cst_25 = arith.constant dense<0.000000e+00> : vector<256x64xf32>
    %40 = tpu.matmul %37, %39, %cst_25 {dimension_numbers = #tpu.dot_dimension_numbers<[1], [0], [0], [1], [0, 0, 1, 1], [], []>} : vector<256x32xf32>, vector<32x64xf32>, vector<256x64xf32> -> vector<256x64xf32>
    %41 = arith.addf %36, %40 : vector<256x64xf32>
    %c0_26 = arith.constant 0 : index
    %c0_27 = arith.constant 0 : index
    %42 = vector.load %arg6[%c0_26, %c0_27] : memref<1x64xf32, #tpu.memory_space<vmem>>, vector<1x64xf32>
    %43 = vector.broadcast %42 : vector<1x64xf32> to vector<256x64xf32>
    %44 = arith.addf %41, %43 : vector<256x64xf32>
    %cst_28 = arith.constant 0.000000e+00 : f32
    %45 = vector.broadcast %cst_28 : f32 to vector<256x64xf32>
    %46 = arith.cmpf oge, %44, %45 : vector<256x64xf32>
    %cst_29 = arith.constant 0.00999999977 : f32
    %47 = vector.broadcast %cst_29 : f32 to vector<256x64xf32>
    %48 = arith.mulf %47, %44 : vector<256x64xf32>
    %49 = arith.select %46, %44, %48 : vector<256x64xi1>, vector<256x64xf32>
    %50 = vector.shape_cast %49 : vector<256x64xf32> to vector<32x8x64xf32>
    %c0_30 = arith.constant 0 : index
    %c0_31 = arith.constant 0 : index
    %c0_32 = arith.constant 0 : index
    %51 = vector.load %arg7[%c0_30, %c0_31, %c0_32] : memref<32x64x32xf32, #tpu.memory_space<vmem>>, vector<32x64x32xf32>
    "tpu.trace_start"() <{level = 10 : i32, message = "lbc,lch->lbh"}> : () -> ()
    %cst_33 = arith.constant dense<0.000000e+00> : vector<32x8x32xf32>
    %52 = tpu.matmul %50, %51, %cst_33 {dimension_numbers = #tpu.dot_dimension_numbers<[2], [1], [1], [2], [0, 0, 0, 1, 1, 2], [0], [0]>} : vector<32x8x64xf32>, vector<32x64x32xf32>, vector<32x8x32xf32> -> vector<32x8x32xf32>
    "tpu.trace_stop"() : () -> ()
    %cst_34 = arith.constant dense<0.000000e+00> : vector<8x32xf32>
    %53 = vector.multi_reduction <add>, %52, %cst_34 [0] : vector<32x8x32xf32> to vector<8x32xf32>
    %c0_35 = arith.constant 0 : index
    %c0_36 = arith.constant 0 : index
    %54 = vector.load %arg8[%c0_35, %c0_36] : memref<1x32xf32, #tpu.memory_space<vmem>>, vector<1x32xf32>
    %55 = vector.broadcast %54 : vector<1x32xf32> to vector<8x32xf32>
    %56 = arith.addf %53, %55 : vector<8x32xf32>
    %cst_37 = arith.constant 0.000000e+00 : f32
    %57 = vector.broadcast %cst_37 : f32 to vector<8x32xf32>
    %58 = arith.cmpf oge, %56, %57 : vector<8x32xf32>
    %cst_38 = arith.constant 0.00999999977 : f32
    %59 = vector.broadcast %cst_38 : f32 to vector<8x32xf32>
    %60 = arith.mulf %59, %56 : vector<8x32xf32>
    %61 = arith.select %58, %56, %60 : vector<8x32xi1>, vector<8x32xf32>
    %c0_39 = arith.constant 0 : index
    %c0_40 = arith.constant 0 : index
    %62 = vector.load %arg9[%c0_39, %c0_40] : memref<32x32xf32, #tpu.memory_space<vmem>>, vector<32x32xf32>
    %cst_41 = arith.constant dense<0.000000e+00> : vector<8x32xf32>
    %63 = tpu.matmul %61, %62, %cst_41 {dimension_numbers = #tpu.dot_dimension_numbers<[1], [0], [0], [1], [0, 0, 1, 1], [], []>} : vector<8x32xf32>, vector<32x32xf32>, vector<8x32xf32> -> vector<8x32xf32>
    %c0_42 = arith.constant 0 : index
    %c0_43 = arith.constant 0 : index
    %64 = vector.load %arg10[%c0_42, %c0_43] : memref<1x32xf32, #tpu.memory_space<vmem>>, vector<1x32xf32>
    %65 = vector.broadcast %64 : vector<1x32xf32> to vector<8x32xf32>
    %66 = arith.addf %63, %65 : vector<8x32xf32>
    %c0_44 = arith.constant 0 : index
    %c0_45 = arith.constant 0 : index
    %67 = vector.load %arg11[%c0_44, %c0_45] : memref<32x32xf32, #tpu.memory_space<vmem>>, vector<32x32xf32>
    %cst_46 = arith.constant dense<0.000000e+00> : vector<8x32xf32>
    %68 = tpu.matmul %66, %67, %cst_46 {dimension_numbers = #tpu.dot_dimension_numbers<[1], [0], [0], [1], [0, 0, 1, 1], [], []>} : vector<8x32xf32>, vector<32x32xf32>, vector<8x32xf32> -> vector<8x32xf32>
    %c0_47 = arith.constant 0 : index
    %c0_48 = arith.constant 0 : index
    %69 = vector.load %arg12[%c0_47, %c0_48] : memref<1x32xf32, #tpu.memory_space<vmem>>, vector<1x32xf32>
    %70 = vector.broadcast %69 : vector<1x32xf32> to vector<8x32xf32>
    %71 = arith.addf %68, %70 : vector<8x32xf32>
    %cst_49 = arith.constant 0.000000e+00 : f32
    %72 = vector.broadcast %cst_49 : f32 to vector<8x32xf32>
    %73 = arith.cmpf oge, %71, %72 : vector<8x32xf32>
    %cst_50 = arith.constant 0.00999999977 : f32
    %74 = vector.broadcast %cst_50 : f32 to vector<8x32xf32>
    %75 = arith.mulf %74, %71 : vector<8x32xf32>
    %76 = arith.select %73, %71, %75 : vector<8x32xi1>, vector<8x32xf32>
    %77 = vector.extract_strided_slice %0 {offsets = [0, 15], sizes = [8, 15], strides = [1, 1]} : vector<8x30xf32> to vector<8x15xf32>
    %c0_51 = arith.constant 0 : index
    %c0_52 = arith.constant 0 : index
    %78 = vector.load %arg13[%c0_51, %c0_52] : memref<15x32xf32, #tpu.memory_space<vmem>>, vector<15x32xf32>
    %cst_53 = arith.constant dense<0.000000e+00> : vector<8x32xf32>
    %79 = tpu.matmul %77, %78, %cst_53 {dimension_numbers = #tpu.dot_dimension_numbers<[1], [0], [0], [1], [0, 0, 1, 1], [], []>} : vector<8x15xf32>, vector<15x32xf32>, vector<8x32xf32> -> vector<8x32xf32>
    %c0_54 = arith.constant 0 : index
    %c0_55 = arith.constant 0 : index
    %80 = vector.load %arg14[%c0_54, %c0_55] : memref<1x32xf32, #tpu.memory_space<vmem>>, vector<1x32xf32>
    %81 = vector.broadcast %80 : vector<1x32xf32> to vector<8x32xf32>
    %82 = arith.addf %79, %81 : vector<8x32xf32>
    %cst_56 = arith.constant 0.000000e+00 : f32
    %83 = vector.broadcast %cst_56 : f32 to vector<8x32xf32>
    %84 = arith.cmpf oge, %82, %83 : vector<8x32xf32>
    %cst_57 = arith.constant 0.00999999977 : f32
    %85 = vector.broadcast %cst_57 : f32 to vector<8x32xf32>
    %86 = arith.mulf %85, %82 : vector<8x32xf32>
    %87 = arith.select %84, %82, %86 : vector<8x32xi1>, vector<8x32xf32>
    %88 = vector.shape_cast %87 : vector<8x32xf32> to vector<1x8x32xf32>
    %89 = vector.shape_cast %88 : vector<1x8x32xf32> to vector<1x8x32xf32>
    %90 = vector.broadcast %89 : vector<1x8x32xf32> to vector<32x8x32xf32>
    %c0_58 = arith.constant 0 : index
    %c0_59 = arith.constant 0 : index
    %c0_60 = arith.constant 0 : index
    %91 = vector.load %arg15[%c0_58, %c0_59, %c0_60] : memref<32x32x32xf32, #tpu.memory_space<vmem>>, vector<32x32x32xf32>
    "tpu.trace_start"() <{level = 10 : i32, message = "lbm,lmc->lbc"}> : () -> ()
    %cst_61 = arith.constant dense<0.000000e+00> : vector<32x8x32xf32>
    %92 = tpu.matmul %90, %91, %cst_61 {dimension_numbers = #tpu.dot_dimension_numbers<[2], [1], [1], [2], [0, 0, 0, 1, 1, 2], [0], [0]>} : vector<32x8x32xf32>, vector<32x32x32xf32>, vector<32x8x32xf32> -> vector<32x8x32xf32>
    "tpu.trace_stop"() : () -> ()
    %93 = vector.shape_cast %92 : vector<32x8x32xf32> to vector<256x32xf32>
    %c0_62 = arith.constant 0 : index
    %c0_63 = arith.constant 0 : index
    %94 = vector.load %arg16[%c0_62, %c0_63] : memref<1x32xf32, #tpu.memory_space<vmem>>, vector<1x32xf32>
    %95 = vector.broadcast %94 : vector<1x32xf32> to vector<256x32xf32>
    %96 = arith.addf %93, %95 : vector<256x32xf32>
    %cst_64 = arith.constant 0.000000e+00 : f32
    %97 = vector.broadcast %cst_64 : f32 to vector<256x32xf32>
    %98 = arith.cmpf oge, %96, %97 : vector<256x32xf32>
    %cst_65 = arith.constant 0.00999999977 : f32
    %99 = vector.broadcast %cst_65 : f32 to vector<256x32xf32>
    %100 = arith.mulf %99, %96 : vector<256x32xf32>
    %101 = arith.select %98, %96, %100 : vector<256x32xi1>, vector<256x32xf32>
    %cst_66 = arith.constant 0.000000e+00 : f32
    %102 = vector.broadcast %cst_66 : f32 to vector<8x32xf32>
    %103 = tpu.concatenate %102, %101, %102 in 0 : vector<8x32xf32>, vector<256x32xf32>, vector<8x32xf32> -> vector<272x32xf32>
    %104 = vector.extract_strided_slice %103 {offsets = [0, 0], sizes = [256, 32], strides = [1, 1]} : vector<272x32xf32> to vector<256x32xf32>
    %c0_67 = arith.constant 0 : index
    %c0_68 = arith.constant 0 : index
    %c0_69 = arith.constant 0 : index
    %105 = vector.load %arg17[%c0_67, %c0_68, %c0_69] : memref<3x32x64xf32, #tpu.memory_space<vmem>>, vector<1x32x64xf32>
    %106 = vector.shape_cast %105 : vector<1x32x64xf32> to vector<32x64xf32>
    %cst_70 = arith.constant dense<0.000000e+00> : vector<256x64xf32>
    %107 = tpu.matmul %104, %106, %cst_70 {dimension_numbers = #tpu.dot_dimension_numbers<[1], [0], [0], [1], [0, 0, 1, 1], [], []>} : vector<256x32xf32>, vector<32x64xf32>, vector<256x64xf32> -> vector<256x64xf32>
    %108 = vector.extract_strided_slice %103 {offsets = [8, 0], sizes = [256, 32], strides = [1, 1]} : vector<272x32xf32> to vector<256x32xf32>
    %c1_71 = arith.constant 1 : index
    %c0_72 = arith.constant 0 : index
    %c0_73 = arith.constant 0 : index
    %109 = vector.load %arg17[%c1_71, %c0_72, %c0_73] : memref<3x32x64xf32, #tpu.memory_space<vmem>>, vector<1x32x64xf32>
    %110 = vector.shape_cast %109 : vector<1x32x64xf32> to vector<32x64xf32>
    %cst_74 = arith.constant dense<0.000000e+00> : vector<256x64xf32>
    %111 = tpu.matmul %108, %110, %cst_74 {dimension_numbers = #tpu.dot_dimension_numbers<[1], [0], [0], [1], [0, 0, 1, 1], [], []>} : vector<256x32xf32>, vector<32x64xf32>, vector<256x64xf32> -> vector<256x64xf32>
    %112 = arith.addf %107, %111 : vector<256x64xf32>
    %113 = vector.extract_strided_slice %103 {offsets = [16, 0], sizes = [256, 32], strides = [1, 1]} : vector<272x32xf32> to vector<256x32xf32>
    %c2_75 = arith.constant 2 : index
    %c0_76 = arith.constant 0 : index
    %c0_77 = arith.constant 0 : index
    %114 = vector.load %arg17[%c2_75, %c0_76, %c0_77] : memref<3x32x64xf32, #tpu.memory_space<vmem>>, vector<1x32x64xf32>
    %115 = vector.shape_cast %114 : vector<1x32x64xf32> to vector<32x64xf32>
    %cst_78 = arith.constant dense<0.000000e+00> : vector<256x64xf32>
    %116 = tpu.matmul %113, %115, %cst_78 {dimension_numbers = #tpu.dot_dimension_numbers<[1], [0], [0], [1], [0, 0, 1, 1], [], []>} : vector<256x32xf32>, vector<32x64xf32>, vector<256x64xf32> -> vector<256x64xf32>
    %117 = arith.addf %112, %116 : vector<256x64xf32>
    %c0_79 = arith.constant 0 : index
    %c0_80 = arith.constant 0 : index
    %118 = vector.load %arg18[%c0_79, %c0_80] : memref<1x64xf32, #tpu.memory_space<vmem>>, vector<1x64xf32>
    %119 = vector.broadcast %118 : vector<1x64xf32> to vector<256x64xf32>
    %120 = arith.addf %117, %119 : vector<256x64xf32>
    %cst_81 = arith.constant 0.000000e+00 : f32
    %121 = vector.broadcast %cst_81 : f32 to vector<256x64xf32>
    %122 = arith.cmpf oge, %120, %121 : vector<256x64xf32>
    %cst_82 = arith.constant 0.00999999977 : f32
    %123 = vector.broadcast %cst_82 : f32 to vector<256x64xf32>
    %124 = arith.mulf %123, %120 : vector<256x64xf32>
    %125 = arith.select %122, %120, %124 : vector<256x64xi1>, vector<256x64xf32>
    %cst_83 = arith.constant 0.000000e+00 : f32
    %126 = vector.broadcast %cst_83 : f32 to vector<8x64xf32>
    %127 = tpu.concatenate %126, %125, %126 in 0 : vector<8x64xf32>, vector<256x64xf32>, vector<8x64xf32> -> vector<272x64xf32>
    %128 = vector.extract_strided_slice %127 {offsets = [0, 0], sizes = [256, 64], strides = [1, 1]} : vector<272x64xf32> to vector<256x64xf32>
    %c0_84 = arith.constant 0 : index
    %c0_85 = arith.constant 0 : index
    %c0_86 = arith.constant 0 : index
    %129 = vector.load %arg19[%c0_84, %c0_85, %c0_86] : memref<3x64x128xf32, #tpu.memory_space<vmem>>, vector<1x64x128xf32>
    %130 = vector.shape_cast %129 : vector<1x64x128xf32> to vector<64x128xf32>
    %cst_87 = arith.constant dense<0.000000e+00> : vector<256x128xf32>
    %131 = tpu.matmul %128, %130, %cst_87 {dimension_numbers = #tpu.dot_dimension_numbers<[1], [0], [0], [1], [0, 0, 1, 1], [], []>} : vector<256x64xf32>, vector<64x128xf32>, vector<256x128xf32> -> vector<256x128xf32>
    %132 = vector.extract_strided_slice %127 {offsets = [8, 0], sizes = [256, 64], strides = [1, 1]} : vector<272x64xf32> to vector<256x64xf32>
    %c1_88 = arith.constant 1 : index
    %c0_89 = arith.constant 0 : index
    %c0_90 = arith.constant 0 : index
    %133 = vector.load %arg19[%c1_88, %c0_89, %c0_90] : memref<3x64x128xf32, #tpu.memory_space<vmem>>, vector<1x64x128xf32>
    %134 = vector.shape_cast %133 : vector<1x64x128xf32> to vector<64x128xf32>
    %cst_91 = arith.constant dense<0.000000e+00> : vector<256x128xf32>
    %135 = tpu.matmul %132, %134, %cst_91 {dimension_numbers = #tpu.dot_dimension_numbers<[1], [0], [0], [1], [0, 0, 1, 1], [], []>} : vector<256x64xf32>, vector<64x128xf32>, vector<256x128xf32> -> vector<256x128xf32>
    %136 = arith.addf %131, %135 : vector<256x128xf32>
    %137 = vector.extract_strided_slice %127 {offsets = [16, 0], sizes = [256, 64], strides = [1, 1]} : vector<272x64xf32> to vector<256x64xf32>
    %c2_92 = arith.constant 2 : index
    %c0_93 = arith.constant 0 : index
    %c0_94 = arith.constant 0 : index
    %138 = vector.load %arg19[%c2_92, %c0_93, %c0_94] : memref<3x64x128xf32, #tpu.memory_space<vmem>>, vector<1x64x128xf32>
    %139 = vector.shape_cast %138 : vector<1x64x128xf32> to vector<64x128xf32>
    %cst_95 = arith.constant dense<0.000000e+00> : vector<256x128xf32>
    %140 = tpu.matmul %137, %139, %cst_95 {dimension_numbers = #tpu.dot_dimension_numbers<[1], [0], [0], [1], [0, 0, 1, 1], [], []>} : vector<256x64xf32>, vector<64x128xf32>, vector<256x128xf32> -> vector<256x128xf32>
    %141 = arith.addf %136, %140 : vector<256x128xf32>
    %c0_96 = arith.constant 0 : index
    %c0_97 = arith.constant 0 : index
    %142 = vector.load %arg20[%c0_96, %c0_97] : memref<1x128xf32, #tpu.memory_space<vmem>>, vector<1x128xf32>
    %143 = vector.broadcast %142 : vector<1x128xf32> to vector<256x128xf32>
    %144 = arith.addf %141, %143 : vector<256x128xf32>
    %cst_98 = arith.constant 0.000000e+00 : f32
    %145 = vector.broadcast %cst_98 : f32 to vector<256x128xf32>
    %146 = arith.cmpf oge, %144, %145 : vector<256x128xf32>
    %cst_99 = arith.constant 0.00999999977 : f32
    %147 = vector.broadcast %cst_99 : f32 to vector<256x128xf32>
    %148 = arith.mulf %147, %144 : vector<256x128xf32>
    %149 = arith.select %146, %144, %148 : vector<256x128xi1>, vector<256x128xf32>
    %150 = vector.shape_cast %149 : vector<256x128xf32> to vector<32x8x128xf32>
    %cst_100 = arith.constant dense<0.000000e+00> : vector<8x128xf32>
    %151 = vector.multi_reduction <add>, %150, %cst_100 [0] : vector<32x8x128xf32> to vector<8x128xf32>
    %cst_101 = arith.constant 3.200000e+01 : f32
    %152 = vector.broadcast %cst_101 : f32 to vector<8x128xf32>
    %153 = arith.divf %151, %152 : vector<8x128xf32>
    %c0_102 = arith.constant 0 : index
    %c0_103 = arith.constant 0 : index
    %154 = vector.load %arg21[%c0_102, %c0_103] : memref<128x32xf32, #tpu.memory_space<vmem>>, vector<128x32xf32>
    %cst_104 = arith.constant dense<0.000000e+00> : vector<8x32xf32>
    %155 = tpu.matmul %153, %154, %cst_104 {dimension_numbers = #tpu.dot_dimension_numbers<[1], [0], [0], [1], [0, 0, 1, 1], [], []>} : vector<8x128xf32>, vector<128x32xf32>, vector<8x32xf32> -> vector<8x32xf32>
    %c0_105 = arith.constant 0 : index
    %c0_106 = arith.constant 0 : index
    %156 = vector.load %arg22[%c0_105, %c0_106] : memref<1x32xf32, #tpu.memory_space<vmem>>, vector<1x32xf32>
    %157 = vector.broadcast %156 : vector<1x32xf32> to vector<8x32xf32>
    %158 = arith.addf %155, %157 : vector<8x32xf32>
    %cst_107 = arith.constant 0.000000e+00 : f32
    %159 = vector.broadcast %cst_107 : f32 to vector<8x32xf32>
    %160 = arith.cmpf oge, %158, %159 : vector<8x32xf32>
    %cst_108 = arith.constant 0.00999999977 : f32
    %161 = vector.broadcast %cst_108 : f32 to vector<8x32xf32>
    %162 = arith.mulf %161, %158 : vector<8x32xf32>
    %163 = arith.select %160, %158, %162 : vector<8x32xi1>, vector<8x32xf32>
    %c0_109 = arith.constant 0 : index
    %c0_110 = arith.constant 0 : index
    %164 = vector.load %arg23[%c0_109, %c0_110] : memref<32x32xf32, #tpu.memory_space<vmem>>, vector<32x32xf32>
    %cst_111 = arith.constant dense<0.000000e+00> : vector<8x32xf32>
    %165 = tpu.matmul %163, %164, %cst_111 {dimension_numbers = #tpu.dot_dimension_numbers<[1], [0], [0], [1], [0, 0, 1, 1], [], []>} : vector<8x32xf32>, vector<32x32xf32>, vector<8x32xf32> -> vector<8x32xf32>
    %c0_112 = arith.constant 0 : index
    %c0_113 = arith.constant 0 : index
    %166 = vector.load %arg24[%c0_112, %c0_113] : memref<1x32xf32, #tpu.memory_space<vmem>>, vector<1x32xf32>
    %167 = vector.broadcast %166 : vector<1x32xf32> to vector<8x32xf32>
    %168 = arith.addf %165, %167 : vector<8x32xf32>
    %c0_114 = arith.constant 0 : index
    %c0_115 = arith.constant 0 : index
    %169 = vector.load %arg25[%c0_114, %c0_115] : memref<64x32xf32, #tpu.memory_space<vmem>>, vector<32x32xf32>
    %cst_116 = arith.constant dense<0.000000e+00> : vector<8x32xf32>
    %170 = tpu.matmul %76, %169, %cst_116 {dimension_numbers = #tpu.dot_dimension_numbers<[1], [0], [0], [1], [0, 0, 1, 1], [], []>} : vector<8x32xf32>, vector<32x32xf32>, vector<8x32xf32> -> vector<8x32xf32>
    %c32 = arith.constant 32 : index
    %c0_117 = arith.constant 0 : index
    %171 = vector.load %arg25[%c32, %c0_117] : memref<64x32xf32, #tpu.memory_space<vmem>>, vector<32x32xf32>
    %cst_118 = arith.constant dense<0.000000e+00> : vector<8x32xf32>
    %172 = tpu.matmul %168, %171, %cst_118 {dimension_numbers = #tpu.dot_dimension_numbers<[1], [0], [0], [1], [0, 0, 1, 1], [], []>} : vector<8x32xf32>, vector<32x32xf32>, vector<8x32xf32> -> vector<8x32xf32>
    %173 = arith.addf %170, %172 : vector<8x32xf32>
    %c0_119 = arith.constant 0 : index
    %c0_120 = arith.constant 0 : index
    %174 = vector.load %arg26[%c0_119, %c0_120] : memref<1x32xf32, #tpu.memory_space<vmem>>, vector<1x32xf32>
    %175 = vector.broadcast %174 : vector<1x32xf32> to vector<8x32xf32>
    %176 = arith.addf %173, %175 : vector<8x32xf32>
    %cst_121 = arith.constant 0.000000e+00 : f32
    %177 = vector.broadcast %cst_121 : f32 to vector<8x32xf32>
    %178 = arith.maximumf %176, %177 : vector<8x32xf32>
    %c0_122 = arith.constant 0 : index
    %c0_123 = arith.constant 0 : index
    %179 = vector.load %arg27[%c0_122, %c0_123] : memref<32x16xf32, #tpu.memory_space<vmem>>, vector<32x16xf32>
    %cst_124 = arith.constant dense<0.000000e+00> : vector<8x16xf32>
    %180 = tpu.matmul %178, %179, %cst_124 {dimension_numbers = #tpu.dot_dimension_numbers<[1], [0], [0], [1], [0, 0, 1, 1], [], []>} : vector<8x32xf32>, vector<32x16xf32>, vector<8x16xf32> -> vector<8x16xf32>
    %c0_125 = arith.constant 0 : index
    %c0_126 = arith.constant 0 : index
    %181 = vector.load %arg28[%c0_125, %c0_126] : memref<1x16xf32, #tpu.memory_space<vmem>>, vector<1x16xf32>
    %182 = vector.broadcast %181 : vector<1x16xf32> to vector<8x16xf32>
    %183 = arith.addf %180, %182 : vector<8x16xf32>
    %cst_127 = arith.constant 0.000000e+00 : f32
    %184 = vector.broadcast %cst_127 : f32 to vector<8x16xf32>
    %185 = arith.maximumf %183, %184 : vector<8x16xf32>
    %c0_128 = arith.constant 0 : index
    %c0_129 = arith.constant 0 : index
    %186 = vector.load %arg29[%c0_128, %c0_129] : memref<16x4xf32, #tpu.memory_space<vmem>>, vector<16x4xf32>
    %cst_130 = arith.constant dense<0.000000e+00> : vector<8x4xf32>
    %187 = tpu.matmul %185, %186, %cst_130 {dimension_numbers = #tpu.dot_dimension_numbers<[1], [0], [0], [1], [0, 0, 1, 1], [], []>} : vector<8x16xf32>, vector<16x4xf32>, vector<8x4xf32> -> vector<8x4xf32>
    %c0_131 = arith.constant 0 : index
    %c0_132 = arith.constant 0 : index
    %188 = vector.load %arg30[%c0_131, %c0_132] : memref<1x4xf32, #tpu.memory_space<vmem>>, vector<1x4xf32>
    %189 = vector.broadcast %188 : vector<1x4xf32> to vector<8x4xf32>
    %190 = arith.addf %187, %189 : vector<8x4xf32>
    %c0_133 = arith.constant 0 : index
    %c0_134 = arith.constant 0 : index
    %191 = vector.load %arg31[%c0_133, %c0_134] : memref<8x4xf32, #tpu.memory_space<vmem>>, vector<8x4xf32>
    tpu.vector_store %arg31[%c0_133, %c0_134], %190 {strides = array<i32>} : memref<8x4xf32, #tpu.memory_space<vmem>>, vector<8x4xf32>,
    return
  }
}

</mosaic_0001>

<bundles_post_ra>
// kernel: dual_path_forward.1
= control target key start
LH: loop header
LB: loop body
LE: loop exit
PB: predicated region body
PF: predicated region fallthrough
CT: control target
= control target key end

     0   :  { %s5750_s3 = smov 1   ;;  %s5751_s10 = smov 3   ;;  %vm141_vm0 = vcmask 1046528   ;;  %vm137_vm1 = vcmask 121856   ;;  %vm296_vm3 = vcmask 261120   ;;  %s7771_s0 = inlined_call_operand.smem [shape: u32[32], index: -1, kind: input, shape index: {}] }
   0x1   :  { %s5237_s6 = sld [smem:[%s7771_s0 + %s5750_s3]]   ;;  %s5752_s14 = smov 2  }
   0x2   :  { %s5795_s9 = sld [smem:[%s7771_s0]]   ;;  %s5753_s18 = smov 4  }
   0x3   :  { %s5800_s13 = sld [smem:[%s7771_s0 + %s5751_s10]]   ;;  %s5754_s22 = smov 5  }
   0x4   :  { %s5805_s17 = sld [smem:[%s7771_s0 + %s5752_s14]]   ;;  %s5756_s26 = smov 6  }
   0x5   :  { %s5817_s21 = sld [smem:[%s7771_s0 + %s5753_s18]]   ;;  %s5757_s30 = smov 7  }
   0x6   :  { %s5981_s25 = sld [smem:[%s7771_s0 + %s5754_s22]]   ;;  %s5758_s4 = smov 113  }
   0x7   :  { %v132_v0 = vld [vmem:[%s5237_s6 + $0x8] sm:$0x7f]  ;;  %v131_v1 = vld [vmem:[%s5237_s6] sm:$0xff]  ;;  %s6268_s29 = sld [smem:[%s7771_s0 + %s5756_s26]]   ;;  %s5759_s5 = smov 8  }
   0x8   :  { %5268 = vmatpush.msk.msra.mxu0 %vm141_vm0, %v132_v0  ;;  %v130_v2 = vld [vmem:[%s5795_s9] sm:$0xff]  ;;  %s6310_s3 = sld [smem:[%s7771_s0 + %s5757_s30]]   ;;  %s5767_s7 = smov 12  }
   0x9   :  { %v171_v3 = vld [vmem:[%s5800_s13 + $0x18] sm:$0xff]  ;;  %v170_v7 = vld [vmem:[%s5800_s13 + $0x10] sm:$0xff]  ;;  %v169_v11 = vld [vmem:[%s5800_s13 + $0x8] sm:$0xff]  ;;  %s6821_s8 = sld [smem:[%s7771_s0 + %s5759_s5]]   ;;  %s5768_s11 = smov 17  }
   0xa   :  { %v175_v4 = vld [vmem:[%s5800_s13 + $0x38] sm:$0xff]  ;;  %160 = vmatpush.msra.mxu0 %v131_v1  ;;  %v174_v8 = vld [vmem:[%s5800_s13 + $0x30] sm:$0xff]  ;;  %v173_v12 = vld [vmem:[%s5800_s13 + $0x28] sm:$0xff]  ;;  %s7059_s10 = sld [smem:[%s7771_s0 + %s5767_s7]]   ;;  %s5769_s15 = smov 19  }
   0xb   :  { %v179_v5 = vld [vmem:[%s5800_s13 + $0x58] sm:$0xff]  ;;  %332 = vmatpush.msra.mxu2 %v175_v4  ;;  %5269 = vmatmul.msk.f32.vlgmr.msra.gmra.mxu0 %vm137_vm1, %v130_v2  ;;  %v178_v9 = vld [vmem:[%s5800_s13 + $0x50] sm:$0xff]  ;;  %v177_v13 = vld [vmem:[%s5800_s13 + $0x48] sm:$0xff]  ;;  %s7101_s14 = sld [smem:[%s7771_s0 + %s5768_s11]]   ;;  %s5770_s19 = smov 18  }
   0xc   :  { %v187_v6 = vld [vmem:[%s5800_s13 + $0x98] sm:$0xff]  ;;  %352 = vmatpush.msra.mxu3 %v179_v5  ;;  %312 = vmatpush.msrb.mxu0 %v171_v3  ;;  %v186_v10 = vld [vmem:[%s5800_s13 + $0x90] sm:$0xff]  ;;  %v185_v14 = vld [vmem:[%s5800_s13 + $0x88] sm:$0xff]  ;;  %s7128_s18 = sld [smem:[%s7771_s0 + %s5769_s15]]   ;;  %s5771_s23 = smov 20  }
   0xd   :  { %392 = vmatpush.msra.mxu1 %v187_v6  ;;  %333 = vmatpush.msra.mxu2 %v174_v8  ;;  %v168_v15 = vld [vmem:[%s5800_s13] sm:$0xff]  ;;  %v183_v19 = vld [vmem:[%s5800_s13 + $0x78] sm:$0xff]  ;;  %v182_v23 = vld [vmem:[%s5800_s13 + $0x70] sm:$0xff]  ;;  %s7147_s22 = sld [smem:[%s7771_s0 + %s5770_s19]]   ;;  %s5772_s27 = smov 21  }
   0xe   :  { %313 = vmatpush.msrb.mxu0 %v170_v7  ;;  %353 = vmatpush.msra.mxu3 %v178_v9  ;;  %v172_v16 = vld [vmem:[%s5800_s13 + $0x20] sm:$0xff]  ;;  %v191_v20 = vld [vmem:[%s5800_s13 + $0xb8] sm:$0xff]  ;;  %v190_v24 = vld [vmem:[%s5800_s13 + $0xb0] sm:$0xff]  ;;  %s7396_s26 = sld [smem:[%s7771_s0 + %s5771_s23]]   ;;  %s5773_s1 = smov 22  }
   0xf   :  { %393 = vmatpush.msra.mxu1 %v186_v10  ;;  %334 = vmatpush.msra.mxu2 %v173_v12  ;;  %v176_v17 = vld [vmem:[%s5800_s13 + $0x40] sm:$0xff]  ;;  %v195_v21 = vld [vmem:[%s5800_s13 + $0xd8] sm:$0xff]  ;;  %v194_v25 = vld [vmem:[%s5800_s13 + $0xd0] sm:$0xff]  ;;  %s7524_s30 = sld [smem:[%s7771_s0 + %s5772_s27]]   ;;  %s5774_s5 = smov 23  }
  0x10   :  { %314 = vmatpush.msrb.mxu0 %v169_v11  ;;  %354 = vmatpush.msra.mxu3 %v177_v13  ;;  %v184_v18 = vld [vmem:[%s5800_s13 + $0x80] sm:$0xff]  ;;  %v203_v22 = vld [vmem:[%s5800_s13 + $0x118] sm:$0xff]  ;;  %v202_v26 = vld [vmem:[%s5800_s13 + $0x110] sm:$0xff]  ;;  %s5783_s7 = smov 31  }
  0x11   :  { %394 = vmatpush.msra.mxu1 %v185_v14  ;;  %335 = vmatpush.msra.mxu2 %v172_v16  ;;  %v181_v27 = vld [vmem:[%s5800_s13 + $0x68] sm:$0xff]  ;;  %v180_v31 = vld [vmem:[%s5800_s13 + $0x60] sm:$0xff]  ;;  %v199_v40 = vld [vmem:[%s5800_s13 + $0xf8] sm:$0xff]  ;;  %s5267_s11 = sld [smem:[%s7771_s0 + %s5783_s7]]  }
  0x12   :  { %315 = vmatpush.msrb.mxu0 %v168_v15  ;;  %355 = vmatpush.msra.mxu3 %v176_v17  ;;  %v189_v28 = vld [vmem:[%s5800_s13 + $0xa8] sm:$0xff]  ;;  %v188_v32 = vld [vmem:[%s5800_s13 + $0xa0] sm:$0xff]  ;;  %v207_v41 = vld [vmem:[%s5800_s13 + $0x138] sm:$0xff] }
  0x13   :  { %395 = vmatpush.msra.mxu1 %v184_v18  ;;  %412 = vmatpush.msrb.mxu2 %v191_v20  ;;  %v193_v29 = vld [vmem:[%s5800_s13 + $0xc8] sm:$0xff]  ;;  %v192_v33 = vld [vmem:[%s5800_s13 + $0xc0] sm:$0xff]  ;;  %v211_v42 = vld [vmem:[%s5800_s13 + $0x158] sm:$0xff] }
  0x14   :  { %372 = vmatpush.msra.mxu0 %v183_v19  ;;  %432 = vmatpush.msrb.mxu3 %v195_v21  ;;  %v201_v30 = vld [vmem:[%s5800_s13 + $0x108] sm:$0xff]  ;;  %v200_v34 = vld [vmem:[%s5800_s13 + $0x100] sm:$0xff]  ;;  %v219_v43 = vld [vmem:[%s5800_s13 + $0x198] sm:$0xff] }
  0x15   :  { %472 = vmatpush.msrb.mxu1 %v203_v22  ;;  %413 = vmatpush.msrb.mxu2 %v190_v24  ;;  %v5731_v35 = vld [vmem:[%s5805_s17] ss:$0 sm:$0xff]  ;;  %v198_v44 = vld [vmem:[%s5800_s13 + $0xf0] sm:$0xff]  ;;  %v197_v48 = vld [vmem:[%s5800_s13 + $0xe8] sm:$0xff]  ;;  %s5762_s17 = smov 9  }
  0x16   :  { %373 = vmatpush.msra.mxu0 %v182_v23  ;;  %433 = vmatpush.msrb.mxu3 %v194_v25  ;;  %v206_v45 = vld [vmem:[%s5800_s13 + $0x130] sm:$0xff]  ;;  %v205_v49 = vld [vmem:[%s5800_s13 + $0x128] sm:$0xff]  ;;  %v196_v52 = vld [vmem:[%s5800_s13 + $0xe0] sm:$0xff]  ;;  %s5245_s20 = sld [smem:[%s7771_s0 + %s5762_s17]]  }
  0x17   :  { %473 = vmatpush.msrb.mxu1 %v202_v26  ;;  %414 = vmatpush.msrb.mxu2 %v189_v28  ;;  %v210_v46 = vld [vmem:[%s5800_s13 + $0x150] sm:$0xff]  ;;  %v209_v50 = vld [vmem:[%s5800_s13 + $0x148] sm:$0xff]  ;;  %v204_v53 = vld [vmem:[%s5800_s13 + $0x120] sm:$0xff] }
  0x18   :  { %374 = vmatpush.msra.mxu0 %v181_v27  ;;  %434 = vmatpush.msrb.mxu3 %v193_v29  ;;  %v218_v47 = vld [vmem:[%s5800_s13 + $0x190] sm:$0xff]  ;;  %v217_v51 = vld [vmem:[%s5800_s13 + $0x188] sm:$0xff]  ;;  %v208_v54 = vld [vmem:[%s5800_s13 + $0x140] sm:$0xff] }
  0x19   :  { %474 = vmatpush.msrb.mxu1 %v201_v30  ;;  %415 = vmatpush.msrb.mxu2 %v188_v32  ;;  %v216_v55 = vld [vmem:[%s5800_s13 + $0x180] sm:$0xff]  ;;  %v215_v56 = vld [vmem:[%s5800_s13 + $0x178] sm:$0xff]  ;;  %v214_v60 = vld [vmem:[%s5800_s13 + $0x170] sm:$0xff] }
  0x1a   :  { %375 = vmatpush.msra.mxu0 %v180_v31  ;;  %435 = vmatpush.msrb.mxu3 %v192_v33  ;;  %v223_v57 = vld [vmem:[%s5800_s13 + $0x1b8] sm:$0xff]  ;;  %v222_v61 = vld [vmem:[%s5800_s13 + $0x1b0] sm:$0xff]  ;;  %v213_v0 = vld [vmem:[%s5800_s13 + $0x168] sm:$0xff] }
  0x1b   :  { %475 = vmatpush.msrb.mxu1 %v200_v34  ;;  %v227_v58 = vld [vmem:[%s5800_s13 + $0x1d8] sm:$0xff]  ;;  %v226_v62 = vld [vmem:[%s5800_s13 + $0x1d0] sm:$0xff]  ;;  %v221_v1 = vld [vmem:[%s5800_s13 + $0x1a8] sm:$0xff] }
  0x1c   :  { %v235_v59 = vld [vmem:[%s5800_s13 + $0x218] sm:$0xff]  ;;  %v234_v63 = vld [vmem:[%s5800_s13 + $0x210] sm:$0xff]  ;;  %v225_v2 = vld [vmem:[%s5800_s13 + $0x1c8] sm:$0xff] }
  0x1d   :  { %v233_v3 = vld [vmem:[%s5800_s13 + $0x208] sm:$0xff]  ;;  %v212_v4 = vld [vmem:[%s5800_s13 + $0x160] sm:$0xff]  ;;  %v231_v8 = vld [vmem:[%s5800_s13 + $0x1f8] sm:$0xff] }
  0x1e   :  { %v220_v5 = vld [vmem:[%s5800_s13 + $0x1a0] sm:$0xff]  ;;  %v239_v9 = vld [vmem:[%s5800_s13 + $0x238] sm:$0xff]  ;;  %v230_v12 = vld [vmem:[%s5800_s13 + $0x1f0] sm:$0xff] }
  0x1f   :  { %v224_v6 = vld [vmem:[%s5800_s13 + $0x1c0] sm:$0xff]  ;;  %v243_v10 = vld [vmem:[%s5800_s13 + $0x258] sm:$0xff]  ;;  %v238_v13 = vld [vmem:[%s5800_s13 + $0x230] sm:$0xff] }
  0x20   :  { %v232_v7 = vld [vmem:[%s5800_s13 + $0x200] sm:$0xff]  ;;  %v251_v11 = vld [vmem:[%s5800_s13 + $0x298] sm:$0xff]  ;;  %v242_v14 = vld [vmem:[%s5800_s13 + $0x250] sm:$0xff] }
  0x21   :  { %v250_v15 = vld [vmem:[%s5800_s13 + $0x290] sm:$0xff]  ;;  %v229_v16 = vld [vmem:[%s5800_s13 + $0x1e8] sm:$0xff]  ;;  %v228_v20 = vld [vmem:[%s5800_s13 + $0x1e0] sm:$0xff] }
  0x22   :  { %v237_v17 = vld [vmem:[%s5800_s13 + $0x228] sm:$0xff]  ;;  %v236_v21 = vld [vmem:[%s5800_s13 + $0x220] sm:$0xff]  ;;  %v247_v24 = vld [vmem:[%s5800_s13 + $0x278] sm:$0xff] }
  0x23   :  { %v241_v18 = vld [vmem:[%s5800_s13 + $0x248] sm:$0xff]  ;;  %v240_v22 = vld [vmem:[%s5800_s13 + $0x240] sm:$0xff]  ;;  %v255_v25 = vld [vmem:[%s5800_s13 + $0x2b8] sm:$0xff] }
  0x24   :  { %v249_v19 = vld [vmem:[%s5800_s13 + $0x288] sm:$0xff]  ;;  %v248_v23 = vld [vmem:[%s5800_s13 + $0x280] sm:$0xff]  ;;  %v259_v26 = vld [vmem:[%s5800_s13 + $0x2d8] sm:$0xff] }
  0x25   :  { %v267_v27 = vld [vmem:[%s5800_s13 + $0x318] sm:$0xff]  ;;  %v246_v28 = vld [vmem:[%s5800_s13 + $0x270] sm:$0xff]  ;;  %v245_v32 = vld [vmem:[%s5800_s13 + $0x268] sm:$0xff] }
  0x26   :  { %v254_v29 = vld [vmem:[%s5800_s13 + $0x2b0] sm:$0xff]  ;;  %v253_v33 = vld [vmem:[%s5800_s13 + $0x2a8] sm:$0xff] }
  0x27   :  { %v258_v30 = vld [vmem:[%s5800_s13 + $0x2d0] sm:$0xff]  ;;  %v257_v34 = vld [vmem:[%s5800_s13 + $0x2c8] sm:$0xff] }
  0x28   :  { %v266_v31 = vld [vmem:[%s5800_s13 + $0x310] sm:$0xff] }
  0x88   :  { %v162_v36 = vpop.f32.mrf.mxu0 }
  0x89   :  { %v163_v37 = vadd.f32 %v5731_v35, %v162_v36  ;;  %v265_v35 = vld [vmem:[%s5800_s13 + $0x308] sm:$0xff]  ;;  %v244_v36 = vld [vmem:[%s5800_s13 + $0x260] sm:$0xff] }
  0x8b   :  { %vm165_vm2 = vcmp.ge.f32.partialorder %v163_v37, 0.0  ;;  %v166_v38 = vmul.f32 0.01, %v163_v37 }
  0x8d   :  { %v5848_v39 = vsel %vm165_vm2, %v163_v37, %v166_v38  ;;  %v252_v37 = vld [vmem:[%s5800_s13 + $0x2a0] sm:$0xff] }
  0x8e   :  { %5270 = vmatmul.msk.f32.vlgmr.msrb.gmra.mxu0 %vm296_vm3, %v5848_v39  ;;  %5271 = vmatmul.msk.f32.vlgmr.msra.gmra.mxu2 %vm296_vm3, %v5848_v39  ;;  %v256_v38 = vld [vmem:[%s5800_s13 + $0x2c0] sm:$0xff] }
  0x8f   :  { %5272 = vmatmul.msk.f32.vlgmr.msra.gmra.mxu3 %vm296_vm3, %v5848_v39  ;;  %5274 = vmatmul.msk.f32.vlgmr.msra.gmra.mxu1 %vm296_vm3, %v5848_v39 }
  0x90   :  { %452 = vmatpush.msrb.mxu0 %v199_v40  ;;  %492 = vmatpush.msra.mxu2 %v207_v41  ;;  %v264_v40 = vld [vmem:[%s5800_s13 + $0x300] sm:$0xff]  ;;  %v263_v41 = vld [vmem:[%s5800_s13 + $0x2f8] sm:$0xff] }
  0x91   :  { %512 = vmatpush.msra.mxu3 %v211_v42  ;;  %552 = vmatpush.msra.mxu1 %v219_v43  ;;  %v271_v42 = vld [vmem:[%s5800_s13 + $0x338] sm:$0xff] }
  0x92   :  { %453 = vmatpush.msrb.mxu0 %v198_v44  ;;  %493 = vmatpush.msra.mxu2 %v206_v45  ;;  %v275_v43 = vld [vmem:[%s5800_s13 + $0x358] sm:$0xff]  ;;  %v262_v45 = vld [vmem:[%s5800_s13 + $0x2f0] sm:$0xff] }
  0x93   :  { %513 = vmatpush.msra.mxu3 %v210_v46  ;;  %553 = vmatpush.msra.mxu1 %v218_v47  ;;  %v283_v44 = vld [vmem:[%s5800_s13 + $0x398] sm:$0xff]  ;;  %v270_v46 = vld [vmem:[%s5800_s13 + $0x330] sm:$0xff] }
  0x94   :  { %454 = vmatpush.msrb.mxu0 %v197_v48  ;;  %494 = vmatpush.msra.mxu2 %v205_v49  ;;  %v274_v47 = vld [vmem:[%s5800_s13 + $0x350] sm:$0xff]  ;;  %v261_v49 = vld [vmem:[%s5800_s13 + $0x2e8] sm:$0xff] }
  0x95   :  { %514 = vmatpush.msra.mxu3 %v209_v50  ;;  %554 = vmatpush.msra.mxu1 %v217_v51  ;;  %v282_v48 = vld [vmem:[%s5800_s13 + $0x390] sm:$0xff]  ;;  %v269_v50 = vld [vmem:[%s5800_s13 + $0x328] sm:$0xff] }
  0x96   :  { %5273 = vmatmul.msk.f32.vlgmr.msra.gmra.mxu0 %vm296_vm3, %v5848_v39  ;;  %5275 = vmatmul.msk.f32.vlgmr.msrb.gmra.mxu2 %vm296_vm3, %v5848_v39  ;;  %v273_v51 = vld [vmem:[%s5800_s13 + $0x348] sm:$0xff] }
  0x97   :  { %5276 = vmatmul.msk.f32.vlgmr.msrb.gmra.mxu3 %vm296_vm3, %v5848_v39  ;;  %5278 = vmatmul.msk.f32.vlgmr.msrb.gmra.mxu1 %vm296_vm3, %v5848_v39 }
  0x98   :  { %455 = vmatpush.msrb.mxu0 %v196_v52  ;;  %495 = vmatpush.msra.mxu2 %v204_v53  ;;  %v281_v52 = vld [vmem:[%s5800_s13 + $0x388] sm:$0xff]  ;;  %v260_v53 = vld [vmem:[%s5800_s13 + $0x2e0] sm:$0xff] }
  0x99   :  { %515 = vmatpush.msra.mxu3 %v208_v54  ;;  %555 = vmatpush.msra.mxu1 %v216_v55  ;;  %v268_v54 = vld [vmem:[%s5800_s13 + $0x320] sm:$0xff] }
  0x9a   :  { %532 = vmatpush.msra.mxu0 %v215_v56  ;;  %572 = vmatpush.msrb.mxu2 %v223_v57  ;;  %v272_v55 = vld [vmem:[%s5800_s13 + $0x340] sm:$0xff]  ;;  %v279_v57 = vld [vmem:[%s5800_s13 + $0x378] sm:$0xff] }
  0x9b   :  { %592 = vmatpush.msrb.mxu3 %v227_v58  ;;  %632 = vmatpush.msrb.mxu1 %v235_v59  ;;  %v280_v56 = vld [vmem:[%s5800_s13 + $0x380] sm:$0xff]  ;;  %v287_v58 = vld [vmem:[%s5800_s13 + $0x3b8] sm:$0xff] }
  0x9c   :  { %533 = vmatpush.msra.mxu0 %v214_v60  ;;  %573 = vmatpush.msrb.mxu2 %v222_v61  ;;  %v291_v59 = vld [vmem:[%s5800_s13 + $0x3d8] sm:$0xff]  ;;  %v278_v60 = vld [vmem:[%s5800_s13 + $0x370] sm:$0xff] }
  0x9d   :  { %593 = vmatpush.msrb.mxu3 %v226_v62  ;;  %633 = vmatpush.msrb.mxu1 %v234_v63  ;;  %v286_v61 = vld [vmem:[%s5800_s13 + $0x3b0] sm:$0xff]  ;;  %v5305_v63 = vld [vmem:[%s5981_s25 + $0x38] sm:$0xff] }
  0x9e   :  { %5277 = vmatmul.msk.f32.vlgmr.msrb.gmra.mxu0 %vm296_vm3, %v5848_v39  ;;  %5279 = vmatmul.msk.f32.vlgmr.msra.gmra.mxu2 %vm296_vm3, %v5848_v39  ;;  %v290_v62 = vld [vmem:[%s5800_s13 + $0x3d0] sm:$0xff] }
  0x9f   :  { %5280 = vmatmul.msk.f32.vlgmr.msra.gmra.mxu3 %vm296_vm3, %v5848_v39  ;;  %5282 = vmatmul.msk.f32.vlgmr.msra.gmra.mxu1 %vm296_vm3, %v5848_v39 }
  0xa0   :  { %534 = vmatpush.msra.mxu0 %v213_v0  ;;  %574 = vmatpush.msrb.mxu2 %v221_v1  ;;  %v277_v0 = vld [vmem:[%s5800_s13 + $0x368] sm:$0xff] }
  0xa1   :  { %594 = vmatpush.msrb.mxu3 %v225_v2  ;;  %634 = vmatpush.msrb.mxu1 %v233_v3  ;;  %v285_v1 = vld [vmem:[%s5800_s13 + $0x3a8] sm:$0xff]  ;;  %v276_v3 = vld [vmem:[%s5800_s13 + $0x360] sm:$0xff] }
  0xa2   :  { %535 = vmatpush.msra.mxu0 %v212_v4  ;;  %575 = vmatpush.msrb.mxu2 %v220_v5  ;;  %v289_v2 = vld [vmem:[%s5800_s13 + $0x3c8] sm:$0xff]  ;;  %v284_v4 = vld [vmem:[%s5800_s13 + $0x3a0] sm:$0xff] }
  0xa3   :  { %595 = vmatpush.msrb.mxu3 %v224_v6  ;;  %635 = vmatpush.msrb.mxu1 %v232_v7  ;;  %v288_v5 = vld [vmem:[%s5800_s13 + $0x3c0] sm:$0xff]  ;;  %v295_v6 = vld [vmem:[%s5800_s13 + $0x3f8] sm:$0xff] }
  0xa4   :  { %612 = vmatpush.msrb.mxu0 %v231_v8  ;;  %652 = vmatpush.msra.mxu2 %v239_v9  ;;  %v1075_v7 = vld [vmem:[%s5981_s25 + $0x18] sm:$0xff]  ;;  %v294_v8 = vld [vmem:[%s5800_s13 + $0x3f0] sm:$0xff] }
  0xa5   :  { %672 = vmatpush.msra.mxu3 %v243_v10  ;;  %712 = vmatpush.msra.mxu1 %v251_v11  ;;  %v1074_v9 = vld [vmem:[%s5981_s25 + $0x10] sm:$0xff]  ;;  %v293_v10 = vld [vmem:[%s5800_s13 + $0x3e8] sm:$0xff] }
  0xa6   :  { %5281 = vmatmul.msk.f32.vlgmr.msra.gmra.mxu0 %vm296_vm3, %v5848_v39  ;;  %5283 = vmatmul.msk.f32.vlgmr.msrb.gmra.mxu2 %vm296_vm3, %v5848_v39  ;;  %v1073_v11 = vld [vmem:[%s5981_s25 + $0x8] sm:$0xff] }
  0xa7   :  { %5284 = vmatmul.msk.f32.vlgmr.msrb.gmra.mxu3 %vm296_vm3, %v5848_v39  ;;  %5286 = vmatmul.msk.f32.vlgmr.msrb.gmra.mxu1 %vm296_vm3, %v5848_v39 }
  0xa8   :  { %613 = vmatpush.msrb.mxu0 %v230_v12  ;;  %653 = vmatpush.msra.mxu2 %v238_v13  ;;  %v292_v12 = vld [vmem:[%s5800_s13 + $0x3e0] sm:$0xff]  ;;  %s5761_s13 = smov 13  }
  0xa9   :  { %673 = vmatpush.msra.mxu3 %v242_v14  ;;  %713 = vmatpush.msra.mxu1 %v250_v15  ;;  %v1072_v13 = vld [vmem:[%s5981_s25] sm:$0xff]  ;;  %v5755_v14 = vmov 0.0   ;;  %v5304_v15 = vld [vmem:[%s5981_s25 + $0x30] sm:$0xff]  ;;  %s5249_s16 = sld [smem:[%s7771_s0 + %s5761_s13]]  }
  0xaa   :  { %614 = vmatpush.msrb.mxu0 %v229_v16  ;;  %654 = vmatpush.msra.mxu2 %v237_v17  ;;  %v5303_v16 = vld [vmem:[%s5981_s25 + $0x28] sm:$0xff]  ;;  %v5302_v17 = vld [vmem:[%s5981_s25 + $0x20] sm:$0xff] }
  0xab   :  { %674 = vmatpush.msra.mxu3 %v241_v18  ;;  %714 = vmatpush.msra.mxu1 %v249_v19  ;;  %v6025_v18 = vld [vmem:[%s5817_s21] ss:$0 sm:$0xff]  ;;  %s5763_s21 = smov 15  }
  0xac   :  { %615 = vmatpush.msrb.mxu0 %v228_v20  ;;  %655 = vmatpush.msra.mxu2 %v236_v21  ;;  %s6872_s24 = sld [smem:[%s7771_s0 + %s5763_s21]]  }
  0xad   :  { %675 = vmatpush.msra.mxu3 %v240_v22  ;;  %715 = vmatpush.msra.mxu1 %v248_v23 }
  0xae   :  { %5285 = vmatmul.msk.f32.vlgmr.msrb.gmra.mxu0 %vm296_vm3, %v5848_v39  ;;  %5287 = vmatmul.msk.f32.vlgmr.msra.gmra.mxu2 %vm296_vm3, %v5848_v39 }
  0xaf   :  { %5288 = vmatmul.msk.f32.vlgmr.msra.gmra.mxu3 %vm296_vm3, %v5848_v39  ;;  %5290 = vmatmul.msk.f32.vlgmr.msra.gmra.mxu1 %vm296_vm3, %v5848_v39 }
  0xb0   :  { %692 = vmatpush.msra.mxu0 %v247_v24  ;;  %732 = vmatpush.msrb.mxu2 %v255_v25 }
  0xb1   :  { %752 = vmatpush.msrb.mxu3 %v259_v26  ;;  %792 = vmatpush.msrb.mxu1 %v267_v27 }
  0xb2   :  { %693 = vmatpush.msra.mxu0 %v246_v28  ;;  %733 = vmatpush.msrb.mxu2 %v254_v29 }
  0xb3   :  { %753 = vmatpush.msrb.mxu3 %v258_v30  ;;  %793 = vmatpush.msrb.mxu1 %v266_v31 }
  0xb4   :  { %694 = vmatpush.msra.mxu0 %v245_v32  ;;  %734 = vmatpush.msrb.mxu2 %v253_v33 }
  0xb5   :  { %754 = vmatpush.msrb.mxu3 %v257_v34  ;;  %794 = vmatpush.msrb.mxu1 %v265_v35 }
  0xb6   :  { %695 = vmatpush.msra.mxu0 %v244_v36  ;;  %735 = vmatpush.msrb.mxu2 %v252_v37 }
  0xb7   :  { %755 = vmatpush.msrb.mxu3 %v256_v38  ;;  %795 = vmatpush.msrb.mxu1 %v264_v40 }
  0xb8   :  { %5289 = vmatmul.msk.f32.vlgmr.msra.gmra.mxu0 %vm296_vm3, %v5848_v39  ;;  %5291 = vmatmul.msk.f32.vlgmr.msrb.gmra.mxu2 %vm296_vm3, %v5848_v39 }
  0xb9   :  { %5292 = vmatmul.msk.f32.vlgmr.msrb.gmra.mxu3 %vm296_vm3, %v5848_v39  ;;  %5294 = vmatmul.msk.f32.vlgmr.msrb.gmra.mxu1 %vm296_vm3, %v5848_v39 }
  0xba   :  { %772 = vmatpush.msrb.mxu0 %v263_v41  ;;  %812 = vmatpush.msra.mxu2 %v271_v42 }
  0xbb   :  { %832 = vmatpush.msra.mxu3 %v275_v43  ;;  %872 = vmatpush.msra.mxu1 %v283_v44 }
  0xbc   :  { %773 = vmatpush.msrb.mxu0 %v262_v45  ;;  %813 = vmatpush.msra.mxu2 %v270_v46 }
  0xbd   :  { %833 = vmatpush.msra.mxu3 %v274_v47  ;;  %873 = vmatpush.msra.mxu1 %v282_v48 }
  0xbe   :  { %774 = vmatpush.msrb.mxu0 %v261_v49  ;;  %814 = vmatpush.msra.mxu2 %v269_v50 }
  0xbf   :  { %834 = vmatpush.msra.mxu3 %v273_v51  ;;  %874 = vmatpush.msra.mxu1 %v281_v52 }
  0xc0   :  { %775 = vmatpush.msrb.mxu0 %v260_v53  ;;  %815 = vmatpush.msra.mxu2 %v268_v54 }
  0xc1   :  { %835 = vmatpush.msra.mxu3 %v272_v55  ;;  %875 = vmatpush.msra.mxu1 %v280_v56 }
  0xc2   :  { %5293 = vmatmul.msk.f32.vlgmr.msrb.gmra.mxu0 %vm296_vm3, %v5848_v39  ;;  %5295 = vmatmul.msk.f32.vlgmr.msra.gmra.mxu2 %vm296_vm3, %v5848_v39 }
  0xc3   :  { %5296 = vmatmul.msk.f32.vlgmr.msra.gmra.mxu3 %vm296_vm3, %v5848_v39  ;;  %5298 = vmatmul.msk.f32.vlgmr.msra.gmra.mxu1 %vm296_vm3, %v5848_v39 }
  0xc4   :  { %852 = vmatpush.msra.mxu0 %v279_v57  ;;  %892 = vmatpush.msrb.mxu2 %v287_v58 }
  0xc5   :  { %912 = vmatpush.msrb.mxu3 %v291_v59  ;;  %5689 = vmatpush.msrb.mxu1 %v5305_v63 }
  0xc6   :  { %853 = vmatpush.msra.mxu0 %v278_v60  ;;  %893 = vmatpush.msrb.mxu2 %v286_v61 }
  0xc7   :  { %913 = vmatpush.msrb.mxu3 %v290_v62  ;;  %5690 = vmatpush.msrb.mxu1 %v5304_v15  ;;  %v5372_v62 = vld [vmem:[%s5981_s25 + $0x58] sm:$0xff] }
  0xc8   :  { %854 = vmatpush.msra.mxu0 %v277_v0  ;;  %894 = vmatpush.msrb.mxu2 %v285_v1 }
  0xc9   :  { %914 = vmatpush.msrb.mxu3 %v289_v2  ;;  %5691 = vmatpush.msrb.mxu1 %v5303_v16 }
  0xca   :  { %855 = vmatpush.msra.mxu0 %v276_v3  ;;  %895 = vmatpush.msrb.mxu2 %v284_v4 }
  0xcb   :  { %915 = vmatpush.msrb.mxu3 %v288_v5  ;;  %5297 = vmatmul.msk.f32.vlgmr.msra.gmra.mxu0 %vm296_vm3, %v5848_v39 }
  0xcc   :  { %5299 = vmatmul.msk.f32.vlgmr.msrb.gmra.mxu2 %vm296_vm3, %v5848_v39  ;;  %5300 = vmatmul.msk.f32.vlgmr.msrb.gmra.mxu3 %vm296_vm3, %v5848_v39 }
  0xcd   :  { %932 = vmatpush.msrb.mxu0 %v295_v6  ;;  %1305 = vmatpush.msra.mxu2 %v1075_v7 }
  0xce   :  { %5693 = vmatpush.msra.mxu3 %v1075_v7  ;;  %5692 = vmatpush.msrb.mxu1 %v5302_v17 }
  0xcf   :  { %933 = vmatpush.msrb.mxu0 %v294_v8  ;;  %1306 = vmatpush.msra.mxu2 %v1074_v9 }
  0xd0   :  { %5694 = vmatpush.msra.mxu3 %v1074_v9 }
  0xd1   :  { %934 = vmatpush.msrb.mxu0 %v293_v10  ;;  %1307 = vmatpush.msra.mxu2 %v1073_v11 }
  0xd2   :  { %5695 = vmatpush.msra.mxu3 %v1073_v11 }
  0xd3   :  { %935 = vmatpush.msrb.mxu0 %v292_v12  ;;  %1308 = vmatpush.msra.mxu2 %v1072_v13 }
  0xd4   :  { %5301 = vmatmul.msk.f32.vlgmr.msrb.gmra.mxu0 %vm296_vm3, %v5848_v39  ;;  %1309 = vmatmul.f32.vlgmr.msra.gmra.mxu2 %v5755_v14 }
  0xd5   :  { %1189 = vmatpush.msra.mxu0 %v5305_v63  ;;  %5696 = vmatpush.msra.mxu3 %v1072_v13 }
  0xd7   :  { %1190 = vmatpush.msra.mxu0 %v5304_v15  ;;  %1423 = vmatpush.msrb.mxu3 %v5372_v62 }
  0xd9   :  { %1191 = vmatpush.msra.mxu0 %v5303_v16 }
  0xdb   :  { %1192 = vmatpush.msra.mxu0 %v5302_v17 }
 0x10b   :  { %v317_v19 = vpop.f32.mrf.mxu0 }
 0x10c   :  { %v944_v20 = vadd.f32 %v6025_v18, %v317_v19  ;;  %v397_v27 = vpop.f32.mrf.mxu1 }
 0x10d   :  { %v948_v42 = vadd.f32 %v6025_v18, %v397_v27 }
 0x10e   :  { %vm976_vm4 = vcmp.ge.f32.partialorder %v944_v20, 0.0  ;;  %v1008_v39 = vmul.f32 0.01, %v944_v20 }
 0x10f   :  { %v1012_v49 = vmul.f32 0.01, %v948_v42  ;;  %vm980_vm9 = vcmp.ge.f32.partialorder %v948_v42, 0.0 }
 0x110   :  { %v1040_v21 = vsel %vm976_vm4, %v944_v20, %v1008_v39 }
 0x111   :  { %v337_v22 = vpop.f32.mrf.mxu2  ;;  %5306 = vmatmul.msk.f32.vlgmr.msra.gmra.mxu0 %vm296_vm3, %v1040_v21  ;;  %5338 = vmatmul.msk.f32.gmra.mxu2 %vm296_vm3, %v1040_v21  ;;  %v6073_v54 = vsel %vm980_vm9, %v948_v42, %v1012_v49 }
 0x112   :  { %v945_v23 = vadd.f32 %v6025_v18, %v337_v22  ;;  %v357_v24 = vpop.f32.mrf.mxu3  ;;  %v5371_v22 = vld [vmem:[%s5981_s25 + $0x50] sm:$0xff] }
 0x113   :  { %v377_v25 = vpop.f32.mrf.mxu0  ;;  %v946_v28 = vadd.f32 %v6025_v18, %v357_v24  ;;  %1424 = vmatpush.msrb.mxu3 %v5371_v22 }
 0x114   :  { %v1009_v26 = vmul.f32 0.01, %v945_v23  ;;  %vm977_vm5 = vcmp.ge.f32.partialorder %v945_v23, 0.0  ;;  %v947_v34 = vadd.f32 %v6025_v18, %v377_v25  ;;  %v6041_v35 = vpop.f32.mrf.mxu1 }
 0x115   :  { %v1010_v33 = vmul.f32 0.01, %v946_v28  ;;  %vm978_vm6 = vcmp.ge.f32.partialorder %v946_v28, 0.0  ;;  %v952_v39 = vadd.f32 %v6025_v18, %v6041_v35 }
 0x116   :  { %v6032_v29 = vsel %vm977_vm5, %v945_v23, %v1009_v26  ;;  %v1011_v41 = vmul.f32 0.01, %v947_v34  ;;  %vm979_vm7 = vcmp.ge.f32.partialorder %v947_v34, 0.0 }
 0x117   :  { %v6043_v36 = vsel %vm978_vm6, %v946_v28, %v1010_v33  ;;  %v1016_v25 = vmul.f32 0.01, %v952_v39  ;;  %vm984_vm6 = vcmp.ge.f32.partialorder %v952_v39, 0.0 }
 0x118   :  { %v6056_v43 = vsel %vm979_vm7, %v947_v34, %v1011_v41 }
 0x119   :  { %v417_v30 = vpop.f32.mrf.mxu2  ;;  %5307 = vmatmul.msk.f32.gmra.mxu0 %vm296_vm3, %v6032_v29  ;;  %5339 = vmatmul.msk.f32.gmra.mxu2 %vm296_vm3, %v6032_v29 }
 0x11a   :  { %v437_v31 = vpop.f32.mrf.mxu3  ;;  %v949_v51 = vadd.f32 %v6025_v18, %v417_v30  ;;  %v6140_v30 = vsel %vm984_vm6, %v952_v39, %v1016_v25 }
 0x11b   :  { %v6038_v32 = vpop.f32.mrf.mxu0  ;;  %v950_v3 = vadd.f32 %v6025_v18, %v437_v31 }
 0x11c   :  { %v6064_v45 = vpop.f32.mrf.mxu1  ;;  %v1013_v59 = vmul.f32 0.01, %v949_v51  ;;  %vm981_vm12 = vcmp.ge.f32.partialorder %v949_v51, 0.0  ;;  %v951_v12 = vadd.f32 %v6025_v18, %v6038_v32 }
 0x11d   :  { %v1014_v8 = vmul.f32 0.01, %v950_v3  ;;  %vm982_vm15 = vcmp.ge.f32.partialorder %v950_v3, 0.0 }
 0x11e   :  { %v6092_v4 = vsel %vm981_vm12, %v949_v51, %v1013_v59  ;;  %v1015_v17 = vmul.f32 0.01, %v951_v12  ;;  %vm983_vm4 = vcmp.ge.f32.partialorder %v951_v12, 0.0  ;;  %v5370_v51 = vld [vmem:[%s5981_s25 + $0x48] sm:$0xff] }
 0x11f   :  { %v6109_v13 = vsel %vm982_vm15, %v950_v3, %v1014_v8  ;;  %1425 = vmatpush.msrb.mxu3 %v5370_v51 }
 0x120   :  { %v6124_v21 = vsel %vm983_vm4, %v951_v12, %v1015_v17 }
 0x121   :  { %v6045_v37 = vpop.f32.mrf.mxu2  ;;  %5308 = vmatmul.msk.f32.gmra.mxu0 %vm296_vm3, %v6043_v36  ;;  %5340 = vmatmul.msk.f32.gmra.mxu2 %vm296_vm3, %v6043_v36 }
 0x122   :  { %v6051_v38 = vpop.f32.mrf.mxu3  ;;  %v953_v28 = vadd.f32 %v6025_v18, %v6045_v37 }
 0x123   :  { %v6053_v40 = vpop.f32.mrf.mxu0  ;;  %v954_v37 = vadd.f32 %v6025_v18, %v6051_v38 }
 0x124   :  { %v637_v60 = vpop.f32.mrf.mxu1  ;;  %v1017_v33 = vmul.f32 0.01, %v953_v28  ;;  %v955_v49 = vadd.f32 %v6025_v18, %v6053_v40 }
 0x125   :  { %v960_v1 = vadd.f32 %v6025_v18, %v637_v60 }
 0x126   :  { %vm987_vm12 = vcmp.ge.f32.partialorder %v955_v49, 0.0 }
 0x127   :  { %v1024_v7 = vmul.f32 0.01, %v960_v1  ;;  %vm992_vm14 = vcmp.ge.f32.partialorder %v960_v1, 0.0 }
 0x129   :  { %v6058_v44 = vpop.f32.mrf.mxu2  ;;  %5309 = vmatmul.msk.f32.gmra.mxu0 %vm296_vm3, %v6056_v43  ;;  %5341 = vmatmul.msk.f32.gmra.mxu2 %vm296_vm3, %v6056_v43  ;;  %v6101_v11 = vsel %vm992_vm14, %v960_v1, %v1024_v7 }
 0x12a   :  { %v597_v46 = vpop.f32.mrf.mxu3 }
 0x12b   :  { %v958_v47 = vadd.f32 %v6025_v18, %v597_v46  ;;  %v617_v48 = vpop.f32.mrf.mxu0 }
 0x12c   :  { %v959_v52 = vadd.f32 %v6025_v18, %v617_v48  ;;  %v717_v16 = vpop.f32.mrf.mxu1 }
 0x12d   :  { %vm990_vm8 = vcmp.ge.f32.partialorder %v958_v47, 0.0  ;;  %v1022_v50 = vmul.f32 0.01, %v958_v47  ;;  %v964_v19 = vadd.f32 %v6025_v18, %v717_v16 }
 0x12e   :  { %v1023_v58 = vmul.f32 0.01, %v959_v52  ;;  %vm991_vm11 = vcmp.ge.f32.partialorder %v959_v52, 0.0 }
 0x12f   :  { %v6069_v53 = vsel %vm990_vm8, %v958_v47, %v1022_v50  ;;  %v1028_v23 = vmul.f32 0.01, %v964_v19  ;;  %vm996_vm5 = vcmp.ge.f32.partialorder %v964_v19, 0.0  ;;  %vm985_vm8 = vcmp.ge.f32.partialorder %v953_v28, 0.0 }
 0x130   :  { %5320 = vmatmul.msk.f32.vlgmr.msrb.gmra.mxu1 %vm296_vm3, %v6069_v53  ;;  %v6085_v2 = vsel %vm991_vm11, %v959_v52, %v1023_v58  ;;  %v6155_v41 = vsel %vm985_vm8, %v953_v28, %v1017_v33  ;;  %v1018_v47 = vmul.f32 0.01, %v954_v37  ;;  %v956_v58 = vadd.f32 %v6025_v18, %v6064_v45 }
 0x131   :  { %v657_v55 = vpop.f32.mrf.mxu2  ;;  %5310 = vmatmul.msk.f32.gmra.mxu0 %vm296_vm3, %v6073_v54  ;;  %5342 = vmatmul.msk.f32.gmra.mxu2 %vm296_vm3, %v6073_v54  ;;  %v6132_v27 = vsel %vm996_vm5, %v964_v19, %v1028_v23  ;;  %v957_v45 = vadd.f32 %v6025_v18, %v6058_v44  ;;  %v5369_v19 = vld [vmem:[%s5981_s25 + $0x40] sm:$0xff]  ;;  %s5764_s25 = smov 10  }
 0x132   :  { %v961_v56 = vadd.f32 %v6025_v18, %v657_v55  ;;  %v677_v57 = vpop.f32.mrf.mxu3  ;;  %v1020_v62 = vmul.f32 0.01, %v956_v58  ;;  %vm988_vm14 = vcmp.ge.f32.partialorder %v956_v58, 0.0  ;;  %1426 = vmatpush.msrb.mxu3 %v5369_v19  ;;  %s6879_s28 = sld [smem:[%s7771_s0 + %s5764_s25]]   ;;  %s5780_s25 = smov 28  }
 0x133   :  { %v962_v63 = vadd.f32 %v6025_v18, %v677_v57  ;;  %v1021_v7 = vmul.f32 0.01, %v957_v45 }
 0x134   :  { %vm993_vm10 = vcmp.ge.f32.partialorder %v961_v56, 0.0  ;;  %v1025_v61 = vmul.f32 0.01, %v961_v56  ;;  %v6201_v3 = vsel %vm988_vm14, %v956_v58, %v1020_v62  ;;  %v1839_v58 = vld [vmem:[%s6310_s3 + $0x4b8] sm:$0xff] }
 0x135   :  { %v1026_v5 = vmul.f32 0.01, %v962_v63  ;;  %v697_v6 = vpop.f32.mrf.mxu0  ;;  %vm994_vm13 = vcmp.ge.f32.partialorder %v962_v63, 0.0  ;;  %v1703_v62 = vld [vmem:[%s6310_s3 + $0x78] sm:$0xff] }
 0x136   :  { %v6082_v0 = vsel %vm993_vm10, %v961_v56, %v1025_v61  ;;  %v963_v9 = vadd.f32 %v6025_v18, %v697_v6  ;;  %vm986_vm10 = vcmp.ge.f32.partialorder %v954_v37, 0.0  ;;  %v797_v55 = vpop.f32.mrf.mxu1  ;;  %v1019_v56 = vmul.f32 0.01, %v955_v49 }
 0x137   :  { %5355 = vmatmul.msk.f32.vlgmr.msra.gmra.mxu3 %vm296_vm3, %v6082_v0  ;;  %v6099_v10 = vsel %vm994_vm13, %v962_v63, %v1026_v5  ;;  %v6170_v50 = vsel %vm986_vm10, %v954_v37, %v1018_v47  ;;  %v968_v40 = vadd.f32 %v6025_v18, %v797_v55 }
 0x138   :  { %5321 = vmatmul.msk.f32.gmra.mxu1 %vm296_vm3, %v6085_v2  ;;  %v1027_v15 = vmul.f32 0.01, %v963_v9  ;;  %vm995_vm2 = vcmp.ge.f32.partialorder %v963_v9, 0.0  ;;  %v6186_v59 = vsel %vm987_vm12, %v955_v49, %v1019_v56  ;;  %v1692_v56 = vld [vmem:[%s6310_s3 + $0x20] sm:$0xff]  ;;  %2370 = vmatpush.msra.mxu3 %v1839_v58 }
 0x139   :  { %5311 = vmatmul.msk.f32.gmra.mxu0 %vm296_vm3, %v6092_v4  ;;  %5343 = vmatmul.msk.f32.gmra.mxu2 %vm296_vm3, %v6092_v4  ;;  %v1032_v60 = vmul.f32 0.01, %v968_v40  ;;  %vm1000_vm13 = vcmp.ge.f32.partialorder %v968_v40, 0.0 }
 0x13a   :  { %v6116_v20 = vsel %vm995_vm2, %v963_v9, %v1027_v15  ;;  %vm989_vm2 = vcmp.ge.f32.partialorder %v957_v45, 0.0 }
 0x13b   :  { %v737_v24 = vpop.f32.mrf.mxu2  ;;  %v6193_v1 = vsel %vm1000_vm13, %v968_v40, %v1032_v60  ;;  %v6214_v9 = vsel %vm989_vm2, %v957_v45, %v1021_v7  ;;  %v1690_v40 = vld [vmem:[%s6310_s3 + $0x10] sm:$0xff] }
 0x13c   :  { %v965_v26 = vadd.f32 %v6025_v18, %v737_v24  ;;  %v757_v32 = vpop.f32.mrf.mxu3  ;;  %v1702_v45 = vld [vmem:[%s6310_s3 + $0x70] sm:$0xff] }
 0x13d   :  { %v966_v34 = vadd.f32 %v6025_v18, %v757_v32 }
 0x13e   :  { %v1029_v31 = vmul.f32 0.01, %v965_v26  ;;  %vm997_vm7 = vcmp.ge.f32.partialorder %v965_v26, 0.0 }
 0x13f   :  { %5356 = vmatmul.msk.f32.gmra.mxu3 %vm296_vm3, %v6099_v10  ;;  %v1030_v42 = vmul.f32 0.01, %v966_v34  ;;  %v777_v46 = vpop.f32.mrf.mxu0  ;;  %vm998_vm9 = vcmp.ge.f32.partialorder %v966_v34, 0.0 }
 0x140   :  { %5322 = vmatmul.msk.f32.gmra.mxu1 %vm296_vm3, %v6101_v11  ;;  %v6147_v35 = vsel %vm997_vm7, %v965_v26, %v1029_v31  ;;  %v967_v48 = vadd.f32 %v6025_v18, %v777_v46  ;;  %v877_v22 = vpop.f32.mrf.mxu1 }
 0x141   :  { %5312 = vmatmul.msk.f32.gmra.mxu0 %vm296_vm3, %v6109_v13  ;;  %5344 = vmatmul.msk.f32.gmra.mxu2 %vm296_vm3, %v6109_v13  ;;  %v6162_v38 = vsel %vm998_vm9, %v966_v34, %v1030_v42  ;;  %v972_v23 = vadd.f32 %v6025_v18, %v877_v22 }
 0x142   :  { %v1031_v52 = vmul.f32 0.01, %v967_v48  ;;  %vm999_vm11 = vcmp.ge.f32.partialorder %v967_v48, 0.0 }
 0x143   :  { %v1036_v25 = vmul.f32 0.01, %v972_v23  ;;  %vm1004_vm6 = vcmp.ge.f32.partialorder %v972_v23, 0.0 }
 0x144   :  { %v6178_v57 = vsel %vm999_vm11, %v967_v48, %v1031_v52  ;;  %vm1944_vm11 = vcmask 523264  }
 0x145   :  { %v817_v61 = vpop.f32.mrf.mxu2  ;;  %v6240_v31 = vsel %vm1004_vm6, %v972_v23, %v1036_v25  ;;  %v1838_v25 = vld [vmem:[%s6310_s3 + $0x4b0] sm:$0xff] }
 0x146   :  { %v969_v63 = vadd.f32 %v6025_v18, %v817_v61  ;;  %v837_v6 = vpop.f32.mrf.mxu3  ;;  %v1688_v61 = vld [vmem:[%s6310_s3] sm:$0xff]  ;;  %2371 = vmatpush.msra.mxu3 %v1838_v25 }
 0x147   :  { %5357 = vmatmul.msk.f32.gmra.mxu3 %vm296_vm3, %v6116_v20  ;;  %v970_v8 = vadd.f32 %v6025_v18, %v837_v6 }
 0x148   :  { %5323 = vmatmul.msk.f32.gmra.mxu1 %vm296_vm3, %v6082_v0  ;;  %v1033_v5 = vmul.f32 0.01, %v969_v63  ;;  %vm1001_vm15 = vcmp.ge.f32.partialorder %v969_v63, 0.0  ;;  %v857_v15 = vpop.f32.mrf.mxu0 }
 0x149   :  { %5313 = vmatmul.msk.f32.gmra.mxu0 %vm296_vm3, %v6124_v21  ;;  %5345 = vmatmul.msk.f32.gmra.mxu2 %vm296_vm3, %v6124_v21  ;;  %v1034_v12 = vmul.f32 0.01, %v970_v8  ;;  %vm1002_vm4 = vcmp.ge.f32.partialorder %v970_v8, 0.0  ;;  %v971_v16 = vadd.f32 %v6025_v18, %v857_v15 }
 0x14a   :  { %v6208_v44 = vsel %vm1001_vm15, %v969_v63, %v1033_v5  ;;  %v1700_v5 = vld [vmem:[%s6310_s3 + $0x60] sm:$0xff] }
 0x14b   :  { %v6221_v17 = vsel %vm1002_vm4, %v970_v8, %v1034_v12  ;;  %v1035_v39 = vmul.f32 0.01, %v971_v16  ;;  %vm1003_vm5 = vcmp.ge.f32.partialorder %v971_v16, 0.0  ;;  %v1699_v8 = vld [vmem:[%s6310_s3 + $0x58] sm:$0xff]  ;;  %v1698_v12 = vld [vmem:[%s6310_s3 + $0x50] sm:$0xff] }
 0x14d   :  { %v6231_v24 = vsel %vm1003_vm5, %v971_v16, %v1035_v39  ;;  %v1697_v16 = vld [vmem:[%s6310_s3 + $0x48] sm:$0xff] }
 0x14f   :  { %5358 = vmatmul.msk.f32.gmra.mxu3 %vm296_vm3, %v6132_v27  ;;  %v897_v26 = vpop.f32.mrf.mxu2  ;;  %v917_v33 = vpop.f32.mrf.mxu3 }
 0x150   :  { %5324 = vmatmul.msk.f32.gmra.mxu1 %vm296_vm3, %v6099_v10  ;;  %v973_v28 = vadd.f32 %v6025_v18, %v897_v26  ;;  %v974_v34 = vadd.f32 %v6025_v18, %v917_v33 }
 0x151   :  { %5314 = vmatmul.msk.f32.gmra.mxu0 %vm296_vm3, %v6140_v30  ;;  %5346 = vmatmul.msk.f32.gmra.mxu2 %vm296_vm3, %v6140_v30  ;;  %v937_v47 = vpop.f32.mrf.mxu0 }
 0x152   :  { %v1037_v32 = vmul.f32 0.01, %v973_v28  ;;  %vm1005_vm7 = vcmp.ge.f32.partialorder %v973_v28, 0.0  ;;  %v1038_v42 = vmul.f32 0.01, %v974_v34  ;;  %vm1006_vm8 = vcmp.ge.f32.partialorder %v974_v34, 0.0 }
 0x153   :  { %v975_v48 = vadd.f32 %v6025_v18, %v937_v47 }
 0x154   :  { %v6249_v37 = vsel %vm1005_vm7, %v973_v28, %v1037_v32  ;;  %v6255_v46 = vsel %vm1006_vm8, %v974_v34, %v1038_v42 }
 0x155   :  { %v1039_v49 = vmul.f32 0.01, %v975_v48  ;;  %vm1007_vm9 = vcmp.ge.f32.partialorder %v975_v48, 0.0 }
 0x157   :  { %5359 = vmatmul.msk.f32.gmra.mxu3 %vm296_vm3, %v6147_v35  ;;  %v1310_v63 = vpop.f32.mrf.mxu2 }
 0x158   :  { %5325 = vmatmul.msk.f32.gmra.mxu1 %vm296_vm3, %v6116_v20 }
 0x159   :  { %5315 = vmatmul.msk.f32.gmra.mxu0 %vm296_vm3, %v6155_v41  ;;  %5347 = vmatmul.msk.f32.gmra.mxu2 %vm296_vm3, %v6155_v41 }
 0x15f   :  { %5360 = vmatmul.msk.f32.gmra.mxu3 %vm296_vm3, %v6162_v38 }
 0x160   :  { %5326 = vmatmul.msk.f32.gmra.mxu1 %vm296_vm3, %v6132_v27 }
 0x161   :  { %5316 = vmatmul.msk.f32.gmra.mxu0 %vm296_vm3, %v6170_v50  ;;  %5348 = vmatmul.msk.f32.gmra.mxu2 %vm296_vm3, %v6170_v50 }
 0x167   :  { %5361 = vmatmul.msk.f32.gmra.mxu3 %vm296_vm3, %v6178_v57 }
 0x168   :  { %5327 = vmatmul.msk.f32.gmra.mxu1 %vm296_vm3, %v6147_v35 }
 0x169   :  { %5317 = vmatmul.msk.f32.gmra.mxu0 %vm296_vm3, %v6186_v59  ;;  %5349 = vmatmul.msk.f32.gmra.mxu2 %vm296_vm3, %v6186_v59 }
 0x16f   :  { %5362 = vmatmul.msk.f32.gmra.mxu3 %vm296_vm3, %v6193_v1 }
 0x170   :  { %5328 = vmatmul.msk.f32.gmra.mxu1 %vm296_vm3, %v6162_v38 }
 0x171   :  { %5318 = vmatmul.msk.f32.gmra.mxu0 %vm296_vm3, %v6201_v3  ;;  %5350 = vmatmul.msk.f32.gmra.mxu2 %vm296_vm3, %v6201_v3 }
 0x177   :  { %5363 = vmatmul.msk.f32.gmra.mxu3 %vm296_vm3, %v6208_v44 }
 0x178   :  { %5329 = vmatmul.msk.f32.gmra.mxu1 %vm296_vm3, %v6178_v57 }
 0x179   :  { %5319 = vmatmul.msk.f32.gmra.mxu0 %vm296_vm3, %v6214_v9  ;;  %5351 = vmatmul.msk.f32.gmra.mxu2 %vm296_vm3, %v6214_v9 }
 0x17f   :  { %5364 = vmatmul.msk.f32.gmra.mxu3 %vm296_vm3, %v6221_v17 }
 0x180   :  { %5330 = vmatmul.msk.f32.gmra.mxu1 %vm296_vm3, %v6193_v1 }
 0x181   :  { %5352 = vmatmul.msk.f32.gmra.mxu2 %vm296_vm3, %v6069_v53 }
 0x187   :  { %5365 = vmatmul.msk.f32.gmra.mxu3 %vm296_vm3, %v6231_v24 }
 0x188   :  { %5331 = vmatmul.msk.f32.gmra.mxu1 %vm296_vm3, %v6208_v44 }
 0x189   :  { %5353 = vmatmul.msk.f32.gmra.mxu2 %vm296_vm3, %v6085_v2 }
 0x18f   :  { %5366 = vmatmul.msk.f32.gmra.mxu3 %vm296_vm3, %v6240_v31 }
 0x190   :  { %5332 = vmatmul.msk.f32.gmra.mxu1 %vm296_vm3, %v6221_v17 }
 0x191   :  { %5354 = vmatmul.msk.f32.gmra.mxu2 %vm296_vm3, %v6101_v11 }
 0x194   :  { %v1313_v7 = vpop.f32.mrf.mxu2 }
 0x197   :  { %5367 = vmatmul.msk.f32.gmra.mxu3 %vm296_vm3, %v6249_v37 }
 0x198   :  { %5333 = vmatmul.msk.f32.gmra.mxu1 %vm296_vm3, %v6231_v24 }
 0x19c   :  { %v1316_v19 = vpop.f32.mrf.mxu2 }
 0x19f   :  { %5368 = vmatmul.msk.f32.gmra.mxu3 %vm296_vm3, %v6255_v46 }
 0x1a0   :  { %5334 = vmatmul.msk.f32.gmra.mxu1 %vm296_vm3, %v6240_v31 }
 0x1a4   :  { %v1319_v22 = vpop.f32.mrf.mxu2 }
 0x1a7   :  { %5373 = vmatmul.msk.f32.vlgmr.msrb.gmra.mxu3 %vm296_vm3, %v6032_v29  ;;  %v6275_v29 = vsel %vm1007_vm9, %v975_v48, %v1039_v49 }
 0x1a8   :  { %5335 = vmatmul.msk.f32.gmra.mxu1 %vm296_vm3, %v6249_v37 }
 0x1ac   :  { %v6363_v34 = vpop.f32.mrf.mxu2 }
 0x1af   :  { %5374 = vmatmul.msk.f32.gmra.mxu3 %vm296_vm3, %v6043_v36 }
 0x1b0   :  { %5336 = vmatmul.msk.f32.gmra.mxu1 %vm296_vm3, %v6255_v46 }
 0x1b7   :  { %5375 = vmatmul.msk.f32.gmra.mxu3 %vm296_vm3, %v6056_v43 }
 0x1b8   :  { %5337 = vmatmul.msk.f32.gmra.mxu1 %vm296_vm3, %v6275_v29 }
 0x1ba   :  { %v6281_v51 = vpop.f32.mrf.mxu3 }
 0x1bf   :  { %5376 = vmatmul.msk.f32.gmra.mxu3 %vm296_vm3, %v6073_v54 }
 0x1c2   :  { %v6285_v18 = vpop.f32.mrf.mxu3 }
 0x1c7   :  { %5377 = vmatmul.msk.f32.gmra.mxu3 %vm296_vm3, %v6092_v4 }
 0x1ca   :  { %v6289_v36 = vpop.f32.mrf.mxu3 }
 0x1cf   :  { %5378 = vmatmul.msk.f32.gmra.mxu3 %vm296_vm3, %v6109_v13 }
 0x1d2   :  { %v6293_v52 = vpop.f32.mrf.mxu3 }
 0x1d7   :  { %5379 = vmatmul.msk.f32.gmra.mxu3 %vm296_vm3, %v6124_v21  ;;  %v1695_v21 = vld [vmem:[%s6310_s3 + $0x38] sm:$0xff] }
 0x1d8   :  { %1956 = vmatpush.msrb.mxu0 %v1695_v21  ;;  %v1710_v21 = vld [vmem:[%s6310_s3 + $0xb0] sm:$0xff] }
 0x1da   :  { %v6297_v43 = vpop.f32.mrf.mxu3 }
 0x1df   :  { %5380 = vmatmul.msk.f32.gmra.mxu3 %vm296_vm3, %v6140_v30  ;;  %v1694_v30 = vld [vmem:[%s6310_s3 + $0x30] sm:$0xff] }
 0x1e0   :  { %1957 = vmatpush.msrb.mxu0 %v1694_v30 }
 0x1e2   :  { %v6301_v54 = vpop.f32.mrf.mxu3 }
 0x1e7   :  { %5381 = vmatmul.msk.f32.gmra.mxu3 %vm296_vm3, %v6155_v41  ;;  %v1693_v41 = vld [vmem:[%s6310_s3 + $0x28] sm:$0xff] }
 0x1e8   :  { %1958 = vmatpush.msrb.mxu0 %v1693_v41  ;;  %v1709_v41 = vld [vmem:[%s6310_s3 + $0xa8] sm:$0xff] }
 0x1ea   :  { %v6305_v4 = vpop.f32.mrf.mxu3  ;;  %1959 = vmatpush.msrb.mxu0 %v1692_v56 }
 0x1ef   :  { %5382 = vmatmul.msk.f32.gmra.mxu3 %vm296_vm3, %v6170_v50  ;;  %v1691_v50 = vld [vmem:[%s6310_s3 + $0x18] sm:$0xff] }
 0x1f0   :  { %1960 = vmatpush.msrb.mxu0 %v1691_v50 }
 0x1f2   :  { %v6314_v13 = vpop.f32.mrf.mxu3  ;;  %1961 = vmatpush.msrb.mxu0 %v1690_v40  ;;  %v6373_v40 = vpop.f32.mrf.mxu2 }
 0x1f7   :  { %5383 = vmatmul.msk.f32.gmra.mxu3 %vm296_vm3, %v6186_v59  ;;  %v1689_v59 = vld [vmem:[%s6310_s3 + $0x8] sm:$0xff] }
 0x1f8   :  { %1962 = vmatpush.msrb.mxu0 %v1689_v59  ;;  %v1707_v59 = vld [vmem:[%s6310_s3 + $0x98] sm:$0xff] }
 0x1fa   :  { %v6321_v55 = vpop.f32.mrf.mxu3  ;;  %1963 = vmatpush.msrb.mxu0 %v1688_v61 }
 0x1fc   :  { %1979 = vmatpush.msra.mxu0 %v1703_v62 }
 0x1fe   :  { %1980 = vmatpush.msra.mxu0 %v1702_v45  ;;  %v1706_v45 = vld [vmem:[%s6310_s3 + $0x90] sm:$0xff] }
 0x1ff   :  { %5384 = vmatmul.msk.f32.gmra.mxu3 %vm296_vm3, %v6201_v3  ;;  %v1701_v3 = vld [vmem:[%s6310_s3 + $0x68] sm:$0xff] }
 0x200   :  { %1981 = vmatpush.msra.mxu0 %v1701_v3 }
 0x202   :  { %v6330_v60 = vpop.f32.mrf.mxu3  ;;  %1982 = vmatpush.msra.mxu0 %v1700_v5  ;;  %v1705_v5 = vld [vmem:[%s6310_s3 + $0x88] sm:$0xff] }
 0x204   :  { %1983 = vmatpush.msra.mxu0 %v1699_v8  ;;  %v1704_v8 = vld [vmem:[%s6310_s3 + $0x80] sm:$0xff] }
 0x206   :  { %1984 = vmatpush.msra.mxu0 %v1698_v12 }
 0x207   :  { %5385 = vmatmul.msk.f32.gmra.mxu3 %vm296_vm3, %v6214_v9  ;;  %v1696_v9 = vld [vmem:[%s6310_s3 + $0x40] sm:$0xff] }
 0x208   :  { %1985 = vmatpush.msra.mxu0 %v1697_v16  ;;  %v1719_v16 = vld [vmem:[%s6310_s3 + $0xf8] sm:$0xff] }
 0x20a   :  { %v6339_v6 = vpop.f32.mrf.mxu3  ;;  %1986 = vmatpush.msra.mxu0 %v1696_v9  ;;  %v6387_v9 = vpop.f32.mrf.mxu2 }
 0x20f   :  { %5386 = vmatmul.msk.f32.gmra.mxu3 %vm296_vm3, %v6069_v53  ;;  %v1194_v53 = vpop.f32.mrf.mxu0 }
 0x210   :  { %v1311_v26 = vadd.f32 %v1310_v63, %v1194_v53  ;;  %v1718_v53 = vld [vmem:[%s6310_s3 + $0xf0] sm:$0xff] }
 0x212   :  { %v6345_v15 = vpop.f32.mrf.mxu3 }
 0x217   :  { %5387 = vmatmul.msk.f32.gmra.mxu3 %vm296_vm3, %v6085_v2  ;;  %v6361_v2 = vld [vmem:[%s6268_s29] ss:$0 sm:$0xff]  ;;  %v1197_v32 = vpop.f32.mrf.mxu0 }
 0x218   :  { %v1314_v47 = vadd.f32 %v1313_v7, %v1197_v32  ;;  %v1717_v32 = vld [vmem:[%s6310_s3 + $0xe8] sm:$0xff] }
 0x21a   :  { %v6351_v39 = vpop.f32.mrf.mxu3 }
 0x21f   :  { %5388 = vmatmul.msk.f32.gmra.mxu3 %vm296_vm3, %v6101_v11  ;;  %v1200_v56 = vpop.f32.mrf.mxu0 }
 0x220   :  { %v1317_v61 = vadd.f32 %v1316_v19, %v1200_v56  ;;  %v1726_v56 = vld [vmem:[%s6310_s3 + $0x130] sm:$0xff] }
 0x222   :  { %v6355_v23 = vpop.f32.mrf.mxu3 }
 0x227   :  { %5389 = vmatmul.msk.f32.gmra.mxu3 %vm296_vm3, %v6082_v0  ;;  %v1711_v0 = vld [vmem:[%s6310_s3 + $0xb8] sm:$0xff] }
 0x22a   :  { %v1428_v28 = vpop.f32.mrf.mxu3 }
 0x22b   :  { %v1524_v33 = vadd.f32 %v1428_v28, %v1311_v26  ;;  %v1837_v28 = vld [vmem:[%s6310_s3 + $0x4a8] sm:$0xff] }
 0x22c   :  { %2372 = vmatpush.msra.mxu3 %v1837_v28  ;;  %v1836_v28 = vld [vmem:[%s6310_s3 + $0x4a0] sm:$0xff] }
 0x22d   :  { %v1560_v11 = vadd.f32 %v6361_v2, %v1524_v33 }
 0x22e   :  { %2373 = vmatpush.msra.mxu3 %v1836_v28 }
 0x22f   :  { %vm1592_vm10 = vcmp.ge.f32.partialorder %v1560_v11, 0.0  ;;  %v1624_v42 = vmul.f32 0.01, %v1560_v11  ;;  %5390 = vmatmul.msk.f32.gmra.mxu3 %vm296_vm3, %v6099_v10  ;;  %v1708_v10 = vld [vmem:[%s6310_s3 + $0xa0] sm:$0xff] }
 0x231   :  { %v1656_v48 = vsel %vm1592_vm10, %v1560_v11, %v1624_v42  ;;  %v1715_v11 = vld [vmem:[%s6310_s3 + $0xd8] sm:$0xff]  ;;  %v1714_v42 = vld [vmem:[%s6310_s3 + $0xd0] sm:$0xff] }
 0x232   :  { %v1431_v49 = vpop.f32.mrf.mxu3  ;;  %5404 = vmatmul.msk.f32.vlgmr.msrb.gmra.mxu0 %vm1944_vm11, %v1656_v48  ;;  %v1713_v48 = vld [vmem:[%s6310_s3 + $0xc8] sm:$0xff] }
 0x233   :  { %v1525_v30 = vadd.f32 %v1431_v49, %v1314_v47  ;;  %2002 = vmatpush.msrb.mxu0 %v1711_v0  ;;  %v6399_v0 = vpop.f32.mrf.mxu2 }
 0x235   :  { %v1561_v50 = vadd.f32 %v6361_v2, %v1525_v30  ;;  %2003 = vmatpush.msrb.mxu0 %v1710_v21  ;;  %v1712_v21 = vld [vmem:[%s6310_s3 + $0xc0] sm:$0xff]  ;;  %v1727_v30 = vld [vmem:[%s6310_s3 + $0x138] sm:$0xff] }
 0x237   :  { %vm1593_vm12 = vcmp.ge.f32.partialorder %v1561_v50, 0.0  ;;  %v1625_v58 = vmul.f32 0.01, %v1561_v50  ;;  %2004 = vmatpush.msrb.mxu0 %v1709_v41  ;;  %5391 = vmatmul.msk.f32.gmra.mxu3 %vm296_vm3, %v6116_v20  ;;  %v1203_v20 = vpop.f32.mrf.mxu0 }
 0x238   :  { %v1320_v25 = vadd.f32 %v1319_v22, %v1203_v20  ;;  %v1735_v20 = vld [vmem:[%s6310_s3 + $0x178] sm:$0xff] }
 0x239   :  { %v1657_v62 = vsel %vm1593_vm12, %v1561_v50, %v1625_v58  ;;  %2005 = vmatpush.msrb.mxu0 %v1708_v10  ;;  %v1725_v58 = vld [vmem:[%s6310_s3 + $0x128] sm:$0xff] }
 0x23a   :  { %v1434_v63 = vpop.f32.mrf.mxu3  ;;  %5405 = vmatmul.msk.f32.vlgmr.msra.gmra.mxu0 %vm1944_vm11, %v1657_v62  ;;  %v1723_v62 = vld [vmem:[%s6310_s3 + $0x118] sm:$0xff] }
 0x23b   :  { %v1526_v3 = vadd.f32 %v1434_v63, %v1317_v61  ;;  %2006 = vmatpush.msrb.mxu0 %v1707_v59  ;;  %v6410_v59 = vpop.f32.mrf.mxu2 }
 0x23d   :  { %v1562_v7 = vadd.f32 %v6361_v2, %v1526_v3  ;;  %2007 = vmatpush.msrb.mxu0 %v1706_v45  ;;  %v1721_v3 = vld [vmem:[%s6310_s3 + $0x108] sm:$0xff] }
 0x23f   :  { %vm1594_vm13 = vcmp.ge.f32.partialorder %v1562_v7, 0.0  ;;  %v1626_v12 = vmul.f32 0.01, %v1562_v7  ;;  %2008 = vmatpush.msrb.mxu0 %v1705_v5  ;;  %5392 = vmatmul.msk.f32.gmra.mxu3 %vm296_vm3, %v6132_v27  ;;  %v1716_v27 = vld [vmem:[%s6310_s3 + $0xe0] sm:$0xff] }
 0x241   :  { %v1658_v19 = vsel %vm1594_vm13, %v1562_v7, %v1626_v12  ;;  %2009 = vmatpush.msrb.mxu0 %v1704_v8  ;;  %v1720_v7 = vld [vmem:[%s6310_s3 + $0x100] sm:$0xff] }
 0x242   :  { %v1437_v26 = vpop.f32.mrf.mxu3  ;;  %5406 = vmatmul.msk.f32.vlgmr.msrb.gmra.mxu0 %vm1944_vm11, %v1658_v19 }
 0x243   :  { %2025 = vmatpush.msra.mxu0 %v1719_v16  ;;  %v1527_v33 = vadd.f32 %v1437_v26, %v1320_v25  ;;  %v6420_v8 = vpop.f32.mrf.mxu2  ;;  %v1734_v16 = vld [vmem:[%s6310_s3 + $0x170] sm:$0xff]  ;;  %v1733_v25 = vld [vmem:[%s6310_s3 + $0x168] sm:$0xff] }
 0x245   :  { %2026 = vmatpush.msra.mxu0 %v1718_v53  ;;  %v1563_v22 = vadd.f32 %v6361_v2, %v1527_v33 }
 0x247   :  { %2027 = vmatpush.msra.mxu0 %v1717_v32  ;;  %5393 = vmatmul.msk.f32.gmra.mxu3 %vm296_vm3, %v6147_v35  ;;  %v1627_v49 = vmul.f32 0.01, %v1563_v22  ;;  %vm1595_vm14 = vcmp.ge.f32.partialorder %v1563_v22, 0.0  ;;  %v1206_v35 = vpop.f32.mrf.mxu0  ;;  %v1731_v32 = vld [vmem:[%s6310_s3 + $0x158] sm:$0xff] }
 0x248   :  { %v1323_v50 = vadd.f32 %v6363_v34, %v1206_v35  ;;  %v1722_v34 = vld [vmem:[%s6310_s3 + $0x110] sm:$0xff] }
 0x249   :  { %2028 = vmatpush.msra.mxu0 %v1716_v27  ;;  %v1659_v41 = vsel %vm1595_vm14, %v1563_v22, %v1627_v49  ;;  %v1730_v27 = vld [vmem:[%s6310_s3 + $0x150] sm:$0xff]  ;;  %v1729_v22 = vld [vmem:[%s6310_s3 + $0x148] sm:$0xff] }
 0x24a   :  { %v1440_v47 = vpop.f32.mrf.mxu3 }
 0x24b   :  { %2029 = vmatpush.msra.mxu0 %v1715_v11  ;;  %v1528_v61 = vadd.f32 %v1440_v47, %v1323_v50  ;;  %v6436_v33 = vpop.f32.mrf.mxu2  ;;  %v1728_v47 = vld [vmem:[%s6310_s3 + $0x140] sm:$0xff] }
 0x24d   :  { %2030 = vmatpush.msra.mxu0 %v1714_v42  ;;  %v1564_v63 = vadd.f32 %v6361_v2, %v1528_v61  ;;  %v1739_v61 = vld [vmem:[%s6310_s3 + $0x198] sm:$0xff] }
 0x24f   :  { %2031 = vmatpush.msra.mxu0 %v1713_v48  ;;  %5394 = vmatmul.msk.f32.gmra.mxu3 %vm296_vm3, %v6162_v38  ;;  %v1724_v38 = vld [vmem:[%s6310_s3 + $0x120] sm:$0xff]  ;;  %v1628_v5 = vmul.f32 0.01, %v1564_v63  ;;  %vm1596_vm15 = vcmp.ge.f32.partialorder %v1564_v63, 0.0  ;;  %v1743_v48 = vld [vmem:[%s6310_s3 + $0x1b8] sm:$0xff] }
 0x251   :  { %2032 = vmatpush.msra.mxu0 %v1712_v21  ;;  %v1660_v12 = vsel %vm1596_vm15, %v1564_v63, %v1628_v5  ;;  %v1742_v21 = vld [vmem:[%s6310_s3 + $0x1b0] sm:$0xff]  ;;  %v1736_v5 = vld [vmem:[%s6310_s3 + $0x180] sm:$0xff] }
 0x252   :  { %5407 = vmatmul.msk.f32.vlgmr.msra.gmra.mxu0 %vm1944_vm11, %v1659_v41  ;;  %v1443_v10 = vpop.f32.mrf.mxu3 }
 0x253   :  { %2048 = vmatpush.msrb.mxu0 %v1727_v30  ;;  %v6450_v30 = vpop.f32.mrf.mxu2 }
 0x255   :  { %2049 = vmatpush.msrb.mxu0 %v1726_v56  ;;  %v1741_v56 = vld [vmem:[%s6310_s3 + $0x1a8] sm:$0xff] }
 0x257   :  { %2050 = vmatpush.msrb.mxu0 %v1725_v58  ;;  %5395 = vmatmul.msk.f32.gmra.mxu3 %vm296_vm3, %v6178_v57  ;;  %v1209_v57 = vpop.f32.mrf.mxu0  ;;  %v6457_v58 = vpop.f32.mrf.mxu1 }
 0x258   :  { %v1326_v19 = vadd.f32 %v6373_v40, %v1209_v57 }
 0x259   :  { %2051 = vmatpush.msrb.mxu0 %v1724_v38  ;;  %v1738_v38 = vld [vmem:[%s6310_s3 + $0x190] sm:$0xff] }
 0x25a   :  { %v1446_v45 = vpop.f32.mrf.mxu3  ;;  %v1529_v26 = vadd.f32 %v1443_v10, %v1326_v19  ;;  %v1740_v10 = vld [vmem:[%s6310_s3 + $0x1a0] sm:$0xff] }
 0x25b   :  { %2052 = vmatpush.msrb.mxu0 %v1723_v62  ;;  %v1823_v62 = vld [vmem:[%s6310_s3 + $0x438] sm:$0xff] }
 0x25c   :  { %v1565_v40 = vadd.f32 %v6361_v2, %v1529_v26  ;;  %2324 = vmatpush.msra.mxu1 %v1823_v62 }
 0x25d   :  { %2053 = vmatpush.msrb.mxu0 %v1722_v34  ;;  %v1737_v34 = vld [vmem:[%s6310_s3 + $0x188] sm:$0xff] }
 0x25e   :  { %v1629_v42 = vmul.f32 0.01, %v1565_v40  ;;  %vm1597_vm2 = vcmp.ge.f32.partialorder %v1565_v40, 0.0 }
 0x25f   :  { %2054 = vmatpush.msrb.mxu0 %v1721_v3  ;;  %5396 = vmatmul.msk.f32.gmra.mxu3 %vm296_vm3, %v6193_v1  ;;  %v1732_v1 = vld [vmem:[%s6310_s3 + $0x160] sm:$0xff]  ;;  %v6474_v57 = vpop.f32.mrf.mxu1 }
 0x260   :  { %v1661_v49 = vsel %vm1597_vm2, %v1565_v40, %v1629_v42  ;;  %v1747_v40 = vld [vmem:[%s6310_s3 + $0x1d8] sm:$0xff]  ;;  %v1822_v42 = vld [vmem:[%s6310_s3 + $0x430] sm:$0xff] }
 0x261   :  { %2055 = vmatpush.msrb.mxu0 %v1720_v7  ;;  %v1751_v7 = vld [vmem:[%s6310_s3 + $0x1f8] sm:$0xff]  ;;  %2325 = vmatpush.msra.mxu1 %v1822_v42 }
 0x262   :  { %5408 = vmatmul.msk.f32.vlgmr.msrb.gmra.mxu0 %vm1944_vm11, %v1660_v12  ;;  %v6428_v53 = vpop.f32.mrf.mxu3  ;;  %v1750_v12 = vld [vmem:[%s6310_s3 + $0x1f0] sm:$0xff]  ;;  %v1767_v42 = vld [vmem:[%s6310_s3 + $0x278] sm:$0xff] }
 0x263   :  { %2071 = vmatpush.msra.mxu0 %v1735_v20 }
 0x265   :  { %2072 = vmatpush.msra.mxu0 %v1734_v16 }
 0x267   :  { %2073 = vmatpush.msra.mxu0 %v1733_v25  ;;  %5397 = vmatmul.msk.f32.gmra.mxu3 %vm296_vm3, %v6208_v44  ;;  %v1212_v44 = vpop.f32.mrf.mxu0  ;;  %v1749_v25 = vld [vmem:[%s6310_s3 + $0x1e8] sm:$0xff] }
 0x268   :  { %v1329_v35 = vadd.f32 %v6387_v9, %v1212_v44 }
 0x269   :  { %2074 = vmatpush.msra.mxu0 %v1732_v1  ;;  %v1830_v1 = vld [vmem:[%s6310_s3 + $0x470] sm:$0xff] }
 0x26a   :  { %v6440_v11 = vpop.f32.mrf.mxu3  ;;  %v1530_v50 = vadd.f32 %v1446_v45, %v1329_v35  ;;  %v6468_v45 = vpop.f32.mrf.mxu2  ;;  %v1820_v35 = vld [vmem:[%s6310_s3 + $0x420] sm:$0xff] }
 0x26b   :  { %2075 = vmatpush.msra.mxu0 %v1731_v32  ;;  %v1835_v32 = vld [vmem:[%s6310_s3 + $0x498] sm:$0xff] }
 0x26c   :  { %v1566_v9 = vadd.f32 %v6361_v2, %v1530_v50  ;;  %2374 = vmatpush.msra.mxu3 %v1835_v32  ;;  %v1752_v32 = vld [vmem:[%s6310_s3 + $0x200] sm:$0xff] }
 0x26d   :  { %2076 = vmatpush.msra.mxu0 %v1730_v27  ;;  %v6493_v27 = vpop.f32.mrf.mxu1 }
 0x26e   :  { %v1630_v3 = vmul.f32 0.01, %v1566_v9  ;;  %vm1598_vm4 = vcmp.ge.f32.partialorder %v1566_v9, 0.0 }
 0x26f   :  { %2077 = vmatpush.msra.mxu0 %v1729_v22  ;;  %5398 = vmatmul.msk.f32.gmra.mxu3 %vm296_vm3, %v6221_v17  ;;  %v1831_v17 = vld [vmem:[%s6310_s3 + $0x478] sm:$0xff] }
 0x270   :  { %2347 = vmatpush.msrb.mxu2 %v1831_v17  ;;  %v1662_v20 = vsel %vm1598_vm4, %v1566_v9, %v1630_v3  ;;  %v1758_v17 = vld [vmem:[%s6310_s3 + $0x230] sm:$0xff]  ;;  %v1757_v9 = vld [vmem:[%s6310_s3 + $0x228] sm:$0xff]  ;;  %v1756_v3 = vld [vmem:[%s6310_s3 + $0x220] sm:$0xff] }
 0x271   :  { %2078 = vmatpush.msra.mxu0 %v1728_v47  ;;  %v1745_v47 = vld [vmem:[%s6310_s3 + $0x1c8] sm:$0xff] }
 0x272   :  { %5409 = vmatmul.msk.f32.vlgmr.msra.gmra.mxu0 %vm1944_vm11, %v1661_v49  ;;  %v6452_v41 = vpop.f32.mrf.mxu3  ;;  %v6484_v28 = vpop.f32.mrf.mxu2  ;;  %2348 = vmatpush.msrb.mxu2 %v1830_v1  ;;  %v1826_v1 = vld [vmem:[%s6310_s3 + $0x450] sm:$0xff] }
 0x273   :  { %2094 = vmatpush.msrb.mxu0 %v1743_v48  ;;  %v1821_v48 = vld [vmem:[%s6310_s3 + $0x428] sm:$0xff] }
 0x274   :  { %2326 = vmatpush.msra.mxu1 %v1821_v48 }
 0x275   :  { %2095 = vmatpush.msrb.mxu0 %v1742_v21  ;;  %v1759_v21 = vld [vmem:[%s6310_s3 + $0x238] sm:$0xff] }
 0x276   :  { %2327 = vmatpush.msra.mxu1 %v1820_v35  ;;  %v5748_v35 = vld [vmem:[%s5795_s9] sm:$0xff]  ;;  %s5760_s9 = smov 14  }
 0x277   :  { %2096 = vmatpush.msrb.mxu0 %v1741_v56  ;;  %5399 = vmatmul.msk.f32.gmra.mxu3 %vm296_vm3, %v6231_v24  ;;  %v1215_v24 = vpop.f32.mrf.mxu0  ;;  %s6833_s12 = sld [smem:[%s7771_s0 + %s5760_s9]]   ;;  %s5775_s9 = smov 25  }
 0x278   :  { %v1332_v16 = vadd.f32 %v6399_v0, %v1215_v24  ;;  %v1755_v24 = vld [vmem:[%s6310_s3 + $0x218] sm:$0xff]  ;;  %2823 = vrot.lane.b32.xlu0 %v5748_v35, %s5758_s4  ;;  %v1852_v35 = vld [vmem:[%s6310_s3 + $0x520] sm:$0xff]  ;;  %s7692_s4 = sld [smem:[%s7771_s0 + %s5773_s1]]  }
 0x279   :  { %2097 = vmatpush.msrb.mxu0 %v1740_v10  ;;  %s7714_s13 = sld [smem:[%s7771_s0 + %s5775_s9]]  }
 0x27a   :  { %v6465_v63 = vpop.f32.mrf.mxu3  ;;  %v1531_v26 = vadd.f32 %v6428_v53, %v1332_v16  ;;  %v1746_v53 = vld [vmem:[%s6310_s3 + $0x1d0] sm:$0xff]  ;;  %v6505_v56 = vpop.f32.mrf.mxu2 }
 0x27b   :  { %2098 = vmatpush.msrb.mxu0 %v1739_v61 }
 0x27c   :  { %v1567_v0 = vadd.f32 %v6361_v2, %v1531_v26  ;;  %v1753_v26 = vld [vmem:[%s6310_s3 + $0x208] sm:$0xff] }
 0x27d   :  { %2099 = vmatpush.msrb.mxu0 %v1738_v38  ;;  %v6514_v38 = vpop.f32.mrf.mxu1 }
 0x27e   :  { %v1631_v44 = vmul.f32 0.01, %v1567_v0  ;;  %vm1599_vm5 = vcmp.ge.f32.partialorder %v1567_v0, 0.0 }
 0x27f   :  { %2100 = vmatpush.msrb.mxu0 %v1737_v34  ;;  %5400 = vmatmul.msk.f32.gmra.mxu3 %vm296_vm3, %v6240_v31  ;;  %v1748_v31 = vld [vmem:[%s6310_s3 + $0x1e0] sm:$0xff]  ;;  %v1218_v49 = vpop.f32.mrf.mxu0  ;;  %v1818_v34 = vld [vmem:[%s6310_s3 + $0x410] sm:$0xff] }
 0x280   :  { %v1663_v50 = vsel %vm1599_vm5, %v1567_v0, %v1631_v44  ;;  %v1335_v10 = vadd.f32 %v6410_v59, %v1218_v49  ;;  %v1829_v59 = vld [vmem:[%s6310_s3 + $0x468] sm:$0xff]  ;;  %v1766_v44 = vld [vmem:[%s6310_s3 + $0x270] sm:$0xff] }
 0x281   :  { %2101 = vmatpush.msrb.mxu0 %v1736_v5  ;;  %v1817_v5 = vld [vmem:[%s6310_s3 + $0x408] sm:$0xff]  ;;  %2349 = vmatpush.msrb.mxu2 %v1829_v59 }
 0x282   :  { %5410 = vmatmul.msk.f32.vlgmr.msrb.gmra.mxu0 %vm1944_vm11, %v1662_v20  ;;  %v6479_v19 = vpop.f32.mrf.mxu3  ;;  %v1532_v62 = vadd.f32 %v6440_v11, %v1335_v10  ;;  %v1816_v11 = vld [vmem:[%s6310_s3 + $0x400] sm:$0xff]  ;;  %v6528_v16 = vpop.f32.mrf.mxu2  ;;  %v1825_v0 = vld [vmem:[%s6310_s3 + $0x448] sm:$0xff] }
 0x283   :  { %2117 = vmatpush.msra.mxu0 %v1751_v7  ;;  %v1828_v20 = vld [vmem:[%s6310_s3 + $0x460] sm:$0xff] }
 0x284   :  { %v1568_v7 = vadd.f32 %v6361_v2, %v1532_v62  ;;  %2350 = vmatpush.msrb.mxu2 %v1828_v20  ;;  %v1764_v10 = vld [vmem:[%s6310_s3 + $0x260] sm:$0xff] }
 0x285   :  { %2118 = vmatpush.msra.mxu0 %v1750_v12  ;;  %v1754_v12 = vld [vmem:[%s6310_s3 + $0x210] sm:$0xff] }
 0x286   :  { %vm1600_vm6 = vcmp.ge.f32.partialorder %v1568_v7, 0.0 }
 0x287   :  { %2119 = vmatpush.msra.mxu0 %v1749_v25  ;;  %5401 = vmatmul.msk.f32.gmra.mxu3 %vm296_vm3, %v6249_v37  ;;  %v1744_v37 = vld [vmem:[%s6310_s3 + $0x1c0] sm:$0xff] }
 0x289   :  { %2120 = vmatpush.msra.mxu0 %v1748_v31  ;;  %v1632_v31 = vmul.f32 0.01, %v1568_v7 }
 0x28a   :  { %v6495_v22 = vpop.f32.mrf.mxu3 }
 0x28b   :  { %2121 = vmatpush.msra.mxu0 %v1747_v40  ;;  %v6536_v40 = vpop.f32.mrf.mxu1 }
 0x28d   :  { %2122 = vmatpush.msra.mxu0 %v1746_v53  ;;  %v1221_v53 = vpop.f32.mrf.mxu0 }
 0x28e   :  { %v1338_v48 = vadd.f32 %v6420_v8, %v1221_v53  ;;  %v1763_v8 = vld [vmem:[%s6310_s3 + $0x258] sm:$0xff] }
 0x28f   :  { %2123 = vmatpush.msra.mxu0 %v1745_v47  ;;  %5402 = vmatmul.msk.f32.gmra.mxu3 %vm296_vm3, %v6255_v46  ;;  %v1819_v46 = vld [vmem:[%s6310_s3 + $0x418] sm:$0xff]  ;;  %v1664_v47 = vsel %vm1600_vm6, %v1568_v7, %v1632_v31 }
 0x290   :  { %2328 = vmatpush.msra.mxu1 %v1819_v46  ;;  %v1834_v46 = vld [vmem:[%s6310_s3 + $0x490] sm:$0xff] }
 0x291   :  { %2124 = vmatpush.msra.mxu0 %v1744_v37  ;;  %v1824_v37 = vld [vmem:[%s6310_s3 + $0x440] sm:$0xff]  ;;  %2375 = vmatpush.msra.mxu3 %v1834_v46  ;;  %v1863_v46 = vld [vmem:[%s6310_s3 + $0x578] sm:$0xff] }
 0x292   :  { %5411 = vmatmul.msk.f32.vlgmr.msra.gmra.mxu0 %vm1944_vm11, %v1663_v50  ;;  %v6510_v61 = vpop.f32.mrf.mxu3  ;;  %2329 = vmatpush.msra.mxu1 %v1818_v34  ;;  %v1358_v50 = vpop.f32.mrf.mxu2 }
 0x293   :  { %2140 = vmatpush.msrb.mxu0 %v1759_v21  ;;  %v1765_v21 = vld [vmem:[%s6310_s3 + $0x268] sm:$0xff]  ;;  %v6554_v62 = vpop.f32.mrf.mxu1 }
 0x294   :  { %2330 = vmatpush.msra.mxu1 %v1817_v5  ;;  %v1832_v5 = vld [vmem:[%s6310_s3 + $0x480] sm:$0xff] }
 0x295   :  { %2141 = vmatpush.msrb.mxu0 %v1758_v17  ;;  %v1533_v17 = vadd.f32 %v6452_v41, %v1338_v48  ;;  %v1762_v41 = vld [vmem:[%s6310_s3 + $0x250] sm:$0xff]  ;;  %v1224_v31 = vpop.f32.mrf.mxu0 }
 0x296   :  { %2331 = vmatpush.msra.mxu1 %v1816_v11  ;;  %v1855_v11 = vld [vmem:[%s6310_s3 + $0x538] sm:$0xff]  ;;  %v1341_v48 = vadd.f32 %v6436_v33, %v1224_v31 }
 0x297   :  { %2142 = vmatpush.msrb.mxu0 %v1757_v9  ;;  %5403 = vmatmul.msk.f32.gmra.mxu3 %vm296_vm3, %v6275_v29  ;;  %v1827_v29 = vld [vmem:[%s6310_s3 + $0x458] sm:$0xff]  ;;  %v1833_v9 = vld [vmem:[%s6310_s3 + $0x488] sm:$0xff]  ;;  %v1569_v34 = vadd.f32 %v6361_v2, %v1533_v17 }
 0x298   :  { %2351 = vmatpush.msrb.mxu2 %v1827_v29  ;;  %2376 = vmatpush.msra.mxu3 %v1833_v9  ;;  %v1534_v17 = vadd.f32 %v6465_v63, %v1341_v48  ;;  %v1850_v9 = vld [vmem:[%s6310_s3 + $0x510] sm:$0xff]  ;;  %v1859_v31 = vld [vmem:[%s6310_s3 + $0x558] sm:$0xff] }
 0x299   :  { %2143 = vmatpush.msrb.mxu0 %v1756_v3  ;;  %v1359_v3 = vadd.f32 %v1358_v50, %v6493_v27  ;;  %v1633_v20 = vmul.f32 0.01, %v1569_v34  ;;  %2416 = vmatpush.msrb.mxu1 %v1855_v11  ;;  %vm1601_vm7 = vcmp.ge.f32.partialorder %v1569_v34, 0.0  ;;  %v1773_v50 = vld [vmem:[%s6310_s3 + $0x2a8] sm:$0xff]  ;;  %v1770_v11 = vld [vmem:[%s6310_s3 + $0x290] sm:$0xff] }
 0x29a   :  { %v6530_v25 = vpop.f32.mrf.mxu3  ;;  %2352 = vmatpush.msrb.mxu2 %v1826_v1  ;;  %2377 = vmatpush.msra.mxu3 %v1832_v5  ;;  %v1361_v27 = vpop.f32.mrf.mxu2  ;;  %v1570_v63 = vadd.f32 %v6361_v2, %v1534_v17  ;;  %v1849_v5 = vld [vmem:[%s6310_s3 + $0x508] sm:$0xff] }
 0x29b   :  { %2144 = vmatpush.msrb.mxu0 %v1755_v24  ;;  %v1761_v24 = vld [vmem:[%s6310_s3 + $0x248] sm:$0xff]  ;;  %v1665_v53 = vsel %vm1601_vm7, %v1569_v34, %v1633_v20  ;;  %v1862_v34 = vld [vmem:[%s6310_s3 + $0x570] sm:$0xff] }
 0x29c   :  { %2353 = vmatpush.msrb.mxu2 %v1825_v0  ;;  %v1853_v0 = vld [vmem:[%s6310_s3 + $0x528] sm:$0xff]  ;;  %vm1602_vm10 = vcmp.ge.f32.partialorder %v1570_v63, 0.0 }
 0x29d   :  { %2145 = vmatpush.msrb.mxu0 %v1754_v12  ;;  %v1760_v12 = vld [vmem:[%s6310_s3 + $0x240] sm:$0xff]  ;;  %v1869_v17 = vld [vmem:[%s6310_s3 + $0x5a8] sm:$0xff] }
 0x29e   :  { %2354 = vmatpush.msrb.mxu2 %v1824_v37  ;;  %v6570_v37 = vpop.f32.mrf.mxu1 }
 0x29f   :  { %2146 = vmatpush.msrb.mxu0 %v1753_v26  ;;  %1520 = vmatmul.f32.gmra.mxu3 %v5755_v14  ;;  %v1854_v26 = vld [vmem:[%s6310_s3 + $0x530] sm:$0xff] }
 0x2a0   :  { %2417 = vmatpush.msrb.mxu1 %v1854_v26  ;;  %2439 = vmatpush.msra.mxu2 %v1863_v46  ;;  %v1769_v26 = vld [vmem:[%s6310_s3 + $0x288] sm:$0xff] }
 0x2a1   :  { %2147 = vmatpush.msrb.mxu0 %v1752_v32  ;;  %v1775_v32 = vld [vmem:[%s6310_s3 + $0x2b8] sm:$0xff] }
 0x2a2   :  { %5412 = vmatmul.msk.f32.vlgmr.msrb.gmra.mxu0 %vm1944_vm11, %v1664_v47  ;;  %v6545_v49 = vpop.f32.mrf.mxu3  ;;  %2418 = vmatpush.msrb.mxu1 %v1853_v0 }
 0x2a3   :  { %2163 = vmatpush.msra.mxu0 %v1767_v42  ;;  %v1362_v42 = vadd.f32 %v1361_v27, %v6514_v38  ;;  %2440 = vmatpush.msra.mxu2 %v1862_v34 }
 0x2a4   :  { %2419 = vmatpush.msrb.mxu1 %v1852_v35 }
 0x2a5   :  { %2164 = vmatpush.msra.mxu0 %v1766_v44  ;;  %v1774_v44 = vld [vmem:[%s6310_s3 + $0x2b0] sm:$0xff] }
 0x2a7   :  { %2165 = vmatpush.msra.mxu0 %v1765_v21 }
 0x2a9   :  { %2166 = vmatpush.msra.mxu0 %v1764_v10  ;;  %v1851_v10 = vld [vmem:[%s6310_s3 + $0x518] sm:$0xff] }
 0x2aa   :  { %v1476_v59 = vpop.f32.mrf.mxu3  ;;  %2420 = vmatpush.msrb.mxu1 %v1851_v10 }
 0x2ab   :  { %2167 = vmatpush.msra.mxu0 %v1763_v8  ;;  %v1540_v7 = vadd.f32 %v1476_v59, %v1359_v3  ;;  %v1772_v8 = vld [vmem:[%s6310_s3 + $0x2a0] sm:$0xff]  ;;  %v1861_v59 = vld [vmem:[%s6310_s3 + $0x568] sm:$0xff] }
 0x2ac   :  { %2421 = vmatpush.msrb.mxu1 %v1850_v9  ;;  %2441 = vmatpush.msra.mxu2 %v1861_v59  ;;  %v1868_v9 = vld [vmem:[%s6310_s3 + $0x5a0] sm:$0xff] }
 0x2ad   :  { %2168 = vmatpush.msra.mxu0 %v1762_v41  ;;  %v1576_v29 = vadd.f32 %v6361_v2, %v1540_v7  ;;  %v1771_v41 = vld [vmem:[%s6310_s3 + $0x298] sm:$0xff] }
 0x2ae   :  { %2422 = vmatpush.msrb.mxu1 %v1849_v5  ;;  %v1866_v5 = vld [vmem:[%s6310_s3 + $0x590] sm:$0xff] }
 0x2af   :  { %2169 = vmatpush.msra.mxu0 %v1761_v24  ;;  %vm1608_vm8 = vcmp.ge.f32.partialorder %v1576_v29, 0.0  ;;  %v1640_v1 = vmul.f32 0.01, %v1576_v29  ;;  %v1365_v24 = vadd.f32 %v6281_v51, %v6536_v40  ;;  %v6594_v51 = vpop.f32.mrf.mxu1  ;;  %v1634_v40 = vmul.f32 0.01, %v1570_v63 }
 0x2b1   :  { %2170 = vmatpush.msra.mxu0 %v1760_v12  ;;  %v1672_v47 = vsel %vm1608_vm8, %v1576_v29, %v1640_v1  ;;  %v1848_v12 = vld [vmem:[%s6310_s3 + $0x500] sm:$0xff]  ;;  %v1871_v1 = vld [vmem:[%s6310_s3 + $0x5b8] sm:$0xff] }
 0x2b2   :  { %5413 = vmatmul.msk.f32.vlgmr.msra.gmra.mxu0 %vm1944_vm11, %v1665_v53  ;;  %v1479_v21 = vpop.f32.mrf.mxu3  ;;  %5420 = vmatmul.msk.f32.vlgmr.msra.gmra.mxu1 %vm1944_vm11, %v1672_v47  ;;  %v1860_v29 = vld [vmem:[%s6310_s3 + $0x560] sm:$0xff]  ;;  %v1858_v53 = vld [vmem:[%s6310_s3 + $0x550] sm:$0xff]  ;;  %v1227_v47 = vpop.f32.mrf.mxu0 }
 0x2b3   :  { %2186 = vmatpush.msrb.mxu0 %v1775_v32  ;;  %v1541_v38 = vadd.f32 %v1479_v21, %v1362_v42  ;;  %2423 = vmatpush.msrb.mxu1 %v1848_v12  ;;  %v1768_v32 = vld [vmem:[%s6310_s3 + $0x280] sm:$0xff]  ;;  %v1870_v42 = vld [vmem:[%s6310_s3 + $0x5b0] sm:$0xff]  ;;  %v1666_v21 = vsel %vm1602_vm10, %v1570_v63, %v1634_v40  ;;  %v1344_v10 = vadd.f32 %v6450_v30, %v1227_v47  ;;  %v1867_v30 = vld [vmem:[%s6310_s3 + $0x598] sm:$0xff] }
 0x2b4   :  { %2442 = vmatpush.msra.mxu2 %v1860_v29  ;;  %2462 = vmatpush.msrb.mxu3 %v1871_v1  ;;  %v1779_v63 = vld [vmem:[%s6310_s3 + $0x2d8] sm:$0xff]  ;;  %v1864_v29 = vld [vmem:[%s6310_s3 + $0x580] sm:$0xff] }
 0x2b5   :  { %2187 = vmatpush.msrb.mxu0 %v1774_v44  ;;  %v1577_v33 = vadd.f32 %v6361_v2, %v1541_v38  ;;  %v1783_v44 = vld [vmem:[%s6310_s3 + $0x2f8] sm:$0xff]  ;;  %v1857_v38 = vld [vmem:[%s6310_s3 + $0x548] sm:$0xff]  ;;  %v1535_v34 = vadd.f32 %v6479_v19, %v1344_v10  ;;  %v1371_v19 = vadd.f32 %v6289_v36, %v6570_v37 }
 0x2b6   :  { %2443 = vmatpush.msra.mxu2 %v1859_v31  ;;  %2463 = vmatpush.msrb.mxu3 %v1870_v42  ;;  %v1887_v36 = vld [vmem:[%s6310_s3 + $0x638] sm:$0xff]  ;;  %v1374_v42 = vadd.f32 %v6293_v52, %v6594_v51  ;;  %v1884_v52 = vld [vmem:[%s6310_s3 + $0x620] sm:$0xff] }
 0x2b7   :  { %2188 = vmatpush.msrb.mxu0 %v1773_v50  ;;  %vm1609_vm9 = vcmp.ge.f32.partialorder %v1577_v33, 0.0  ;;  %v1641_v3 = vmul.f32 0.01, %v1577_v33  ;;  %v1782_v50 = vld [vmem:[%s6310_s3 + $0x2f0] sm:$0xff]  ;;  %v1571_v59 = vadd.f32 %v6361_v2, %v1535_v34  ;;  %2508 = vmatpush.msra.mxu1 %v1887_v36  ;;  %v1791_v31 = vld [vmem:[%s6310_s3 + $0x338] sm:$0xff]  ;;  %v1788_v51 = vld [vmem:[%s6310_s3 + $0x320] sm:$0xff] }
 0x2b8   :  { %2444 = vmatpush.msra.mxu2 %v1858_v53  ;;  %2464 = vmatpush.msrb.mxu3 %v1869_v17  ;;  %v1882_v34 = vld [vmem:[%s6310_s3 + $0x610] sm:$0xff] }
 0x2b9   :  { %2189 = vmatpush.msrb.mxu0 %v1772_v8  ;;  %v1673_v7 = vsel %vm1609_vm9, %v1577_v33, %v1641_v3  ;;  %v1781_v8 = vld [vmem:[%s6310_s3 + $0x2e8] sm:$0xff]  ;;  %v1856_v33 = vld [vmem:[%s6310_s3 + $0x540] sm:$0xff]  ;;  %vm1603_vm13 = vcmp.ge.f32.partialorder %v1571_v59, 0.0 }
 0x2ba   :  { %v1482_v20 = vpop.f32.mrf.mxu3  ;;  %5421 = vmatmul.msk.f32.vlgmr.msrb.gmra.mxu2 %vm1944_vm11, %v1673_v7  ;;  %v1780_v3 = vld [vmem:[%s6310_s3 + $0x2e0] sm:$0xff]  ;;  %2465 = vmatpush.msrb.mxu3 %v1868_v9  ;;  %v1865_v7 = vld [vmem:[%s6310_s3 + $0x588] sm:$0xff]  ;;  %v1230_v37 = vpop.f32.mrf.mxu0 }
 0x2bb   :  { %2190 = vmatpush.msrb.mxu0 %v1771_v41  ;;  %v1542_v27 = vadd.f32 %v1482_v20, %v1365_v24  ;;  %2445 = vmatpush.msra.mxu2 %v1857_v38  ;;  %v6617_v41 = vpop.f32.mrf.mxu1  ;;  %v1778_v24 = vld [vmem:[%s6310_s3 + $0x2d0] sm:$0xff]  ;;  %v1777_v20 = vld [vmem:[%s6310_s3 + $0x2c8] sm:$0xff] }
 0x2bc   :  { %2466 = vmatpush.msrb.mxu3 %v1867_v30  ;;  %v1377_v30 = vadd.f32 %v6297_v43, %v6617_v41  ;;  %v1880_v41 = vld [vmem:[%s6310_s3 + $0x600] sm:$0xff] }
 0x2bd   :  { %2191 = vmatpush.msrb.mxu0 %v1770_v11  ;;  %v1578_v0 = vadd.f32 %v6361_v2, %v1542_v27  ;;  %2446 = vmatpush.msra.mxu2 %v1856_v33  ;;  %v1776_v27 = vld [vmem:[%s6310_s3 + $0x2c0] sm:$0xff]  ;;  %v1787_v33 = vld [vmem:[%s6310_s3 + $0x318] sm:$0xff] }
 0x2be   :  { %2467 = vmatpush.msrb.mxu3 %v1866_v5  ;;  %v1786_v5 = vld [vmem:[%s6310_s3 + $0x310] sm:$0xff] }
 0x2bf   :  { %2192 = vmatpush.msrb.mxu0 %v1769_v26  ;;  %vm1610_vm12 = vcmp.ge.f32.partialorder %v1578_v0, 0.0  ;;  %v1642_v48 = vmul.f32 0.01, %v1578_v0  ;;  %v1635_v26 = vmul.f32 0.01, %v1571_v59 }
 0x2c0   :  { %2468 = vmatpush.msrb.mxu3 %v1865_v7  ;;  %v1893_v7 = vld [vmem:[%s6310_s3 + $0x668] sm:$0xff] }
 0x2c1   :  { %2193 = vmatpush.msrb.mxu0 %v1768_v32  ;;  %v1674_v35 = vsel %vm1610_vm12, %v1578_v0, %v1642_v48  ;;  %v1886_v32 = vld [vmem:[%s6310_s3 + $0x630] sm:$0xff]  ;;  %v1667_v53 = vsel %vm1603_vm13, %v1571_v59, %v1635_v26  ;;  %v1347_v48 = vadd.f32 %v6468_v45, %v1230_v37  ;;  %v1883_v45 = vld [vmem:[%s6310_s3 + $0x618] sm:$0xff] }
 0x2c2   :  { %5414 = vmatmul.msk.f32.vlgmr.msrb.gmra.mxu0 %vm1944_vm11, %v1666_v21  ;;  %v6608_v46 = vpop.f32.mrf.mxu3  ;;  %5422 = vmatmul.msk.f32.vlgmr.msra.gmra.mxu3 %vm1944_vm11, %v1674_v35  ;;  %v1885_v35 = vld [vmem:[%s6310_s3 + $0x628] sm:$0xff]  ;;  %v1233_v36 = vpop.f32.mrf.mxu0  ;;  %v1799_v37 = vld [vmem:[%s6310_s3 + $0x378] sm:$0xff] }
 0x2c3   :  { %2209 = vmatpush.msra.mxu0 %v1783_v44  ;;  %2469 = vmatpush.msrb.mxu3 %v1864_v29  ;;  %v6633_v0 = vpop.f32.mrf.mxu1  ;;  %v1790_v44 = vld [vmem:[%s6310_s3 + $0x330] sm:$0xff]  ;;  %v1536_v17 = vadd.f32 %v6495_v22, %v1347_v48  ;;  %v1784_v29 = vld [vmem:[%s6310_s3 + $0x300] sm:$0xff]  ;;  %v1797_v48 = vld [vmem:[%s6310_s3 + $0x368] sm:$0xff] }
 0x2c4   :  { %2509 = vmatpush.msra.mxu1 %v1886_v32 }
 0x2c5   :  { %2210 = vmatpush.msra.mxu0 %v1782_v50  ;;  %v1789_v50 = vld [vmem:[%s6310_s3 + $0x328] sm:$0xff]  ;;  %v1572_v22 = vadd.f32 %v6361_v2, %v1536_v17  ;;  %v1888_v17 = vld [vmem:[%s6310_s3 + $0x640] sm:$0xff] }
 0x2c6   :  { %2510 = vmatpush.msra.mxu1 %v1885_v35  ;;  %v1901_v35 = vld [vmem:[%s6310_s3 + $0x6a8] sm:$0xff] }
 0x2c7   :  { %2211 = vmatpush.msra.mxu0 %v1781_v8  ;;  %v1895_v8 = vld [vmem:[%s6310_s3 + $0x678] sm:$0xff]  ;;  %v1636_v43 = vmul.f32 0.01, %v1572_v22  ;;  %vm1604_vm2 = vcmp.ge.f32.partialorder %v1572_v22, 0.0 }
 0x2c8   :  { %2511 = vmatpush.msra.mxu1 %v1884_v52  ;;  %2531 = vmatpush.msrb.mxu2 %v1895_v8  ;;  %v1900_v52 = vld [vmem:[%s6310_s3 + $0x6a0] sm:$0xff] }
 0x2c9   :  { %2212 = vmatpush.msra.mxu0 %v1780_v3  ;;  %v1894_v3 = vld [vmem:[%s6310_s3 + $0x670] sm:$0xff] }
 0x2ca   :  { %v1488_v11 = vpop.f32.mrf.mxu3  ;;  %2512 = vmatpush.msra.mxu1 %v1883_v45  ;;  %2532 = vmatpush.msrb.mxu2 %v1894_v3  ;;  %v6685_v45 = vld [vmem:[%s6268_s29] ss:$0 sm:$0xff]  ;;  %s5765_s29 = smov 11  }
 0x2cb   :  { %2213 = vmatpush.msra.mxu0 %v1779_v63  ;;  %v1544_v12 = vadd.f32 %v1488_v11, %v1371_v19  ;;  %v1266_v59 = vpop.f32.mrf.mxu1  ;;  %v1785_v11 = vld [vmem:[%s6310_s3 + $0x308] sm:$0xff]  ;;  %s6937_s2 = sld [smem:[%s7771_s0 + %s5765_s29]]   ;;  %s5781_s29 = smov 29  }
 0x2cc   :  { %2513 = vmatpush.msra.mxu1 %v1882_v34  ;;  %2533 = vmatpush.msrb.mxu2 %v1893_v7  ;;  %v1383_v8 = vadd.f32 %v6305_v4, %v1266_v59  ;;  %v1793_v34 = vld [vmem:[%s6310_s3 + $0x348] sm:$0xff]  ;;  %v1896_v4 = vld [vmem:[%s6310_s3 + $0x680] sm:$0xff] }
 0x2cd   :  { %2214 = vmatpush.msra.mxu0 %v1778_v24  ;;  %v1580_v40 = vadd.f32 %v6361_v2, %v1544_v12  ;;  %v1881_v24 = vld [vmem:[%s6310_s3 + $0x608] sm:$0xff]  ;;  %v1892_v12 = vld [vmem:[%s6310_s3 + $0x660] sm:$0xff] }
 0x2ce   :  { %2514 = vmatpush.msra.mxu1 %v1881_v24  ;;  %2534 = vmatpush.msrb.mxu2 %v1892_v12  ;;  %v1807_v24 = vld [vmem:[%s6310_s3 + $0x3b8] sm:$0xff] }
 0x2cf   :  { %2215 = vmatpush.msra.mxu0 %v1777_v20  ;;  %vm1612_vm14 = vcmp.ge.f32.partialorder %v1580_v40, 0.0  ;;  %v1644_v1 = vmul.f32 0.01, %v1580_v40 }
 0x2d0   :  { %2515 = vmatpush.msra.mxu1 %v1880_v41  ;;  %v1806_v41 = vld [vmem:[%s6310_s3 + $0x3b0] sm:$0xff] }
 0x2d1   :  { %2216 = vmatpush.msra.mxu0 %v1776_v27  ;;  %v1676_v47 = vsel %vm1612_vm14, %v1580_v40, %v1644_v1  ;;  %v1891_v27 = vld [vmem:[%s6310_s3 + $0x658] sm:$0xff]  ;;  %v1668_v1 = vsel %vm1604_vm2, %v1572_v22, %v1636_v43 }
 0x2d2   :  { %5415 = vmatmul.msk.f32.vlgmr.msra.gmra.mxu0 %vm1944_vm11, %v1667_v53  ;;  %v1491_v21 = vpop.f32.mrf.mxu3  ;;  %5424 = vmatmul.msk.f32.vlgmr.msrb.gmra.mxu1 %vm1944_vm11, %v1676_v47  ;;  %v1903_v40 = vld [vmem:[%s6310_s3 + $0x6b8] sm:$0xff]  ;;  %v1890_v53 = vld [vmem:[%s6310_s3 + $0x650] sm:$0xff]  ;;  %v1350_v47 = vadd.f32 %v6484_v28, %v1233_v36  ;;  %v1796_v28 = vld [vmem:[%s6310_s3 + $0x360] sm:$0xff] }
 0x2d3   :  { %2232 = vmatpush.msrb.mxu0 %v1791_v31  ;;  %v1545_v38 = vadd.f32 %v1491_v21, %v1374_v42  ;;  %2535 = vmatpush.msrb.mxu2 %v1891_v27  ;;  %v1902_v42 = vld [vmem:[%s6310_s3 + $0x6b0] sm:$0xff]  ;;  %v1889_v21 = vld [vmem:[%s6310_s3 + $0x648] sm:$0xff] }
 0x2d4   :  { %2554 = vmatpush.msra.mxu3 %v1903_v40  ;;  %v1918_v27 = vld [vmem:[%s6310_s3 + $0x730] sm:$0xff]  ;;  %v1805_v40 = vld [vmem:[%s6310_s3 + $0x3a8] sm:$0xff] }
 0x2d5   :  { %2233 = vmatpush.msrb.mxu0 %v1790_v44  ;;  %v1581_v10 = vadd.f32 %v6361_v2, %v1545_v38  ;;  %2536 = vmatpush.msrb.mxu2 %v1890_v53  ;;  %v1537_v38 = vadd.f32 %v6510_v61, %v1350_v47  ;;  %v1915_v53 = vld [vmem:[%s6310_s3 + $0x718] sm:$0xff] }
 0x2d6   :  { %2555 = vmatpush.msra.mxu3 %v1902_v42  ;;  %v1927_v42 = vld [vmem:[%s6310_s3 + $0x778] sm:$0xff] }
 0x2d7   :  { %2234 = vmatpush.msrb.mxu0 %v1789_v50  ;;  %vm1613_vm15 = vcmp.ge.f32.partialorder %v1581_v10, 0.0  ;;  %v1645_v9 = vmul.f32 0.01, %v1581_v10  ;;  %v1269_v50 = vpop.f32.mrf.mxu1  ;;  %2537 = vmatpush.msrb.mxu2 %v1889_v21  ;;  %v1573_v61 = vadd.f32 %v6685_v45, %v1537_v38  ;;  %v1926_v38 = vld [vmem:[%s6310_s3 + $0x770] sm:$0xff] }
 0x2d8   :  { %2556 = vmatpush.msra.mxu3 %v1901_v35  ;;  %v1386_v43 = vadd.f32 %v6314_v13, %v1269_v50  ;;  %v1914_v50 = vld [vmem:[%s6310_s3 + $0x710] sm:$0xff] }
 0x2d9   :  { %2235 = vmatpush.msrb.mxu0 %v1788_v51  ;;  %v1677_v63 = vsel %vm1613_vm15, %v1581_v10, %v1645_v9  ;;  %v1795_v51 = vld [vmem:[%s6310_s3 + $0x358] sm:$0xff]  ;;  %2538 = vmatpush.msrb.mxu2 %v1888_v17  ;;  %v1898_v9 = vld [vmem:[%s6310_s3 + $0x690] sm:$0xff]  ;;  %vm1605_vm5 = vcmp.ge.f32.partialorder %v1573_v61, 0.0 }
 0x2da   :  { %v1494_v19 = vpop.f32.mrf.mxu3  ;;  %5425 = vmatmul.msk.f32.vlgmr.msra.gmra.mxu2 %vm1944_vm11, %v1677_v63  ;;  %2557 = vmatpush.msra.mxu3 %v1900_v52  ;;  %v1899_v10 = vld [vmem:[%s6310_s3 + $0x698] sm:$0xff]  ;;  %v1637_v63 = vmul.f32 0.01, %v1573_v61  ;;  %v1913_v52 = vld [vmem:[%s6310_s3 + $0x708] sm:$0xff] }
 0x2db   :  { %2236 = vmatpush.msrb.mxu0 %v1787_v33  ;;  %v1546_v20 = vadd.f32 %v1494_v19, %v1377_v30  ;;  %v1794_v33 = vld [vmem:[%s6310_s3 + $0x350] sm:$0xff]  ;;  %v1897_v30 = vld [vmem:[%s6310_s3 + $0x688] sm:$0xff]  ;;  %2623 = vmatpush.msra.mxu2 %v1927_v42  ;;  %v1928_v42 = vld [vmem:[%s6310_s3 + $0x780] sm:$0xff] }
 0x2dc   :  { %2558 = vmatpush.msra.mxu3 %v1899_v10  ;;  %v1800_v10 = vld [vmem:[%s6310_s3 + $0x380] sm:$0xff] }
 0x2dd   :  { %2237 = vmatpush.msrb.mxu0 %v1786_v5  ;;  %v1582_v26 = vadd.f32 %v6361_v2, %v1546_v20  ;;  %v1798_v2 = vld [vmem:[%s6310_s3 + $0x370] sm:$0xff]  ;;  %v1792_v5 = vld [vmem:[%s6310_s3 + $0x340] sm:$0xff]  ;;  %v1669_v20 = vsel %vm1605_vm5, %v1573_v61, %v1637_v63  ;;  %2624 = vmatpush.msra.mxu2 %v1926_v38  ;;  %v1923_v63 = vld [vmem:[%s6310_s3 + $0x758] sm:$0xff] }
 0x2de   :  { %2559 = vmatpush.msra.mxu3 %v1898_v9  ;;  %v1815_v9 = vld [vmem:[%s6310_s3 + $0x3f8] sm:$0xff] }
 0x2df   :  { %2238 = vmatpush.msrb.mxu0 %v1785_v11  ;;  %vm1614_vm4 = vcmp.ge.f32.partialorder %v1582_v26, 0.0  ;;  %v1646_v31 = vmul.f32 0.01, %v1582_v26  ;;  %v1272_v59 = vpop.f32.mrf.mxu1  ;;  %v1919_v11 = vld [vmem:[%s6310_s3 + $0x738] sm:$0xff] }
 0x2e0   :  { %2560 = vmatpush.msra.mxu3 %v1897_v30  ;;  %2600 = vmatpush.msrb.mxu1 %v1919_v11  ;;  %v1389_v47 = vadd.f32 %v6321_v55, %v1272_v59  ;;  %v1934_v11 = vld [vmem:[%s6310_s3 + $0x7b0] sm:$0xff] }
 0x2e1   :  { %2239 = vmatpush.msrb.mxu0 %v1784_v29  ;;  %v1678_v32 = vsel %vm1614_vm4, %v1582_v26, %v1646_v31  ;;  %v1353_v29 = vadd.f32 %v6505_v56, %v6457_v58  ;;  %v1804_v31 = vld [vmem:[%s6310_s3 + $0x3a0] sm:$0xff]  ;;  %v1803_v56 = vld [vmem:[%s6310_s3 + $0x398] sm:$0xff] }
 0x2e2   :  { %5416 = vmatmul.msk.f32.vlgmr.msrb.gmra.mxu0 %vm1944_vm11, %v1668_v1  ;;  %v6672_v44 = vpop.f32.mrf.mxu3  ;;  %5426 = vmatmul.msk.f32.vlgmr.msrb.gmra.mxu3 %vm1944_vm11, %v1678_v32  ;;  %v1916_v58 = vld [vmem:[%s6310_s3 + $0x720] sm:$0xff] }
 0x2e3   :  { %2255 = vmatpush.msra.mxu0 %v1799_v37  ;;  %2561 = vmatpush.msra.mxu3 %v1896_v4  ;;  %v1538_v13 = vadd.f32 %v6530_v25, %v1353_v29  ;;  %v1917_v37 = vld [vmem:[%s6310_s3 + $0x728] sm:$0xff]  ;;  %v1932_v29 = vld [vmem:[%s6310_s3 + $0x7a0] sm:$0xff] }
 0x2e4   :  { %2601 = vmatpush.msrb.mxu1 %v1918_v27  ;;  %v1810_v27 = vld [vmem:[%s6310_s3 + $0x3d0] sm:$0xff] }
 0x2e5   :  { %2256 = vmatpush.msra.mxu0 %v1798_v2  ;;  %v1574_v25 = vadd.f32 %v6685_v45, %v1538_v13  ;;  %v1809_v13 = vld [vmem:[%s6310_s3 + $0x3c8] sm:$0xff] }
 0x2e6   :  { %2602 = vmatpush.msrb.mxu1 %v1917_v37 }
 0x2e7   :  { %2257 = vmatpush.msra.mxu0 %v1797_v48  ;;  %v6712_v32 = vpop.f32.mrf.mxu1  ;;  %v1802_v48 = vld [vmem:[%s6310_s3 + $0x390] sm:$0xff]  ;;  %v1638_v55 = vmul.f32 0.01, %v1574_v25  ;;  %vm1606_vm8 = vcmp.ge.f32.partialorder %v1574_v25, 0.0 }
 0x2e8   :  { %2603 = vmatpush.msrb.mxu1 %v1916_v58 }
 0x2e9   :  { %2258 = vmatpush.msra.mxu0 %v1796_v28  ;;  %v1801_v28 = vld [vmem:[%s6310_s3 + $0x388] sm:$0xff] }
 0x2ea   :  { %v1500_v22 = vpop.f32.mrf.mxu3  ;;  %2604 = vmatpush.msrb.mxu1 %v1915_v53 }
 0x2eb   :  { %2259 = vmatpush.msra.mxu0 %v1795_v51  ;;  %v1548_v3 = vadd.f32 %v1500_v22, %v1383_v8  ;;  %v1925_v51 = vld [vmem:[%s6310_s3 + $0x768] sm:$0xff]  ;;  %v1912_v8 = vld [vmem:[%s6310_s3 + $0x700] sm:$0xff] }
 0x2ec   :  { %2605 = vmatpush.msrb.mxu1 %v1914_v50  ;;  %2625 = vmatpush.msra.mxu2 %v1925_v51  ;;  %v1368_v50 = vadd.f32 %v6285_v18, %v6554_v62 }
 0x2ed   :  { %2260 = vmatpush.msra.mxu0 %v1794_v33  ;;  %v1584_v19 = vadd.f32 %v6685_v45, %v1548_v3  ;;  %v1924_v33 = vld [vmem:[%s6310_s3 + $0x760] sm:$0xff]  ;;  %v1814_v3 = vld [vmem:[%s6310_s3 + $0x3f0] sm:$0xff] }
 0x2ee   :  { %2606 = vmatpush.msrb.mxu1 %v1913_v52  ;;  %2626 = vmatpush.msra.mxu2 %v1924_v33 }
 0x2ef   :  { %2261 = vmatpush.msra.mxu0 %v1793_v34  ;;  %vm1616_vm6 = vcmp.ge.f32.partialorder %v1584_v19, 0.0  ;;  %v1648_v7 = vmul.f32 0.01, %v1584_v19  ;;  %v1670_v34 = vsel %vm1606_vm8, %v1574_v25, %v1638_v55  ;;  %v1278_v4 = vpop.f32.mrf.mxu1  ;;  %v1847_v25 = vld [vmem:[%s6310_s3 + $0x4f8] sm:$0xff]  ;;  %v1543_v55 = vadd.f32 %v6608_v46, %v1368_v50  ;;  %v1842_v46 = vld [vmem:[%s6310_s3 + $0x4d0] sm:$0xff] }
 0x2f0   :  { %2607 = vmatpush.msrb.mxu1 %v1912_v8  ;;  %2627 = vmatpush.msra.mxu2 %v1923_v63 }
 0x2f1   :  { %2262 = vmatpush.msra.mxu0 %v1792_v5  ;;  %v1680_v12 = vsel %vm1616_vm6, %v1584_v19, %v1648_v7  ;;  %v1935_v5 = vld [vmem:[%s6310_s3 + $0x7b8] sm:$0xff]  ;;  %v1356_v19 = vadd.f32 %v6528_v16, %v6474_v57  ;;  %v1922_v7 = vld [vmem:[%s6310_s3 + $0x750] sm:$0xff]  ;;  %v1812_v57 = vld [vmem:[%s6310_s3 + $0x3e0] sm:$0xff]  ;;  %v1579_v62 = vadd.f32 %v6685_v45, %v1543_v55 }
 0x2f2   :  { %5417 = vmatmul.msk.f32.vlgmr.msra.gmra.mxu0 %vm1944_vm11, %v1669_v20  ;;  %v1503_v26 = vpop.f32.mrf.mxu3  ;;  %5428 = vmatmul.msk.f32.vlgmr.msra.gmra.mxu1 %vm1944_vm11, %v1680_v12  ;;  %v1921_v16 = vld [vmem:[%s6310_s3 + $0x748] sm:$0xff]  ;;  %v1920_v12 = vld [vmem:[%s6310_s3 + $0x740] sm:$0xff] }
 0x2f3   :  { %2278 = vmatpush.msrb.mxu0 %v1807_v24  ;;  %v1549_v36 = vadd.f32 %v1503_v26, %v1386_v43  ;;  %v1813_v24 = vld [vmem:[%s6310_s3 + $0x3e8] sm:$0xff]  ;;  %2646 = vmatpush.msrb.mxu3 %v1935_v5  ;;  %v1539_v20 = vadd.f32 %v6545_v49, %v1356_v19  ;;  %v1395_v49 = vadd.f32 %v6339_v6, %v1278_v4  ;;  %vm1611_vm14 = vcmp.ge.f32.partialorder %v1579_v62, 0.0  ;;  %v1879_v5 = vld [vmem:[%s6310_s3 + $0x5f8] sm:$0xff] }
 0x2f4   :  { %2628 = vmatpush.msra.mxu2 %v1922_v7  ;;  %v1933_v43 = vld [vmem:[%s6310_s3 + $0x7a8] sm:$0xff] }
 0x2f5   :  { %2279 = vmatpush.msrb.mxu0 %v1806_v41  ;;  %v1585_v1 = vadd.f32 %v6685_v45, %v1549_v36  ;;  %2647 = vmatpush.msrb.mxu3 %v1934_v11  ;;  %v1811_v41 = vld [vmem:[%s6310_s3 + $0x3d8] sm:$0xff]  ;;  %v1575_v26 = vadd.f32 %v6685_v45, %v1539_v20  ;;  %v1380_v11 = vadd.f32 %v6301_v54, %v6633_v0  ;;  %v1877_v20 = vld [vmem:[%s6310_s3 + $0x5e8] sm:$0xff] }
 0x2f6   :  { %2629 = vmatpush.msra.mxu2 %v1921_v16  ;;  %v1876_v16 = vld [vmem:[%s6310_s3 + $0x5e0] sm:$0xff]  ;;  %v1873_v54 = vld [vmem:[%s6310_s3 + $0x5c8] sm:$0xff] }
 0x2f7   :  { %2280 = vmatpush.msrb.mxu0 %v1805_v40  ;;  %vm1617_vm7 = vcmp.ge.f32.partialorder %v1585_v1, 0.0  ;;  %v1649_v2 = vmul.f32 0.01, %v1585_v1  ;;  %2648 = vmatpush.msrb.mxu3 %v1933_v43  ;;  %v1931_v40 = vld [vmem:[%s6310_s3 + $0x798] sm:$0xff]  ;;  %v1639_v58 = vmul.f32 0.01, %v1575_v26 }
 0x2f8   :  { %2630 = vmatpush.msra.mxu2 %v1920_v12  ;;  %vm1607_vm10 = vcmp.ge.f32.partialorder %v1575_v26, 0.0  ;;  %v1875_v43 = vld [vmem:[%s6310_s3 + $0x5d8] sm:$0xff]  ;;  %v1874_v12 = vld [vmem:[%s6310_s3 + $0x5d0] sm:$0xff] }
 0x2f9   :  { %2281 = vmatpush.msrb.mxu0 %v1804_v31  ;;  %v1681_v21 = vsel %vm1617_vm7, %v1585_v1, %v1649_v2  ;;  %2649 = vmatpush.msrb.mxu3 %v1932_v29  ;;  %v1930_v31 = vld [vmem:[%s6310_s3 + $0x790] sm:$0xff]  ;;  %v1281_v1 = vpop.f32.mrf.mxu1  ;;  %v1929_v2 = vld [vmem:[%s6310_s3 + $0x788] sm:$0xff] }
 0x2fa   :  { %v1506_v35 = vpop.f32.mrf.mxu3  ;;  %5429 = vmatmul.msk.f32.vlgmr.msrb.gmra.mxu2 %vm1944_vm11, %v1681_v21  ;;  %v1846_v21 = vld [vmem:[%s6310_s3 + $0x4f0] sm:$0xff] }
 0x2fb   :  { %2282 = vmatpush.msrb.mxu0 %v1803_v56  ;;  %v1550_v17 = vadd.f32 %v1506_v35, %v1389_v47  ;;  %2650 = vmatpush.msrb.mxu3 %v1931_v40  ;;  %v1808_v56 = vld [vmem:[%s6310_s3 + $0x3c0] sm:$0xff]  ;;  %v1671_v47 = vsel %vm1607_vm10, %v1575_v26, %v1639_v58  ;;  %v1911_v26 = vld [vmem:[%s6310_s3 + $0x6f8] sm:$0xff]  ;;  %v1392_v40 = vadd.f32 %v6330_v60, %v6712_v32  ;;  %v1905_v60 = vld [vmem:[%s6310_s3 + $0x6c8] sm:$0xff] }
 0x2fd   :  { %2283 = vmatpush.msrb.mxu0 %v1802_v48  ;;  %v1586_v61 = vadd.f32 %v6685_v45, %v1550_v17  ;;  %2651 = vmatpush.msrb.mxu3 %v1930_v31  ;;  %v1398_v48 = vadd.f32 %v6345_v15, %v1281_v1  ;;  %v1844_v15 = vld [vmem:[%s6310_s3 + $0x4e0] sm:$0xff]  ;;  %v1907_v1 = vld [vmem:[%s6310_s3 + $0x6d8] sm:$0xff] }
 0x2fe   :  { %v1908_v31 = vld [vmem:[%s6310_s3 + $0x6e0] sm:$0xff] }
 0x2ff   :  { %2284 = vmatpush.msrb.mxu0 %v1801_v28  ;;  %vm1618_vm9 = vcmp.ge.f32.partialorder %v1586_v61, 0.0  ;;  %v1650_v22 = vmul.f32 0.01, %v1586_v61  ;;  %2652 = vmatpush.msrb.mxu3 %v1929_v2  ;;  %v1845_v28 = vld [vmem:[%s6310_s3 + $0x4e8] sm:$0xff]  ;;  %v1904_v2 = vld [vmem:[%s6310_s3 + $0x6c0] sm:$0xff] }
 0x301   :  { %2285 = vmatpush.msrb.mxu0 %v1800_v10  ;;  %v1682_v30 = vsel %vm1618_vm9, %v1586_v61, %v1650_v22  ;;  %2653 = vmatpush.msrb.mxu3 %v1928_v42  ;;  %v1284_v51 = vpop.f32.mrf.mxu1  ;;  %v6770_v10 = vpop.f32.mrf.mxu0  ;;  %v1843_v61 = vld [vmem:[%s6310_s3 + $0x4d8] sm:$0xff]  ;;  %v1841_v22 = vld [vmem:[%s6310_s3 + $0x4c8] sm:$0xff] }
 0x302   :  { %5418 = vmatmul.msk.f32.vlgmr.msrb.gmra.mxu0 %vm1944_vm11, %v1670_v34  ;;  %v6736_v59 = vpop.f32.mrf.mxu3  ;;  %5430 = vmatmul.msk.f32.vlgmr.msra.gmra.mxu3 %vm1944_vm11, %v1682_v30  ;;  %v1401_v8 = vadd.f32 %v6351_v39, %v1284_v51  ;;  %v1840_v30 = vld [vmem:[%s6310_s3 + $0x4c0] sm:$0xff] }
 0x303   :  { %2301 = vmatpush.msra.mxu0 %v1815_v9  ;;  %v1936_v51 = vld [vmem:[%s6310_s3 + $0x7c0] sm:$0xff] }
 0x305   :  { %2302 = vmatpush.msra.mxu0 %v1814_v3  ;;  %v1643_v3 = vmul.f32 0.01, %v1579_v62 }
 0x307   :  { %2303 = vmatpush.msra.mxu0 %v1813_v24  ;;  %v1675_v4 = vsel %vm1611_vm14, %v1579_v62, %v1643_v3  ;;  %v1878_v24 = vld [vmem:[%s6310_s3 + $0x5f0] sm:$0xff] }
 0x309   :  { %2304 = vmatpush.msra.mxu0 %v1812_v57  ;;  %v6781_v19 = vpop.f32.mrf.mxu0  ;;  %v1547_v57 = vadd.f32 %v6672_v44, %v1380_v11  ;;  %v1872_v44 = vld [vmem:[%s6310_s3 + $0x5c0] sm:$0xff] }
 0x30a   :  { %v1512_v36 = vpop.f32.mrf.mxu3 }
 0x30b   :  { %2305 = vmatpush.msra.mxu0 %v1811_v41  ;;  %v1552_v37 = vadd.f32 %v1512_v36, %v1395_v49  ;;  %v1583_v41 = vadd.f32 %v6685_v45, %v1547_v57 }
 0x30d   :  { %2306 = vmatpush.msra.mxu0 %v1810_v27  ;;  %v1588_v6 = vadd.f32 %v6685_v45, %v1552_v37  ;;  %v1647_v0 = vmul.f32 0.01, %v1583_v41  ;;  %vm1615_vm2 = vcmp.ge.f32.partialorder %v1583_v41, 0.0  ;;  %v1910_v27 = vld [vmem:[%s6310_s3 + $0x6f0] sm:$0xff]  ;;  %v1551_v37 = vadd.f32 %v6736_v59, %v1392_v40  ;;  %v1287_v59 = vpop.f32.mrf.mxu1 }
 0x30f   :  { %2307 = vmatpush.msra.mxu0 %v1809_v13  ;;  %vm1620_vm12 = vcmp.ge.f32.partialorder %v1588_v6, 0.0  ;;  %v1652_v53 = vmul.f32 0.01, %v1588_v6  ;;  %v1679_v49 = vsel %vm1615_vm2, %v1583_v41, %v1647_v0  ;;  %v1909_v13 = vld [vmem:[%s6310_s3 + $0x6e8] sm:$0xff]  ;;  %v1587_v58 = vadd.f32 %v6685_v45, %v1551_v37 }
 0x311   :  { %2308 = vmatpush.msra.mxu0 %v1808_v56  ;;  %v1684_v35 = vsel %vm1620_vm12, %v1588_v6, %v1652_v53  ;;  %v6794_v29 = vpop.f32.mrf.mxu0  ;;  %v1906_v56 = vld [vmem:[%s6310_s3 + $0x6d0] sm:$0xff]  ;;  %v1651_v32 = vmul.f32 0.01, %v1587_v58  ;;  %vm1619_vm4 = vcmp.ge.f32.partialorder %v1587_v58, 0.0 }
 0x312   :  { %5419 = vmatmul.msk.f32.vlgmr.msra.gmra.mxu0 %vm1944_vm11, %v1671_v47  ;;  %v1515_v38 = vpop.f32.mrf.mxu3  ;;  %5432 = vmatmul.msk.f32.vlgmr.msrb.gmra.mxu1 %vm1944_vm11, %v1684_v35  ;;  %v1942_v47 = vld [vmem:[%s6310_s3 + $0x7f0] sm:$0xff]  ;;  %v1941_v35 = vld [vmem:[%s6310_s3 + $0x7e8] sm:$0xff] }
 0x313   :  { %2393 = vmatpush.msrb.mxu0 %v1847_v25  ;;  %v1553_v17 = vadd.f32 %v1515_v38, %v1398_v48  ;;  %v1943_v25 = vld [vmem:[%s6310_s3 + $0x7f8] sm:$0xff]  ;;  %v1683_v53 = vsel %vm1619_vm4, %v1587_v58, %v1651_v32  ;;  %v1404_v48 = vadd.f32 %v6355_v23, %v1287_v59  ;;  %v1940_v38 = vld [vmem:[%s6310_s3 + $0x7e0] sm:$0xff]  ;;  %v1938_v23 = vld [vmem:[%s6310_s3 + $0x7d0] sm:$0xff] }
 0x315   :  { %2394 = vmatpush.msrb.mxu0 %v1846_v21  ;;  %v1589_v52 = vadd.f32 %v6685_v45, %v1553_v17 }
 0x317   :  { %2395 = vmatpush.msrb.mxu0 %v1845_v28  ;;  %vm1621_vm13 = vcmp.ge.f32.partialorder %v1589_v52, 0.0  ;;  %v1653_v18 = vmul.f32 0.01, %v1589_v52  ;;  %v1939_v28 = vld [vmem:[%s6310_s3 + $0x7d8] sm:$0xff] }
 0x319   :  { %2396 = vmatpush.msrb.mxu0 %v1844_v15  ;;  %v1685_v33 = vsel %vm1621_vm13, %v1589_v52, %v1653_v18  ;;  %v6803_v36 = vpop.f32.mrf.mxu0  ;;  %v1937_v15 = vld [vmem:[%s6310_s3 + $0x7c8] sm:$0xff]  ;;  %s5766_s3 = smov 16  }
 0x31a   :  { %v1518_v9 = vpop.f32.mrf.mxu3  ;;  %5433 = vmatmul.msk.f32.vlgmr.msra.gmra.mxu2 %vm1944_vm11, %v1685_v33  ;;  %v2818_v33 = vld [vmem:[%s5249_s16 + $0x8] sm:$0x7f]  ;;  %s6991_s6 = sld [smem:[%s7771_s0 + %s5766_s3]]   ;;  %s5782_s3 = smov 30  }
 0x31b   :  { %2397 = vmatpush.msrb.mxu0 %v1843_v61  ;;  %v1554_v34 = vadd.f32 %v1518_v9, %v1401_v8  ;;  %v2817_v9 = vld [vmem:[%s5249_s16] sm:$0xff]  ;;  %5438 = vmatpush.msk.msra.mxu3 %vm141_vm0, %v2818_v33  ;;  %v2753_v33 = vld [vmem:[%s5245_s20 + $0x8] sm:$0xff] }
 0x31d   :  { %2398 = vmatpush.msrb.mxu0 %v1842_v46  ;;  %v1590_v63 = vadd.f32 %v6685_v45, %v1554_v34  ;;  %2845 = vmatpush.msra.mxu3 %v2817_v9  ;;  %v2682_v34 = vsel %vm296_vm3, %v6781_v19, 0.0 }
 0x31f   :  { %2399 = vmatpush.msrb.mxu0 %v1841_v22  ;;  %vm1622_vm15 = vcmp.ge.f32.partialorder %v1590_v63, 0.0  ;;  %v1654_v39 = vmul.f32 0.01, %v1590_v63  ;;  %v2824_v22 = vpop.permute.xlu0 %2823 }
 0x321   :  { %2400 = vmatpush.msrb.mxu0 %v1840_v30  ;;  %v1686_v7 = vsel %vm1622_vm15, %v1590_v63, %v1654_v39  ;;  %v2057_v6 = vpop.f32.mrf.mxu0  ;;  %v2681_v30 = vsel %vm296_vm3, %v6770_v10, 0.0  ;;  %v2684_v63 = vsel %vm296_vm3, %v6794_v29, 0.0  ;;  %v2686_v39 = vsel %vm296_vm3, %v6803_v36, 0.0 }
 0x322   :  { %5423 = vmatmul.msk.f32.vlgmr.msrb.gmra.mxu0 %vm1944_vm11, %v1675_v4  ;;  %5434 = vmatmul.msk.f32.vlgmr.msrb.gmra.mxu3 %vm1944_vm11, %v1686_v7  ;;  %v1521_v42 = vpop.f32.mrf.mxu3 }
 0x323   :  { %2485 = vmatpush.msra.mxu0 %v1879_v5  ;;  %v1555_v50 = vadd.f32 %v1521_v42, %v1404_v48  ;;  %v2683_v5 = vadd.f32 %v2682_v34, %v2681_v30  ;;  %v2752_v34 = vld [vmem:[%s5245_s20] sm:$0xff]  ;;  %v2856_v30 = vld [vmem:[%s6872_s24 + $0x18] sm:$0xff] }
 0x325   :  { %2486 = vmatpush.msra.mxu0 %v1878_v24  ;;  %v1591_v17 = vadd.f32 %v6685_v45, %v1555_v50  ;;  %v2685_v4 = vadd.f32 %v2684_v63, %v2683_v5  ;;  %v2688_v24 = vsel %vm296_vm3, %v2057_v6, 0.0  ;;  %v2864_v63 = vld [vmem:[%s6872_s24 + $0x58] sm:$0xff] }
 0x326   :  { %v2868_v5 = vld [vmem:[%s6872_s24 + $0x78] sm:$0xff]  ;;  %3036 = vmatpush.msrb.mxu3 %v2864_v63  ;;  %v2885_v63 = vld [vmem:[%s6872_s24 + $0x100] sm:$0xff] }
 0x327   :  { %2487 = vmatpush.msra.mxu0 %v1877_v20  ;;  %v1655_v52 = vmul.f32 0.01, %v1591_v17  ;;  %vm1623_vm5 = vcmp.ge.f32.partialorder %v1591_v17, 0.0  ;;  %v2687_v7 = vadd.f32 %v2686_v39, %v2685_v4 }
 0x329   :  { %2488 = vmatpush.msra.mxu0 %v1876_v16  ;;  %v2080_v21 = vpop.f32.mrf.mxu0  ;;  %v1687_v61 = vsel %vm1623_vm5, %v1591_v17, %v1655_v52  ;;  %v2689_v20 = vadd.f32 %v2688_v24, %v2687_v7 }
 0x32a   :  { %5439 = vmatmul.msk.f32.vlgmr.msra.gmra.mxu3 %vm137_vm1, %v2824_v22  ;;  %v2690_v11 = vsel %vm296_vm3, %v2080_v21, 0.0 }
 0x32b   :  { %2489 = vmatpush.msra.mxu0 %v1875_v43  ;;  %v2691_v16 = vadd.f32 %v2690_v11, %v2689_v20 }
 0x32d   :  { %2490 = vmatpush.msra.mxu0 %v1874_v12 }
 0x32f   :  { %2491 = vmatpush.msra.mxu0 %v1873_v54 }
 0x331   :  { %2492 = vmatpush.msra.mxu0 %v1872_v44  ;;  %v2103_v55 = vpop.f32.mrf.mxu0 }
 0x332   :  { %5427 = vmatmul.msk.f32.vlgmr.msra.gmra.mxu0 %vm1944_vm11, %v1679_v49  ;;  %v2692_v19 = vsel %vm296_vm3, %v2103_v55, 0.0 }
 0x333   :  { %2577 = vmatpush.msrb.mxu0 %v1911_v26  ;;  %v2693_v43 = vadd.f32 %v2692_v19, %v2691_v16 }
 0x335   :  { %2578 = vmatpush.msrb.mxu0 %v1910_v27 }
 0x337   :  { %2579 = vmatpush.msrb.mxu0 %v1909_v13 }
 0x339   :  { %2580 = vmatpush.msrb.mxu0 %v1908_v31  ;;  %v2126_v18 = vpop.f32.mrf.mxu0 }
 0x33a   :  { %v2694_v10 = vsel %vm296_vm3, %v2126_v18, 0.0  ;;  %v2755_v18 = vld [vmem:[%s5245_s20 + $0x18] sm:$0xff] }
 0x33b   :  { %2581 = vmatpush.msrb.mxu0 %v1907_v1  ;;  %v2695_v12 = vadd.f32 %v2694_v10, %v2693_v43  ;;  %2775 = vmatpush.msra.mxu1 %v2755_v18 }
 0x33d   :  { %2582 = vmatpush.msrb.mxu0 %v1906_v56  ;;  %v2356_v59 = vpop.f32.mrf.mxu2 }
 0x33f   :  { %2583 = vmatpush.msrb.mxu0 %v1905_v60  ;;  %v2333_v60 = vpop.f32.mrf.mxu1 }
 0x341   :  { %2584 = vmatpush.msrb.mxu0 %v1904_v2  ;;  %v2149_v45 = vpop.f32.mrf.mxu0  ;;  %v2712_v2 = vsel %vm296_vm3, %v2333_v60, 0.0  ;;  %v2854_v60 = vld [vmem:[%s6872_s24 + $0x8] sm:$0xff] }
 0x342   :  { %5431 = vmatmul.msk.f32.vlgmr.msrb.gmra.mxu0 %vm1944_vm11, %v1683_v53  ;;  %v2696_v41 = vsel %vm296_vm3, %v2149_v45, 0.0  ;;  %v2714_v53 = vsel %vm296_vm3, %v2356_v59, 0.0  ;;  %v2853_v59 = vld [vmem:[%s6872_s24] sm:$0xff] }
 0x343   :  { %2669 = vmatpush.msra.mxu0 %v1943_v25  ;;  %v2697_v54 = vadd.f32 %v2696_v41, %v2695_v12 }
 0x345   :  { %2670 = vmatpush.msra.mxu0 %v1942_v47  ;;  %v2379_v42 = vpop.f32.mrf.mxu3 }
 0x346   :  { %v2716_v21 = vsel %vm296_vm3, %v2379_v42, 0.0  ;;  %v2872_v42 = vld [vmem:[%s6872_s24 + $0x98] sm:$0xff] }
 0x347   :  { %2671 = vmatpush.msra.mxu0 %v1941_v35 }
 0x349   :  { %2672 = vmatpush.msra.mxu0 %v1940_v38  ;;  %v2172_v62 = vpop.f32.mrf.mxu0 }
 0x34a   :  { %v2698_v29 = vsel %vm296_vm3, %v2172_v62, 0.0 }
 0x34b   :  { %2673 = vmatpush.msra.mxu0 %v1939_v28  ;;  %v2699_v26 = vadd.f32 %v2698_v29, %v2697_v54 }
 0x34d   :  { %2674 = vmatpush.msra.mxu0 %v1938_v23 }
 0x34f   :  { %2675 = vmatpush.msra.mxu0 %v1937_v15  ;;  %v2425_v38 = vpop.f32.mrf.mxu1 }
 0x350   :  { %v2720_v17 = vsel %vm296_vm3, %v2425_v38, 0.0  ;;  %v2870_v38 = vld [vmem:[%s6872_s24 + $0x88] sm:$0xff] }
 0x351   :  { %2676 = vmatpush.msra.mxu0 %v1936_v51  ;;  %v2195_v8 = vpop.f32.mrf.mxu0 }
 0x352   :  { %5435 = vmatmul.msk.f32.vlgmr.msra.gmra.mxu0 %vm1944_vm11, %v1687_v61  ;;  %v2700_v44 = vsel %vm296_vm3, %v2195_v8, 0.0  ;;  %v2754_v8 = vld [vmem:[%s5245_s20 + $0x10] sm:$0xff] }
 0x353   :  { %v2701_v27 = vadd.f32 %v2700_v44, %v2699_v26  ;;  %2776 = vmatpush.msra.mxu1 %v2754_v8  ;;  %3056 = vmatpush.msrb.mxu0 %v2868_v5  ;;  %v2896_v8 = vld [vmem:[%s6872_s24 + $0x158] sm:$0xff]  ;;  %v2893_v5 = vld [vmem:[%s6872_s24 + $0x140] sm:$0xff] }
 0x355   :  { %2777 = vmatpush.msra.mxu1 %v2753_v33  ;;  %v2887_v33 = vld [vmem:[%s6872_s24 + $0x110] sm:$0xff] }
 0x357   :  { %2778 = vmatpush.msra.mxu1 %v2752_v34  ;;  %v2886_v34 = vld [vmem:[%s6872_s24 + $0x108] sm:$0xff] }
 0x359   :  { %v2218_v46 = vpop.f32.mrf.mxu0  ;;  %2996 = vmatpush.msrb.mxu1 %v2856_v30  ;;  %v2898_v30 = vld [vmem:[%s6872_s24 + $0x168] sm:$0xff] }
 0x35a   :  { %v2702_v49 = vsel %vm296_vm3, %v2218_v46, 0.0 }
 0x35b   :  { %v2703_v36 = vadd.f32 %v2702_v49, %v2701_v27 }
 0x35d   :  { %v2448_v23 = vpop.f32.mrf.mxu2 }
 0x35e   :  { %v2722_v15 = vsel %vm296_vm3, %v2448_v23, 0.0  ;;  %v2869_v23 = vld [vmem:[%s6872_s24 + $0x80] sm:$0xff] }
 0x361   :  { %v2241_v3 = vpop.f32.mrf.mxu0 }
 0x362   :  { %v2704_v40 = vsel %vm296_vm3, %v2241_v3, 0.0 }
 0x363   :  { %v2705_v37 = vadd.f32 %v2704_v40, %v2703_v36  ;;  %v5734_v40 = vld [vmem:[%s6821_s8] ss:$0 sm:$0xff]  ;;  %s7709_s8 = sld [smem:[%s7771_s0 + %s5774_s5]]  }
 0x365   :  { %v2471_v52 = vpop.f32.mrf.mxu3 }
 0x366   :  { %v2724_v45 = vsel %vm296_vm3, %v2471_v52, 0.0  ;;  %v5735_v52 = vld [vmem:[%s6833_s12] ss:$0 sm:$0xff] }
 0x36f   :  { %v2264_v57 = vpop.f32.mrf.mxu0  ;;  %v2517_v9 = vpop.f32.mrf.mxu1 }
 0x370   :  { %v2706_v13 = vsel %vm296_vm3, %v2264_v57, 0.0  ;;  %v2728_v3 = vsel %vm296_vm3, %v2517_v9, 0.0  ;;  %v2895_v9 = vld [vmem:[%s6872_s24 + $0x150] sm:$0xff] }
 0x371   :  { %v2707_v58 = vadd.f32 %v2706_v13, %v2705_v37 }
 0x37d   :  { %v2540_v39 = vpop.f32.mrf.mxu2 }
 0x37e   :  { %v2730_v24 = vsel %vm296_vm3, %v2540_v39, 0.0  ;;  %v2897_v39 = vld [vmem:[%s6872_s24 + $0x160] sm:$0xff] }
 0x37f   :  { %v2287_v0 = vpop.f32.mrf.mxu0 }
 0x380   :  { %v2708_v1 = vsel %vm296_vm3, %v2287_v0, 0.0 }
 0x381   :  { %v2709_v6 = vadd.f32 %v2708_v1, %v2707_v58  ;;  %v2855_v58 = vld [vmem:[%s6872_s24 + $0x10] sm:$0xff] }
 0x382   :  { %2997 = vmatpush.msrb.mxu1 %v2855_v58  ;;  %v2925_v58 = vld [vmem:[%s6872_s24 + $0x240] sm:$0xff] }
 0x384   :  { %2998 = vmatpush.msrb.mxu1 %v2854_v60  ;;  %v2929_v60 = vld [vmem:[%s6872_s24 + $0x260] sm:$0xff] }
 0x385   :  { %v2563_v7 = vpop.f32.mrf.mxu3 }
 0x386   :  { %v2732_v57 = vsel %vm296_vm3, %v2563_v7, 0.0  ;;  %2999 = vmatpush.msrb.mxu1 %v2853_v59  ;;  %v2916_v7 = vld [vmem:[%s6872_s24 + $0x1f8] sm:$0xff]  ;;  %v2943_v59 = vld [vmem:[%s6872_s24 + $0x2d0] sm:$0xff] }
 0x38f   :  { %v2310_v31 = vpop.f32.mrf.mxu0  ;;  %v2609_v10 = vpop.f32.mrf.mxu1 }
 0x390   :  { %v2710_v56 = vsel %vm296_vm3, %v2310_v31, 0.0  ;;  %v2736_v41 = vsel %vm296_vm3, %v2609_v10, 0.0  ;;  %v2914_v10 = vld [vmem:[%s6872_s24 + $0x1e8] sm:$0xff] }
 0x391   :  { %v2711_v32 = vadd.f32 %v2710_v56, %v2709_v6  ;;  %v2863_v56 = vld [vmem:[%s6872_s24 + $0x50] sm:$0xff] }
 0x392   :  { %v2867_v6 = vld [vmem:[%s6872_s24 + $0x70] sm:$0xff]  ;;  %3037 = vmatpush.msrb.mxu3 %v2863_v56  ;;  %v2936_v56 = vld [vmem:[%s6872_s24 + $0x298] sm:$0xff] }
 0x393   :  { %v2713_v25 = vadd.f32 %v2712_v2, %v2711_v32  ;;  %v2862_v32 = vld [vmem:[%s6872_s24 + $0x48] sm:$0xff]  ;;  %3057 = vmatpush.msrb.mxu0 %v2867_v6  ;;  %v2944_v6 = vld [vmem:[%s6872_s24 + $0x2d8] sm:$0xff] }
 0x394   :  { %v2866_v2 = vld [vmem:[%s6872_s24 + $0x68] sm:$0xff]  ;;  %3038 = vmatpush.msrb.mxu3 %v2862_v32  ;;  %v2948_v32 = vld [vmem:[%s6872_s24 + $0x2f8] sm:$0xff] }
 0x395   :  { %v2715_v48 = vadd.f32 %v2714_v53, %v2713_v25  ;;  %v2861_v25 = vld [vmem:[%s6872_s24 + $0x40] sm:$0xff]  ;;  %3058 = vmatpush.msrb.mxu0 %v2866_v2  ;;  %v2935_v2 = vld [vmem:[%s6872_s24 + $0x290] sm:$0xff] }
 0x396   :  { %v2865_v53 = vld [vmem:[%s6872_s24 + $0x60] sm:$0xff]  ;;  %3039 = vmatpush.msrb.mxu3 %v2861_v25  ;;  %v2947_v25 = vld [vmem:[%s6872_s24 + $0x2f0] sm:$0xff] }
 0x397   :  { %v2717_v50 = vadd.f32 %v2716_v21, %v2715_v48  ;;  %v2884_v48 = vld [vmem:[%s6872_s24 + $0xf8] sm:$0xff]  ;;  %v2871_v21 = vld [vmem:[%s6872_s24 + $0x90] sm:$0xff]  ;;  %3059 = vmatpush.msrb.mxu0 %v2865_v53  ;;  %v2934_v53 = vld [vmem:[%s6872_s24 + $0x288] sm:$0xff] }
 0x399   :  { %3136 = vmatpush.msra.mxu0 %v2884_v48  ;;  %v2933_v48 = vld [vmem:[%s6872_s24 + $0x280] sm:$0xff] }
 0x39d   :  { %v2632_v12 = vpop.f32.mrf.mxu2 }
 0x39e   :  { %v2738_v54 = vsel %vm296_vm3, %v2632_v12, 0.0  ;;  %v2909_v12 = vld [vmem:[%s6872_s24 + $0x1c0] sm:$0xff] }
 0x39f   :  { %v2402_v47 = vpop.f32.mrf.mxu0 }
 0x3a0   :  { %v2718_v35 = vsel %vm296_vm3, %v2402_v47, 0.0  ;;  %v2880_v47 = vld [vmem:[%s6872_s24 + $0xd8] sm:$0xff] }
 0x3a1   :  { %v2719_v28 = vadd.f32 %v2718_v35, %v2717_v50  ;;  %v2879_v35 = vld [vmem:[%s6872_s24 + $0xd0] sm:$0xff]  ;;  %3116 = vmatpush.msra.mxu3 %v2880_v47  ;;  %v2946_v47 = vld [vmem:[%s6872_s24 + $0x2e8] sm:$0xff] }
 0x3a2   :  { %v2883_v50 = vld [vmem:[%s6872_s24 + $0xf0] sm:$0xff] }
 0x3a3   :  { %v2721_v55 = vadd.f32 %v2720_v17, %v2719_v28  ;;  %v2878_v28 = vld [vmem:[%s6872_s24 + $0xc8] sm:$0xff]  ;;  %3117 = vmatpush.msra.mxu3 %v2879_v35  ;;  %3137 = vmatpush.msra.mxu0 %v2883_v50  ;;  %v2952_v35 = vld [vmem:[%s6872_s24 + $0x318] sm:$0xff]  ;;  %v2945_v50 = vld [vmem:[%s6872_s24 + $0x2e0] sm:$0xff] }
 0x3a4   :  { %v2882_v17 = vld [vmem:[%s6872_s24 + $0xe8] sm:$0xff] }
 0x3a5   :  { %v2723_v61 = vadd.f32 %v2722_v15, %v2721_v55  ;;  %v2655_v0 = vpop.f32.mrf.mxu3  ;;  %v2877_v55 = vld [vmem:[%s6872_s24 + $0xc0] sm:$0xff]  ;;  %3118 = vmatpush.msra.mxu3 %v2878_v28  ;;  %3138 = vmatpush.msra.mxu0 %v2882_v17  ;;  %v2964_v28 = vld [vmem:[%s6872_s24 + $0x378] sm:$0xff]  ;;  %v2951_v17 = vld [vmem:[%s6872_s24 + $0x310] sm:$0xff] }
 0x3a6   :  { %v2740_v26 = vsel %vm296_vm3, %v2655_v0, 0.0  ;;  %v2881_v15 = vld [vmem:[%s6872_s24 + $0xe0] sm:$0xff]  ;;  %v2928_v0 = vld [vmem:[%s6872_s24 + $0x258] sm:$0xff] }
 0x3a7   :  { %v2725_v46 = vadd.f32 %v2724_v45, %v2723_v61  ;;  %3119 = vmatpush.msra.mxu3 %v2877_v55  ;;  %3139 = vmatpush.msra.mxu0 %v2881_v15  ;;  %v2888_v45 = vld [vmem:[%s6872_s24 + $0x118] sm:$0xff]  ;;  %v2963_v55 = vld [vmem:[%s6872_s24 + $0x370] sm:$0xff]  ;;  %v2950_v15 = vld [vmem:[%s6872_s24 + $0x308] sm:$0xff] }
 0x3af   :  { %v2494_v51 = vpop.f32.mrf.mxu0 }
 0x3b0   :  { %v2726_v62 = vsel %vm296_vm3, %v2494_v51, 0.0  ;;  %v2847_v51 = vpop.f32.mrf.mxu3 }
 0x3b1   :  { %v2727_v22 = vadd.f32 %v2726_v62, %v2725_v46  ;;  %v2848_v61 = vadd.f32 %v5735_v52, %v2847_v51  ;;  %v2900_v46 = vld [vmem:[%s6872_s24 + $0x178] sm:$0xff]  ;;  %v2958_v52 = vld [vmem:[%s6872_s24 + $0x348] sm:$0xff] }
 0x3b2   :  { %v2962_v51 = vld [vmem:[%s6872_s24 + $0x368] sm:$0xff] }
 0x3b3   :  { %v2729_v4 = vadd.f32 %v2728_v3, %v2727_v22  ;;  %vm2850_vm1 = vcmp.ge.f32.partialorder %v2848_v61, 0.0  ;;  %v2851_v18 = vmul.f32 0.01, %v2848_v61  ;;  %v2899_v22 = vld [vmem:[%s6872_s24 + $0x170] sm:$0xff]  ;;  %v2894_v3 = vld [vmem:[%s6872_s24 + $0x148] sm:$0xff] }
 0x3b5   :  { %v2731_v11 = vadd.f32 %v2730_v24, %v2729_v4  ;;  %v6917_v62 = vsel %vm2850_vm1, %v2848_v61, %v2851_v18  ;;  %v2904_v4 = vld [vmem:[%s6872_s24 + $0x198] sm:$0xff]  ;;  %v2949_v61 = vld [vmem:[%s6872_s24 + $0x300] sm:$0xff] }
 0x3b6   :  { %5442 = vmatmul.msk.f32.vlgmr.msrb.gmra.mxu3 %vm296_vm3, %v6917_v62  ;;  %5443 = vmatmul.msk.f32.vlgmr.msrb.gmra.mxu0 %vm296_vm3, %v6917_v62  ;;  %v2912_v24 = vld [vmem:[%s6872_s24 + $0x1d8] sm:$0xff]  ;;  %v2957_v18 = vld [vmem:[%s6872_s24 + $0x340] sm:$0xff] }
 0x3b7   :  { %v2733_v16 = vadd.f32 %v2732_v57, %v2731_v11  ;;  %3196 = vmatpush.msrb.mxu3 %v2896_v8  ;;  %3216 = vmatpush.msrb.mxu0 %v2900_v46  ;;  %v2903_v11 = vld [vmem:[%s6872_s24 + $0x190] sm:$0xff]  ;;  %v2961_v8 = vld [vmem:[%s6872_s24 + $0x360] sm:$0xff]  ;;  %v2976_v46 = vld [vmem:[%s6872_s24 + $0x3d8] sm:$0xff] }
 0x3b8   :  { %v2915_v57 = vld [vmem:[%s6872_s24 + $0x1f0] sm:$0xff] }
 0x3b9   :  { %3197 = vmatpush.msrb.mxu3 %v2895_v9  ;;  %3217 = vmatpush.msrb.mxu0 %v2899_v22  ;;  %v2967_v9 = vld [vmem:[%s6872_s24 + $0x390] sm:$0xff] }
 0x3ba   :  { %v2975_v22 = vld [vmem:[%s6872_s24 + $0x3d0] sm:$0xff] }
 0x3bb   :  { %3198 = vmatpush.msrb.mxu3 %v2894_v3  ;;  %3218 = vmatpush.msrb.mxu0 %v2898_v30  ;;  %v2783_v3 = vld [vmem:[%s6937_s2] sm:$0xff]  ;;  %v2966_v30 = vld [vmem:[%s6872_s24 + $0x388] sm:$0xff] }
 0x3bd   :  { %3199 = vmatpush.msrb.mxu3 %v2893_v5  ;;  %3219 = vmatpush.msrb.mxu0 %v2897_v39  ;;  %v2978_v5 = vld [vmem:[%s6872_s24 + $0x3e8] sm:$0xff]  ;;  %v2860_v39 = vld [vmem:[%s6872_s24 + $0x38] sm:$0xff] }
 0x3be   :  { %5446 = vmatmul.msk.f32.vlgmr.msra.gmra.mxu3 %vm296_vm3, %v6917_v62  ;;  %5447 = vmatmul.msk.f32.vlgmr.msra.gmra.mxu0 %vm296_vm3, %v6917_v62 }
 0x3bf   :  { %v2586_v20 = vpop.f32.mrf.mxu0  ;;  %3276 = vmatpush.msra.mxu3 %v2912_v24  ;;  %3296 = vmatpush.msra.mxu0 %v2916_v7  ;;  %v2973_v24 = vld [vmem:[%s6872_s24 + $0x3c0] sm:$0xff] }
 0x3c0   :  { %v2734_v19 = vsel %vm296_vm3, %v2586_v20, 0.0  ;;  %v2911_v20 = vld [vmem:[%s6872_s24 + $0x1d0] sm:$0xff]  ;;  %v2977_v7 = vld [vmem:[%s6872_s24 + $0x3e0] sm:$0xff] }
 0x3c1   :  { %v2735_v43 = vadd.f32 %v2734_v19, %v2733_v16  ;;  %v2902_v19 = vld [vmem:[%s6872_s24 + $0x188] sm:$0xff]  ;;  %3277 = vmatpush.msra.mxu3 %v2911_v20  ;;  %3297 = vmatpush.msra.mxu0 %v2915_v57  ;;  %v2857_v57 = vld [vmem:[%s6872_s24 + $0x20] sm:$0xff] }
 0x3c2   :  { %v2910_v16 = vld [vmem:[%s6872_s24 + $0x1c8] sm:$0xff] }
 0x3c3   :  { %v2737_v29 = vadd.f32 %v2736_v41, %v2735_v43  ;;  %v2786_v43 = vld [vmem:[%s6937_s2 + $0x18] sm:$0xff]  ;;  %v2901_v41 = vld [vmem:[%s6872_s24 + $0x180] sm:$0xff]  ;;  %3278 = vmatpush.msra.mxu3 %v2910_v16  ;;  %3298 = vmatpush.msra.mxu0 %v2914_v10  ;;  %v2858_v20 = vld [vmem:[%s6872_s24 + $0x28] sm:$0xff] }
 0x3c4   :  { %2806 = vmatpush.msrb.mxu2 %v2786_v43  ;;  %v2876_v43 = vld [vmem:[%s6872_s24 + $0xb8] sm:$0xff] }
 0x3c5   :  { %v2739_v44 = vadd.f32 %v2738_v54, %v2737_v29  ;;  %v2913_v29 = vld [vmem:[%s6872_s24 + $0x1e0] sm:$0xff]  ;;  %v2920_v54 = vld [vmem:[%s6872_s24 + $0x218] sm:$0xff]  ;;  %3279 = vmatpush.msra.mxu3 %v2909_v12  ;;  %v2874_v12 = vld [vmem:[%s6872_s24 + $0xa8] sm:$0xff] }
 0x3c6   :  { %5450 = vmatmul.msk.f32.vlgmr.msrb.gmra.mxu3 %vm296_vm3, %v6917_v62  ;;  %5451 = vmatmul.msk.f32.vlgmr.msrb.gmra.mxu0 %vm296_vm3, %v6917_v62 }
 0x3c7   :  { %v2741_v27 = vadd.f32 %v2740_v26, %v2739_v44  ;;  %v2932_v44 = vld [vmem:[%s6872_s24 + $0x278] sm:$0xff]  ;;  %v2785_v26 = vld [vmem:[%s6937_s2 + $0x10] sm:$0xff]  ;;  %3299 = vmatpush.msra.mxu0 %v2913_v29  ;;  %3356 = vmatpush.msrb.mxu3 %v2928_v0  ;;  %v2873_v29 = vld [vmem:[%s6872_s24 + $0xa0] sm:$0xff] }
 0x3c8   :  { %2807 = vmatpush.msrb.mxu2 %v2785_v26  ;;  %v2891_v0 = vld [vmem:[%s6872_s24 + $0x130] sm:$0xff]  ;;  %v2889_v26 = vld [vmem:[%s6872_s24 + $0x120] sm:$0xff] }
 0x3c9   :  { %3376 = vmatpush.msrb.mxu0 %v2932_v44  ;;  %v2890_v44 = vld [vmem:[%s6872_s24 + $0x128] sm:$0xff] }
 0x3ce   :  { %5454 = vmatmul.msk.f32.vlgmr.msra.gmra.mxu3 %vm296_vm3, %v6917_v62  ;;  %5455 = vmatmul.msk.f32.vlgmr.msra.gmra.mxu0 %vm296_vm3, %v6917_v62 }
 0x3cf   :  { %v2678_v49 = vpop.f32.mrf.mxu0 }
 0x3d0   :  { %v2742_v36 = vsel %vm296_vm3, %v2678_v49, 0.0  ;;  %v2919_v49 = vld [vmem:[%s6872_s24 + $0x210] sm:$0xff] }
 0x3d1   :  { %v2743_v13 = vadd.f32 %v2742_v36, %v2741_v27  ;;  %v2927_v27 = vld [vmem:[%s6872_s24 + $0x250] sm:$0xff]  ;;  %v2784_v36 = vld [vmem:[%s6937_s2 + $0x8] sm:$0xff]  ;;  %s5265_s2 = sld [smem:[%s7771_s0 + %s5781_s29]]  }
 0x3d2   :  { %3357 = vmatpush.msrb.mxu3 %v2927_v27  ;;  %2808 = vmatpush.msrb.mxu2 %v2784_v36  ;;  %v2907_v27 = vld [vmem:[%s6872_s24 + $0x1b0] sm:$0xff]  ;;  %v2905_v36 = vld [vmem:[%s6872_s24 + $0x1a0] sm:$0xff] }
 0x3d3   :  { %v2748_v37 = vadd.f32 %v5734_v40, %v2743_v13  ;;  %v2931_v40 = vld [vmem:[%s6872_s24 + $0x270] sm:$0xff]  ;;  %v2918_v13 = vld [vmem:[%s6872_s24 + $0x208] sm:$0xff] }
 0x3d4   :  { %3377 = vmatpush.msrb.mxu0 %v2931_v40  ;;  %2809 = vmatpush.msrb.mxu2 %v2783_v3  ;;  %v2906_v40 = vld [vmem:[%s6872_s24 + $0x1a8] sm:$0xff]  ;;  %v4375_v3 = vld [vmem:[%s7128_s18 + $0x30] sm:$0xff] }
 0x3d5   :  { %vm2749_vm0 = vcmp.ge.f32.partialorder %v2748_v37, 0.0  ;;  %v2750_v31 = vmul.f32 0.01, %v2748_v37 }
 0x3d6   :  { %3016 = vmatpush.msra.mxu2 %v2860_v39 }
 0x3d7   :  { %v2751_v1 = vsel %vm2749_vm0, %v2748_v37, %v2750_v31  ;;  %v2926_v37 = vld [vmem:[%s6872_s24 + $0x248] sm:$0xff]  ;;  %v2917_v31 = vld [vmem:[%s6872_s24 + $0x200] sm:$0xff] }
 0x3d8   :  { %5436 = vmatmul.msk.f32.vlgmr.msra.gmra.mxu1 %vm296_vm3, %v2751_v1  ;;  %3358 = vmatpush.msrb.mxu3 %v2926_v37  ;;  %v2930_v1 = vld [vmem:[%s6872_s24 + $0x268] sm:$0xff]  ;;  %v2923_v37 = vld [vmem:[%s6872_s24 + $0x230] sm:$0xff] }
 0x3d9   :  { %3076 = vmatpush.msra.mxu1 %v2872_v42  ;;  %3378 = vmatpush.msrb.mxu0 %v2930_v1  ;;  %v2942_v42 = vld [vmem:[%s6872_s24 + $0x2c8] sm:$0xff]  ;;  %v2921_v1 = vld [vmem:[%s6872_s24 + $0x220] sm:$0xff] }
 0x3da   :  { %3359 = vmatpush.msrb.mxu3 %v2925_v58  ;;  %v2940_v58 = vld [vmem:[%s6872_s24 + $0x2b8] sm:$0xff] }
 0x3db   :  { %3077 = vmatpush.msra.mxu1 %v2871_v21  ;;  %3379 = vmatpush.msrb.mxu0 %v2929_v60  ;;  %v2941_v21 = vld [vmem:[%s6872_s24 + $0x2c0] sm:$0xff] }
 0x3dc   :  { %3436 = vmatpush.msra.mxu3 %v2944_v6  ;;  %5459 = vmatmul.msk.f32.vlgmr.msrb.gmra.mxu0 %vm296_vm3, %v6917_v62  ;;  %v2938_v6 = vld [vmem:[%s6872_s24 + $0x2a8] sm:$0xff]  ;;  %v2937_v60 = vld [vmem:[%s6872_s24 + $0x2a0] sm:$0xff] }
 0x3dd   :  { %3078 = vmatpush.msra.mxu1 %v2870_v38  ;;  %3456 = vmatpush.msra.mxu0 %v2948_v32  ;;  %v2960_v38 = vld [vmem:[%s6872_s24 + $0x358] sm:$0xff] }
 0x3de   :  { %3437 = vmatpush.msra.mxu3 %v2943_v59  ;;  %v2956_v32 = vld [vmem:[%s6872_s24 + $0x338] sm:$0xff]  ;;  %v2954_v59 = vld [vmem:[%s6872_s24 + $0x328] sm:$0xff] }
 0x3df   :  { %3079 = vmatpush.msra.mxu1 %v2869_v23  ;;  %3457 = vmatpush.msra.mxu0 %v2947_v25  ;;  %v2959_v23 = vld [vmem:[%s6872_s24 + $0x350] sm:$0xff]  ;;  %v2953_v25 = vld [vmem:[%s6872_s24 + $0x320] sm:$0xff] }
 0x3e0   :  { %5440 = vmatmul.msk.f32.vlgmr.msrb.gmra.mxu1 %vm296_vm3, %v6917_v62  ;;  %5458 = vmatmul.msk.f32.vlgmr.msrb.gmra.mxu3 %vm296_vm3, %v6917_v62 }
 0x3e1   :  { %3156 = vmatpush.msrb.mxu1 %v2888_v45  ;;  %3438 = vmatpush.msra.mxu3 %v2942_v42  ;;  %v2968_v45 = vld [vmem:[%s6872_s24 + $0x398] sm:$0xff]  ;;  %v2971_v42 = vld [vmem:[%s6872_s24 + $0x3b0] sm:$0xff] }
 0x3e2   :  { %3458 = vmatpush.msra.mxu0 %v2946_v47  ;;  %v2970_v47 = vld [vmem:[%s6872_s24 + $0x3a8] sm:$0xff] }
 0x3e3   :  { %3157 = vmatpush.msrb.mxu1 %v2887_v33  ;;  %3439 = vmatpush.msra.mxu3 %v2941_v21  ;;  %v2980_v33 = vld [vmem:[%s6872_s24 + $0x3f8] sm:$0xff] }
 0x3e4   :  { %3459 = vmatpush.msra.mxu0 %v2945_v50  ;;  %v3759_v21 = vld [vmem:[%s7101_s14 + $0x18] sm:$0xff]  ;;  %v3757_v50 = vld [vmem:[%s7101_s14 + $0x8] sm:$0xff] }
 0x3e5   :  { %3158 = vmatpush.msrb.mxu1 %v2886_v34  ;;  %3516 = vmatpush.msrb.mxu3 %v2960_v38  ;;  %v2979_v34 = vld [vmem:[%s6872_s24 + $0x3f0] sm:$0xff]  ;;  %v3756_v38 = vld [vmem:[%s7101_s14] sm:$0xff] }
 0x3e6   :  { %3536 = vmatpush.msrb.mxu0 %v2964_v28  ;;  %v5475_v28 = vld [vmem:[%s7101_s14 + $0x38] sm:$0xff] }
 0x3e7   :  { %3159 = vmatpush.msrb.mxu1 %v2885_v63  ;;  %3517 = vmatpush.msrb.mxu3 %v2959_v23  ;;  %v2974_v63 = vld [vmem:[%s6872_s24 + $0x3c8] sm:$0xff] }
 0x3e8   :  { %5444 = vmatmul.msk.f32.vlgmr.msra.gmra.mxu1 %vm296_vm3, %v6917_v62  ;;  %3537 = vmatpush.msrb.mxu0 %v2963_v55  ;;  %v5474_v55 = vld [vmem:[%s7101_s14 + $0x30] sm:$0xff] }
 0x3e9   :  { %3236 = vmatpush.msra.mxu1 %v2904_v4  ;;  %5462 = vmatmul.msk.f32.vlgmr.msra.gmra.mxu3 %vm296_vm3, %v6917_v62  ;;  %v2965_v4 = vld [vmem:[%s6872_s24 + $0x380] sm:$0xff] }
 0x3ea   :  { %5463 = vmatmul.msk.f32.vlgmr.msra.gmra.mxu0 %vm296_vm3, %v6917_v62  ;;  %3518 = vmatpush.msrb.mxu3 %v2958_v52 }
 0x3eb   :  { %3237 = vmatpush.msra.mxu1 %v2903_v11  ;;  %3538 = vmatpush.msrb.mxu0 %v2962_v51  ;;  %v2859_v11 = vld [vmem:[%s6872_s24 + $0x30] sm:$0xff] }
 0x3ec   :  { %3519 = vmatpush.msrb.mxu3 %v2957_v18  ;;  %3017 = vmatpush.msra.mxu2 %v2859_v11  ;;  %v5652_v18 = vld [vmem:[%s7128_s18 + $0xb8] sm:$0xff] }
 0x3ed   :  { %3238 = vmatpush.msra.mxu1 %v2902_v19  ;;  %3539 = vmatpush.msrb.mxu0 %v2961_v8  ;;  %v5736_v19 = vld [vmem:[%s6879_s28] ss:$0 sm:$0xff]  ;;  %v5542_v8 = vld [vmem:[%s7101_s14 + $0x58] sm:$0xff]  ;;  %s5264_s28 = sld [smem:[%s7771_s0 + %s5780_s25]]  }
 0x3ee   :  { %3596 = vmatpush.msra.mxu3 %v2976_v46  ;;  %3018 = vmatpush.msra.mxu2 %v2858_v20  ;;  %v5541_v46 = vld [vmem:[%s7101_s14 + $0x50] sm:$0xff] }
 0x3ef   :  { %3239 = vmatpush.msra.mxu1 %v2901_v41  ;;  %3616 = vmatpush.msra.mxu0 %v2980_v33  ;;  %v2875_v41 = vld [vmem:[%s6872_s24 + $0xb0] sm:$0xff]  ;;  %v5540_v33 = vld [vmem:[%s7101_s14 + $0x48] sm:$0xff] }
 0x3f0   :  { %5448 = vmatmul.msk.f32.vlgmr.msrb.gmra.mxu1 %vm296_vm3, %v6917_v62  ;;  %3597 = vmatpush.msra.mxu3 %v2975_v22 }
 0x3f1   :  { %3316 = vmatpush.msrb.mxu1 %v2920_v54  ;;  %5466 = vmatmul.msk.f32.vlgmr.msrb.gmra.mxu3 %vm296_vm3, %v6917_v62  ;;  %v2892_v54 = vld [vmem:[%s6872_s24 + $0x138] sm:$0xff] }
 0x3f2   :  { %5467 = vmatmul.msk.f32.vlgmr.msrb.gmra.mxu0 %vm296_vm3, %v6917_v62  ;;  %3598 = vmatpush.msra.mxu3 %v2974_v63 }
 0x3f3   :  { %3317 = vmatpush.msrb.mxu1 %v2919_v49  ;;  %3617 = vmatpush.msra.mxu0 %v2979_v34  ;;  %v2908_v49 = vld [vmem:[%s6872_s24 + $0x1b8] sm:$0xff]  ;;  %v5651_v34 = vld [vmem:[%s7128_s18 + $0xb0] sm:$0xff] }
 0x3f4   :  { %3599 = vmatpush.msra.mxu3 %v2973_v24  ;;  %3019 = vmatpush.msra.mxu2 %v2857_v57 }
 0x3f5   :  { %3318 = vmatpush.msrb.mxu1 %v2918_v13  ;;  %3618 = vmatpush.msra.mxu0 %v2978_v5  ;;  %v2924_v13 = vld [vmem:[%s6872_s24 + $0x238] sm:$0xff] }
 0x3f6   :  { %4104 = vmatpush.msrb.mxu3 %v5542_v8 }
 0x3f7   :  { %3319 = vmatpush.msrb.mxu1 %v2917_v31  ;;  %3619 = vmatpush.msra.mxu0 %v2977_v7  ;;  %v2922_v31 = vld [vmem:[%s6872_s24 + $0x228] sm:$0xff] }
 0x3f8   :  { %5452 = vmatmul.msk.f32.vlgmr.msra.gmra.mxu1 %vm296_vm3, %v6917_v62  ;;  %4105 = vmatpush.msrb.mxu3 %v5541_v46 }
 0x3f9   :  { %3396 = vmatpush.msra.mxu1 %v2936_v56  ;;  %5470 = vmatmul.msk.f32.vlgmr.msra.gmra.mxu3 %vm296_vm3, %v6917_v62  ;;  %v2939_v56 = vld [vmem:[%s6872_s24 + $0x2b0] sm:$0xff] }
 0x3fa   :  { %5471 = vmatmul.msk.f32.vlgmr.msra.gmra.mxu0 %vm296_vm3, %v6917_v62  ;;  %4106 = vmatpush.msrb.mxu3 %v5540_v33 }
 0x3fb   :  { %3397 = vmatpush.msra.mxu1 %v2935_v2  ;;  %v2955_v2 = vld [vmem:[%s6872_s24 + $0x330] sm:$0xff] }
 0x3fd   :  { %3398 = vmatpush.msra.mxu1 %v2934_v53  ;;  %v2972_v53 = vld [vmem:[%s6872_s24 + $0x3b8] sm:$0xff] }
 0x3ff   :  { %3399 = vmatpush.msra.mxu1 %v2933_v48  ;;  %v2969_v48 = vld [vmem:[%s6872_s24 + $0x3a0] sm:$0xff] }
 0x400   :  { %5456 = vmatmul.msk.f32.vlgmr.msrb.gmra.mxu1 %vm296_vm3, %v6917_v62 }
 0x401   :  { %3476 = vmatpush.msrb.mxu1 %v2952_v35  ;;  %v3758_v35 = vld [vmem:[%s7101_s14 + $0x10] sm:$0xff] }
 0x403   :  { %3477 = vmatpush.msrb.mxu1 %v2951_v17  ;;  %v7118_v17 = vld [vmem:[%s6991_s6] ss:$0 sm:$0xff]  ;;  %s5266_s6 = sld [smem:[%s7771_s0 + %s5782_s3]]  }
 0x405   :  { %3478 = vmatpush.msrb.mxu1 %v2950_v15  ;;  %v5473_v15 = vld [vmem:[%s7101_s14 + $0x28] sm:$0xff] }
 0x407   :  { %3479 = vmatpush.msrb.mxu1 %v2949_v61 }
 0x408   :  { %5460 = vmatmul.msk.f32.vlgmr.msra.gmra.mxu1 %vm296_vm3, %v6917_v62 }
 0x409   :  { %3556 = vmatpush.msra.mxu1 %v2968_v45  ;;  %v4376_v45 = vld [vmem:[%s7128_s18 + $0x38] sm:$0xff] }
 0x40b   :  { %3557 = vmatpush.msra.mxu1 %v2967_v9  ;;  %v5539_v9 = vld [vmem:[%s7101_s14 + $0x40] sm:$0xff] }
 0x40c   :  { %4107 = vmatpush.msrb.mxu3 %v5539_v9 }
 0x40d   :  { %3558 = vmatpush.msra.mxu1 %v2966_v30 }
 0x40f   :  { %3559 = vmatpush.msra.mxu1 %v2965_v4 }
 0x410   :  { %5464 = vmatmul.msk.f32.vlgmr.msrb.gmra.mxu1 %vm296_vm3, %v6917_v62 }
 0x411   :  { %3873 = vmatpush.msrb.mxu1 %v5475_v28 }
 0x413   :  { %3874 = vmatpush.msrb.mxu1 %v5474_v55 }
 0x415   :  { %3875 = vmatpush.msrb.mxu1 %v5473_v15 }
 0x418   :  { %5468 = vmatmul.msk.f32.vlgmr.msra.gmra.mxu1 %vm296_vm3, %v6917_v62 }
 0x433   :  { %v3061_v11 = vpop.f32.mrf.mxu0 }
 0x434   :  { %v3631_v20 = vadd.f32 %v7118_v17, %v3061_v11  ;;  %v5579_v11 = vld [vmem:[%s7128_s18 + $0x68] sm:$0xff] }
 0x436   :  { %vm3663_vm9 = vcmp.ge.f32.partialorder %v3631_v20, 0.0 }
 0x439   :  { %v3041_v39 = vpop.f32.mrf.mxu3 }
 0x43a   :  { %v3630_v4 = vadd.f32 %v7118_v17, %v3041_v39  ;;  %v5580_v39 = vld [vmem:[%s7128_s18 + $0x70] sm:$0xff] }
 0x43c   :  { %v3694_v7 = vmul.f32 0.01, %v3630_v4  ;;  %vm3662_vm8 = vcmp.ge.f32.partialorder %v3630_v4, 0.0 }
 0x43e   :  { %v3726_v57 = vsel %vm3662_vm8, %v3630_v4, %v3694_v7 }
 0x455   :  { %v2780_v16 = vpop.f32.mrf.mxu1 }
 0x456   :  { %v2781_v10 = vadd.f32 %v5736_v19, %v2780_v16  ;;  %v3695_v19 = vmul.f32 0.01, %v3631_v20 }
 0x458   :  { %5437 = vmatmul.msk.f32.vlgmr.msrb.gmra.mxu2 %vm296_vm3, %v2781_v10 }
 0x459   :  { %3096 = vmatpush.msrb.mxu2 %v2876_v43  ;;  %v3727_v43 = vsel %vm3663_vm9, %v3631_v20, %v3695_v19  ;;  %v5578_v20 = vld [vmem:[%s7128_s18 + $0x60] sm:$0xff] }
 0x45b   :  { %3097 = vmatpush.msrb.mxu2 %v2875_v41 }
 0x45d   :  { %3098 = vmatpush.msrb.mxu2 %v2874_v12  ;;  %v3001_v23 = vpop.f32.mrf.mxu1 }
 0x45e   :  { %v3628_v52 = vadd.f32 %v7118_v17, %v3001_v23 }
 0x45f   :  { %3099 = vmatpush.msrb.mxu2 %v2873_v29  ;;  %v5650_v29 = vld [vmem:[%s7128_s18 + $0xa8] sm:$0xff] }
 0x460   :  { %5441 = vmatmul.msk.f32.vlgmr.msra.gmra.mxu2 %vm296_vm3, %v6917_v62  ;;  %v3692_v51 = vmul.f32 0.01, %v3628_v52  ;;  %vm3660_vm6 = vcmp.ge.f32.partialorder %v3628_v52, 0.0 }
 0x461   :  { %3176 = vmatpush.msra.mxu2 %v2892_v54 }
 0x462   :  { %v3724_v61 = vsel %vm3660_vm6, %v3628_v52, %v3692_v51 }
 0x463   :  { %3177 = vmatpush.msra.mxu2 %v2891_v0 }
 0x465   :  { %3178 = vmatpush.msra.mxu2 %v2890_v44  ;;  %v3081_v16 = vpop.f32.mrf.mxu1  ;;  %v4374_v44 = vld [vmem:[%s7128_s18 + $0x28] sm:$0xff] }
 0x466   :  { %v3632_v10 = vadd.f32 %v7118_v17, %v3081_v16  ;;  %v5577_v16 = vld [vmem:[%s7128_s18 + $0x58] sm:$0xff] }
 0x467   :  { %3179 = vmatpush.msra.mxu2 %v2889_v26 }
 0x468   :  { %5445 = vmatmul.msk.f32.vlgmr.msrb.gmra.mxu2 %vm296_vm3, %v6917_v62  ;;  %v3696_v41 = vmul.f32 0.01, %v3632_v10  ;;  %vm3664_vm10 = vcmp.ge.f32.partialorder %v3632_v10, 0.0 }
 0x469   :  { %3256 = vmatpush.msrb.mxu2 %v2908_v49  ;;  %v3121_v49 = vpop.f32.mrf.mxu3 }
 0x46a   :  { %v3728_v0 = vsel %vm3664_vm10, %v3632_v10, %v3696_v41 }
 0x46b   :  { %3257 = vmatpush.msrb.mxu2 %v2907_v27  ;;  %v3634_v27 = vadd.f32 %v7118_v17, %v3121_v49 }
 0x46d   :  { %3258 = vmatpush.msrb.mxu2 %v2906_v40  ;;  %vm3666_vm13 = vcmp.ge.f32.partialorder %v3634_v27, 0.0 }
 0x46f   :  { %3259 = vmatpush.msrb.mxu2 %v2905_v36  ;;  %v3698_v36 = vmul.f32 0.01, %v3634_v27 }
 0x470   :  { %5449 = vmatmul.msk.f32.vlgmr.msra.gmra.mxu2 %vm296_vm3, %v6917_v62 }
 0x471   :  { %3336 = vmatpush.msra.mxu2 %v2924_v13  ;;  %v3141_v13 = vpop.f32.mrf.mxu0 }
 0x473   :  { %3337 = vmatpush.msra.mxu2 %v2923_v37  ;;  %v3635_v37 = vadd.f32 %v7118_v17, %v3141_v13 }
 0x475   :  { %3338 = vmatpush.msra.mxu2 %v2922_v31  ;;  %v3730_v31 = vsel %vm3666_vm13, %v3634_v27, %v3698_v36  ;;  %vm3667_vm14 = vcmp.ge.f32.partialorder %v3635_v37, 0.0 }
 0x477   :  { %3339 = vmatpush.msra.mxu2 %v2921_v1  ;;  %v3699_v1 = vmul.f32 0.01, %v3635_v37 }
 0x478   :  { %5453 = vmatmul.msk.f32.vlgmr.msrb.gmra.mxu2 %vm296_vm3, %v6917_v62 }
 0x479   :  { %3416 = vmatpush.msrb.mxu2 %v2940_v58  ;;  %v3161_v58 = vpop.f32.mrf.mxu1  ;;  %v3221_v28 = vpop.f32.mrf.mxu0 }
 0x47a   :  { %v3639_v23 = vadd.f32 %v7118_v17, %v3221_v28 }
 0x47b   :  { %3417 = vmatpush.msrb.mxu2 %v2939_v56  ;;  %v3636_v56 = vadd.f32 %v7118_v17, %v3161_v58 }
 0x47c   :  { %v3703_v15 = vmul.f32 0.01, %v3639_v23  ;;  %vm3671_vm5 = vcmp.ge.f32.partialorder %v3639_v23, 0.0 }
 0x47d   :  { %3418 = vmatpush.msrb.mxu2 %v2938_v6  ;;  %v3731_v6 = vsel %vm3667_vm14, %v3635_v37, %v3699_v1  ;;  %vm3668_vm15 = vcmp.ge.f32.partialorder %v3636_v56, 0.0 }
 0x47f   :  { %3419 = vmatpush.msrb.mxu2 %v2937_v60  ;;  %v5649_v60 = vld [vmem:[%s7128_s18 + $0xa0] sm:$0xff] }
 0x480   :  { %5457 = vmatmul.msk.f32.vlgmr.msra.gmra.mxu2 %vm296_vm3, %v6917_v62 }
 0x481   :  { %3496 = vmatpush.msra.mxu2 %v2956_v32  ;;  %v3700_v32 = vmul.f32 0.01, %v3636_v56  ;;  %v3301_v10 = vpop.f32.mrf.mxu0 }
 0x482   :  { %v3643_v41 = vadd.f32 %v7118_v17, %v3301_v10 }
 0x483   :  { %3497 = vmatpush.msra.mxu2 %v2955_v2 }
 0x485   :  { %3498 = vmatpush.msra.mxu2 %v2954_v59 }
 0x487   :  { %3499 = vmatpush.msra.mxu2 %v2953_v25  ;;  %v3732_v25 = vsel %vm3668_vm15, %v3636_v56, %v3700_v32  ;;  %v5647_v56 = vld [vmem:[%s7128_s18 + $0x90] sm:$0xff] }
 0x488   :  { %5461 = vmatmul.msk.f32.vlgmr.msrb.gmra.mxu2 %vm296_vm3, %v6917_v62 }
 0x489   :  { %3576 = vmatpush.msrb.mxu2 %v2972_v53  ;;  %v4373_v53 = vld [vmem:[%s7128_s18 + $0x20] sm:$0xff]  ;;  %v3381_v28 = vpop.f32.mrf.mxu0 }
 0x48b   :  { %3577 = vmatpush.msrb.mxu2 %v2971_v42 }
 0x48d   :  { %3578 = vmatpush.msrb.mxu2 %v2970_v47  ;;  %v3201_v47 = vpop.f32.mrf.mxu3 }
 0x48f   :  { %3579 = vmatpush.msrb.mxu2 %v2969_v48  ;;  %v3638_v48 = vadd.f32 %v7118_v17, %v3201_v47 }
 0x490   :  { %5465 = vmatmul.msk.f32.vlgmr.msra.gmra.mxu2 %vm296_vm3, %v6917_v62 }
 0x491   :  { %3986 = vmatpush.msra.mxu2 %v3759_v21  ;;  %vm3670_vm4 = vcmp.ge.f32.partialorder %v3638_v48, 0.0 }
 0x493   :  { %3987 = vmatpush.msra.mxu2 %v3758_v35 }
 0x495   :  { %3988 = vmatpush.msra.mxu2 %v3757_v50  ;;  %v3702_v50 = vmul.f32 0.01, %v3638_v48  ;;  %v3281_v8 = vpop.f32.mrf.mxu3 }
 0x496   :  { %v3642_v4 = vadd.f32 %v7118_v17, %v3281_v8 }
 0x497   :  { %3989 = vmatpush.msra.mxu2 %v3756_v38  ;;  %v3241_v38 = vpop.f32.mrf.mxu1  ;;  %v3734_v55 = vsel %vm3670_vm4, %v3638_v48, %v3702_v50 }
 0x498   :  { %5469 = vmatmul.msk.f32.vlgmr.msrb.gmra.mxu2 %vm296_vm3, %v6917_v62  ;;  %v5472_v62 = vld [vmem:[%s7101_s14 + $0x20] sm:$0xff]  ;;  %v3640_v51 = vadd.f32 %v7118_v17, %v3241_v38  ;;  %vm3674_vm6 = vcmp.ge.f32.partialorder %v3642_v4, 0.0  ;;  %s5777_s14 = smov 24  }
 0x499   :  { %3876 = vmatpush.msrb.mxu1 %v5472_v62  ;;  %4727 = vmatpush.msrb.mxu2 %v5652_v18  ;;  %v3735_v62 = vsel %vm3671_vm5, %v3639_v23, %v3703_v15  ;;  %v5648_v18 = vld [vmem:[%s7128_s18 + $0x98] sm:$0xff]  ;;  %v3647_v23 = vadd.f32 %v7118_v17, %v3381_v28  ;;  %s7734_s17 = sld [smem:[%s7771_s0 + %s5777_s14]]  }
 0x49a   :  { %5476 = vmatmul.msk.f32.vlgmr.msrb.gmra.mxu1 %vm296_vm3, %v3724_v61  ;;  %vm3672_vm0 = vcmp.ge.f32.partialorder %v3640_v51, 0.0 }
 0x49b   :  { %4605 = vmatpush.msra.mxu1 %v4376_v45  ;;  %4728 = vmatpush.msrb.mxu2 %v5651_v34  ;;  %v3704_v45 = vmul.f32 0.01, %v3640_v51  ;;  %vm3679_vm13 = vcmp.ge.f32.partialorder %v3647_v23, 0.0 }
 0x49d   :  { %4606 = vmatpush.msra.mxu1 %v4375_v3  ;;  %4729 = vmatpush.msrb.mxu2 %v5650_v29  ;;  %v3736_v9 = vsel %vm3672_vm0, %v3640_v51, %v3704_v45  ;;  %v4372_v3 = vld [vmem:[%s7128_s18 + $0x18] sm:$0xff]  ;;  %v3711_v51 = vmul.f32 0.01, %v3647_v23 }
 0x49f   :  { %4607 = vmatpush.msra.mxu1 %v4374_v44  ;;  %4730 = vmatpush.msrb.mxu2 %v5649_v60  ;;  %v5574_v44 = vld [vmem:[%s7128_s18 + $0x40] sm:$0xff] }
 0x4a0   :  { %3990 = vmatmul.f32.vlgmr.msra.gmra.mxu2 %v5755_v14 }
 0x4a1   :  { %4608 = vmatpush.msra.mxu1 %v4373_v53  ;;  %4731 = vmatpush.msrb.mxu2 %v5648_v18 }
 0x4a3   :  { %4609 = vmatpush.msra.mxu1 %v4372_v3  ;;  %4732 = vmatpush.msrb.mxu2 %v5647_v56 }
 0x4a8   :  { %5508 = vmatmul.msk.f32.gmra.mxu2 %vm296_vm3, %v3724_v61  ;;  %v3321_v61 = vpop.f32.mrf.mxu1 }
 0x4a9   :  { %v3644_v27 = vadd.f32 %v7118_v17, %v3321_v61 }
 0x4ab   :  { %v3708_v37 = vmul.f32 0.01, %v3644_v27  ;;  %vm3676_vm8 = vcmp.ge.f32.partialorder %v3644_v27, 0.0 }
 0x4ad   :  { %v3740_v58 = vsel %vm3676_vm8, %v3644_v27, %v3708_v37 }
 0x4b0   :  { %v7204_v34 = vpop.f32.mrf.mxu1 }
 0x4b8   :  { %v7218_v19 = vpop.f32.mrf.mxu1 }
 0x4c0   :  { %v7232_v49 = vpop.f32.mrf.mxu1 }
 0x4db   :  { %v7138_v22 = vpop.f32.mrf.mxu2 }
 0x4e3   :  { %v3021_v30 = vpop.f32.mrf.mxu2 }
 0x4e4   :  { %v3629_v63 = vadd.f32 %v7118_v17, %v3021_v30  ;;  %v5581_v30 = vld [vmem:[%s7128_s18 + $0x78] sm:$0xff] }
 0x4e5   :  { %4490 = vmatpush.msrb.mxu0 %v5581_v30  ;;  %v3743_v30 = vsel %vm3679_vm13, %v3647_v23, %v3711_v51  ;;  %v3652_v51 = vadd.f32 %v7118_v17, %v7218_v19 }
 0x4e6   :  { %v3693_v5 = vmul.f32 0.01, %v3629_v63  ;;  %vm3661_vm7 = vcmp.ge.f32.partialorder %v3629_v63, 0.0 }
 0x4e7   :  { %4491 = vmatpush.msrb.mxu0 %v5580_v39  ;;  %vm3684_vm8 = vcmp.ge.f32.partialorder %v3652_v51, 0.0 }
 0x4e8   :  { %v3725_v24 = vsel %vm3661_vm7, %v3629_v63, %v3693_v5  ;;  %v3361_v5 = vpop.f32.mrf.mxu3  ;;  %vm3675_vm7 = vcmp.ge.f32.partialorder %v3643_v41, 0.0 }
 0x4e9   :  { %5477 = vmatmul.msk.f32.gmra.mxu1 %vm296_vm3, %v3725_v24  ;;  %5509 = vmatmul.msk.f32.gmra.mxu2 %vm296_vm3, %v3725_v24 }
 0x4ea   :  { %5543 = vmatmul.msk.f32.vlgmr.msrb.gmra.mxu3 %vm296_vm3, %v3725_v24  ;;  %4492 = vmatpush.msrb.mxu0 %v5579_v11 }
 0x4eb   :  { %v3101_v12 = vpop.f32.mrf.mxu2 }
 0x4ec   :  { %v3633_v54 = vadd.f32 %v7118_v17, %v3101_v12  ;;  %4493 = vmatpush.msrb.mxu0 %v5578_v20 }
 0x4ee   :  { %v3697_v26 = vmul.f32 0.01, %v3633_v54  ;;  %vm3665_vm12 = vcmp.ge.f32.partialorder %v3633_v54, 0.0  ;;  %4494 = vmatpush.msrb.mxu0 %v5577_v16 }
 0x4f0   :  { %v3729_v40 = vsel %vm3665_vm12, %v3633_v54, %v3697_v26  ;;  %v7223_v29 = vpop.f32.mrf.mxu3  ;;  %v5575_v54 = vld [vmem:[%s7128_s18 + $0x48] sm:$0xff]  ;;  %v3707_v26 = vmul.f32 0.01, %v3643_v41 }
 0x4f1   :  { %5478 = vmatmul.msk.f32.gmra.mxu1 %vm296_vm3, %v3726_v57  ;;  %5510 = vmatmul.msk.f32.gmra.mxu2 %vm296_vm3, %v3726_v57  ;;  %v3650_v37 = vadd.f32 %v7118_v17, %v7223_v29 }
 0x4f2   :  { %5544 = vmatmul.msk.f32.gmra.mxu3 %vm296_vm3, %v3726_v57  ;;  %v3706_v57 = vmul.f32 0.01, %v3642_v4 }
 0x4f3   :  { %v3181_v2 = vpop.f32.mrf.mxu2  ;;  %v3714_v56 = vmul.f32 0.01, %v3650_v37  ;;  %vm3682_vm0 = vcmp.ge.f32.partialorder %v3650_v37, 0.0 }
 0x4f4   :  { %v3637_v59 = vadd.f32 %v7118_v17, %v3181_v2  ;;  %v3738_v12 = vsel %vm3674_vm6, %v3642_v4, %v3706_v57 }
 0x4f6   :  { %v3701_v42 = vmul.f32 0.01, %v3637_v59  ;;  %vm3669_vm2 = vcmp.ge.f32.partialorder %v3637_v59, 0.0 }
 0x4f8   :  { %v3733_v21 = vsel %vm3669_vm2, %v3637_v59, %v3701_v42  ;;  %v7238_v13 = vpop.f32.mrf.mxu3 }
 0x4f9   :  { %5479 = vmatmul.msk.f32.gmra.mxu1 %vm296_vm3, %v3727_v43  ;;  %5511 = vmatmul.msk.f32.gmra.mxu2 %vm296_vm3, %v3727_v43 }
 0x4fa   :  { %5545 = vmatmul.msk.f32.gmra.mxu3 %vm296_vm3, %v3727_v43  ;;  %v5576_v43 = vld [vmem:[%s7128_s18 + $0x50] sm:$0xff] }
 0x4fb   :  { %v3261_v35 = vpop.f32.mrf.mxu2  ;;  %4495 = vmatpush.msrb.mxu0 %v5576_v43  ;;  %v5646_v43 = vld [vmem:[%s7128_s18 + $0x88] sm:$0xff] }
 0x4fc   :  { %v3641_v33 = vadd.f32 %v7118_v17, %v3261_v35  ;;  %4733 = vmatpush.msrb.mxu2 %v5646_v43 }
 0x4fd   :  { %4496 = vmatpush.msrb.mxu0 %v5575_v54 }
 0x4fe   :  { %v3705_v63 = vmul.f32 0.01, %v3641_v33  ;;  %vm3673_vm1 = vcmp.ge.f32.partialorder %v3641_v33, 0.0 }
 0x4ff   :  { %4497 = vmatpush.msrb.mxu0 %v5574_v44 }
 0x500   :  { %v3737_v7 = vsel %vm3673_vm1, %v3641_v33, %v3705_v63  ;;  %v7247_v2 = vpop.f32.mrf.mxu3 }
 0x501   :  { %5480 = vmatmul.msk.f32.gmra.mxu1 %vm296_vm3, %v3728_v0  ;;  %5512 = vmatmul.msk.f32.gmra.mxu2 %vm296_vm3, %v3728_v0 }
 0x502   :  { %5546 = vmatmul.msk.f32.gmra.mxu3 %vm296_vm3, %v3728_v0 }
 0x503   :  { %v7192_v52 = vpop.f32.mrf.mxu2 }
 0x504   :  { %v3645_v1 = vadd.f32 %v7118_v17, %v7192_v52 }
 0x506   :  { %v3709_v60 = vmul.f32 0.01, %v3645_v1  ;;  %vm3677_vm9 = vcmp.ge.f32.partialorder %v3645_v1, 0.0 }
 0x508   :  { %v3741_v53 = vsel %vm3677_vm9, %v3645_v1, %v3709_v60 }
 0x509   :  { %5481 = vmatmul.msk.f32.gmra.mxu1 %vm296_vm3, %v3729_v40  ;;  %5513 = vmatmul.msk.f32.gmra.mxu2 %vm296_vm3, %v3729_v40 }
 0x50a   :  { %5547 = vmatmul.msk.f32.gmra.mxu3 %vm296_vm3, %v3729_v40  ;;  %v3739_v40 = vsel %vm3675_vm7, %v3643_v41, %v3707_v26 }
 0x50b   :  { %v7199_v46 = vpop.f32.mrf.mxu2 }
 0x50c   :  { %v3649_v57 = vadd.f32 %v7118_v17, %v7199_v46 }
 0x50e   :  { %v3713_v54 = vmul.f32 0.01, %v3649_v57  ;;  %vm3681_vm4 = vcmp.ge.f32.partialorder %v3649_v57, 0.0 }
 0x510   :  { %v3745_v1 = vsel %vm3681_vm4, %v3649_v57, %v3713_v54  ;;  %v3654_v54 = vadd.f32 %v7118_v17, %v7238_v13 }
 0x511   :  { %5482 = vmatmul.msk.f32.gmra.mxu1 %vm296_vm3, %v3730_v31  ;;  %5514 = vmatmul.msk.f32.gmra.mxu2 %vm296_vm3, %v3730_v31 }
 0x512   :  { %5548 = vmatmul.msk.f32.gmra.mxu3 %vm296_vm3, %v3730_v31  ;;  %vm3686_vm13 = vcmp.ge.f32.partialorder %v3654_v54, 0.0 }
 0x513   :  { %v7211_v24 = vpop.f32.mrf.mxu2 }
 0x517   :  { %v3878_v31 = vpop.f32.mrf.mxu1 }
 0x519   :  { %5483 = vmatmul.msk.f32.gmra.mxu1 %vm296_vm3, %v3731_v6  ;;  %5515 = vmatmul.msk.f32.gmra.mxu2 %vm296_vm3, %v3731_v6 }
 0x51a   :  { %5549 = vmatmul.msk.f32.gmra.mxu3 %vm296_vm3, %v3731_v6  ;;  %v4371_v6 = vld [vmem:[%s7128_s18 + $0x10] sm:$0xff] }
 0x51b   :  { %v7228_v0 = vpop.f32.mrf.mxu2  ;;  %4610 = vmatpush.msra.mxu1 %v4371_v6 }
 0x521   :  { %5484 = vmatmul.msk.f32.gmra.mxu1 %vm296_vm3, %v3732_v25  ;;  %5516 = vmatmul.msk.f32.gmra.mxu2 %vm296_vm3, %v3732_v25 }
 0x522   :  { %5550 = vmatmul.msk.f32.gmra.mxu3 %vm296_vm3, %v3732_v25  ;;  %v3646_v25 = vadd.f32 %v7118_v17, %v3361_v5 }
 0x523   :  { %v3991_v36 = vpop.f32.mrf.mxu2 }
 0x524   :  { %v3710_v42 = vmul.f32 0.01, %v3646_v25  ;;  %v3992_v47 = vadd.f32 %v3991_v36, %v3878_v31  ;;  %vm3678_vm10 = vcmp.ge.f32.partialorder %v3646_v25, 0.0 }
 0x526   :  { %v3742_v15 = vsel %vm3678_vm10, %v3646_v25, %v3710_v42 }
 0x529   :  { %5485 = vmatmul.msk.f32.gmra.mxu1 %vm296_vm3, %v3733_v21  ;;  %5517 = vmatmul.msk.f32.gmra.mxu2 %vm296_vm3, %v3733_v21 }
 0x52a   :  { %5551 = vmatmul.msk.f32.gmra.mxu3 %vm296_vm3, %v3733_v21  ;;  %v7254_v21 = vld [vmem:[%s7147_s22] ss:$0 sm:$0xff] }
 0x52b   :  { %v3994_v32 = vpop.f32.mrf.mxu2 }
 0x531   :  { %5486 = vmatmul.msk.f32.gmra.mxu1 %vm296_vm3, %v3734_v55  ;;  %5518 = vmatmul.msk.f32.gmra.mxu2 %vm296_vm3, %v3734_v55 }
 0x532   :  { %5552 = vmatmul.msk.f32.gmra.mxu3 %vm296_vm3, %v3734_v55 }
 0x539   :  { %5487 = vmatmul.msk.f32.gmra.mxu1 %vm296_vm3, %v3735_v62  ;;  %5519 = vmatmul.msk.f32.gmra.mxu2 %vm296_vm3, %v3735_v62 }
 0x53a   :  { %5553 = vmatmul.msk.f32.gmra.mxu3 %vm296_vm3, %v3735_v62 }
 0x541   :  { %5488 = vmatmul.msk.f32.gmra.mxu1 %vm296_vm3, %v3736_v9  ;;  %5520 = vmatmul.msk.f32.gmra.mxu2 %vm296_vm3, %v3736_v9 }
 0x542   :  { %5554 = vmatmul.msk.f32.gmra.mxu3 %vm296_vm3, %v3736_v9  ;;  %v3648_v9 = vadd.f32 %v7118_v17, %v7204_v34 }
 0x544   :  { %v3712_v5 = vmul.f32 0.01, %v3648_v9  ;;  %vm3680_vm15 = vcmp.ge.f32.partialorder %v3648_v9, 0.0 }
 0x546   :  { %v3744_v10 = vsel %vm3680_vm15, %v3648_v9, %v3712_v5  ;;  %v3653_v5 = vadd.f32 %v7118_v17, %v7211_v24 }
 0x548   :  { %v3717_v57 = vmul.f32 0.01, %v3653_v5  ;;  %vm3685_vm10 = vcmp.ge.f32.partialorder %v3653_v5, 0.0 }
 0x549   :  { %5489 = vmatmul.msk.f32.gmra.mxu1 %vm296_vm3, %v3737_v7  ;;  %5521 = vmatmul.msk.f32.gmra.mxu2 %vm296_vm3, %v3737_v7 }
 0x54a   :  { %5555 = vmatmul.msk.f32.gmra.mxu3 %vm296_vm3, %v3737_v7 }
 0x551   :  { %5490 = vmatmul.msk.f32.gmra.mxu1 %vm296_vm3, %v3738_v12  ;;  %5522 = vmatmul.msk.f32.gmra.mxu2 %vm296_vm3, %v3738_v12 }
 0x552   :  { %5556 = vmatmul.msk.f32.gmra.mxu3 %vm296_vm3, %v3738_v12  ;;  %v4370_v12 = vld [vmem:[%s7128_s18 + $0x8] sm:$0xff] }
 0x553   :  { %4611 = vmatpush.msra.mxu1 %v4370_v12 }
 0x559   :  { %5491 = vmatmul.msk.f32.gmra.mxu1 %vm296_vm3, %v3739_v40  ;;  %5523 = vmatmul.msk.f32.gmra.mxu2 %vm296_vm3, %v3739_v40 }
 0x55a   :  { %5557 = vmatmul.msk.f32.gmra.mxu3 %vm296_vm3, %v3739_v40 }
 0x561   :  { %5492 = vmatmul.msk.f32.gmra.mxu1 %vm296_vm3, %v3740_v58  ;;  %5524 = vmatmul.msk.f32.gmra.mxu2 %vm296_vm3, %v3740_v58 }
 0x562   :  { %5558 = vmatmul.msk.f32.gmra.mxu3 %vm296_vm3, %v3740_v58 }
 0x566   :  { %v3881_v59 = vpop.f32.mrf.mxu1 }
 0x567   :  { %v3995_v61 = vadd.f32 %v3994_v32, %v3881_v59 }
 0x569   :  { %5493 = vmatmul.msk.f32.gmra.mxu1 %vm296_vm3, %v3741_v53  ;;  %5525 = vmatmul.msk.f32.gmra.mxu2 %vm296_vm3, %v3741_v53 }
 0x56a   :  { %5559 = vmatmul.msk.f32.gmra.mxu3 %vm296_vm3, %v3741_v53  ;;  %v3461_v53 = vpop.f32.mrf.mxu0 }
 0x56b   :  { %v3651_v42 = vadd.f32 %v7118_v17, %v3461_v53 }
 0x56c   :  { %v3997_v48 = vpop.f32.mrf.mxu2 }
 0x56d   :  { %v4109_v35 = vpop.f32.mrf.mxu3  ;;  %vm3683_vm6 = vcmp.ge.f32.partialorder %v3651_v42, 0.0 }
 0x56e   :  { %v4205_v50 = vadd.f32 %v4109_v35, %v3992_v47  ;;  %v3884_v38 = vpop.f32.mrf.mxu1 }
 0x56f   :  { %v3998_v39 = vadd.f32 %v3997_v48, %v3884_v38  ;;  %v3746_v48 = vsel %vm3682_vm0, %v3650_v37, %v3714_v56 }
 0x570   :  { %v4241_v55 = vadd.f32 %v7254_v21, %v4205_v50  ;;  %v3715_v50 = vmul.f32 0.01, %v3651_v42 }
 0x571   :  { %5494 = vmatmul.msk.f32.gmra.mxu1 %vm296_vm3, %v3742_v15  ;;  %5526 = vmatmul.msk.f32.gmra.mxu2 %vm296_vm3, %v3742_v15 }
 0x572   :  { %vm4273_vm12 = vcmp.ge.f32.partialorder %v4241_v55, 0.0  ;;  %v4305_v52 = vmul.f32 0.01, %v4241_v55  ;;  %5560 = vmatmul.msk.f32.gmra.mxu3 %vm296_vm3, %v3742_v15  ;;  %v3541_v56 = vpop.f32.mrf.mxu0 }
 0x574   :  { %v7261_v62 = vsel %vm4273_vm12, %v4241_v55, %v4305_v52  ;;  %v4000_v18 = vpop.f32.mrf.mxu2 }
 0x575   :  { %v4112_v45 = vpop.f32.mrf.mxu3  ;;  %5582 = vmatmul.msk.f32.vlgmr.msrb.gmra.mxu0 %vm1944_vm11, %v7261_v62 }
 0x576   :  { %v4206_v8 = vadd.f32 %v4112_v45, %v3995_v61  ;;  %v3887_v33 = vpop.f32.mrf.mxu1 }
 0x577   :  { %v4001_v44 = vadd.f32 %v4000_v18, %v3887_v33  ;;  %v3747_v18 = vsel %vm3683_vm6, %v3651_v42, %v3715_v50 }
 0x578   :  { %v4242_v3 = vadd.f32 %v7254_v21, %v4206_v8  ;;  %v3716_v8 = vmul.f32 0.01, %v3652_v51 }
 0x579   :  { %5495 = vmatmul.msk.f32.gmra.mxu1 %vm296_vm3, %v3743_v30  ;;  %5527 = vmatmul.msk.f32.gmra.mxu2 %vm296_vm3, %v3743_v30 }
 0x57a   :  { %5561 = vmatmul.msk.f32.gmra.mxu3 %vm296_vm3, %v3743_v30  ;;  %vm4274_vm14 = vcmp.ge.f32.partialorder %v4242_v3, 0.0  ;;  %v4306_v63 = vmul.f32 0.01, %v4242_v3 }
 0x57c   :  { %v4003_v4 = vpop.f32.mrf.mxu2  ;;  %v7271_v7 = vsel %vm4274_vm14, %v4242_v3, %v4306_v63 }
 0x57d   :  { %v4115_v11 = vpop.f32.mrf.mxu3  ;;  %5583 = vmatmul.msk.f32.gmra.mxu0 %vm1944_vm11, %v7271_v7 }
 0x57e   :  { %v4207_v34 = vadd.f32 %v4115_v11, %v3998_v39  ;;  %v3890_v20 = vpop.f32.mrf.mxu1  ;;  %v5645_v11 = vld [vmem:[%s7128_s18 + $0x80] sm:$0xff] }
 0x57f   :  { %v4004_v6 = vadd.f32 %v4003_v4, %v3890_v20  ;;  %v3748_v4 = vsel %vm3684_vm8, %v3652_v51, %v3716_v8  ;;  %4734 = vmatpush.msrb.mxu2 %v5645_v11  ;;  %v4369_v20 = vld [vmem:[%s7128_s18] sm:$0xff]  ;;  %s5778_s18 = smov 26  }
 0x580   :  { %v4243_v16 = vadd.f32 %v7254_v21, %v4207_v34  ;;  %4612 = vmatpush.msra.mxu1 %v4369_v20  ;;  %v3658_v20 = vadd.f32 %v7118_v17, %v7247_v2  ;;  %s5262_s21 = sld [smem:[%s7771_s0 + %s5778_s18]]  }
 0x581   :  { %5496 = vmatmul.msk.f32.gmra.mxu1 %vm296_vm3, %v3744_v10  ;;  %5528 = vmatmul.msk.f32.gmra.mxu2 %vm296_vm3, %v3744_v10 }
 0x582   :  { %5562 = vmatmul.msk.f32.gmra.mxu3 %vm296_vm3, %v3744_v10  ;;  %vm4275_vm2 = vcmp.ge.f32.partialorder %v4243_v16, 0.0  ;;  %v4307_v41 = vmul.f32 0.01, %v4243_v16  ;;  %vm3690_vm6 = vcmp.ge.f32.partialorder %v3658_v20, 0.0 }
 0x584   :  { %v4006_v26 = vpop.f32.mrf.mxu2  ;;  %v7283_v27 = vsel %vm4275_vm2, %v4243_v16, %v4307_v41 }
 0x585   :  { %v4118_v46 = vpop.f32.mrf.mxu3  ;;  %5584 = vmatmul.msk.f32.gmra.mxu0 %vm1944_vm11, %v7283_v27 }
 0x586   :  { %v4208_v40 = vadd.f32 %v4118_v46, %v4001_v44  ;;  %v3893_v36 = vpop.f32.mrf.mxu1 }
 0x587   :  { %v4007_v38 = vadd.f32 %v4006_v26, %v3893_v36  ;;  %v3749_v26 = vsel %vm3685_vm10, %v3653_v5, %v3717_v57 }
 0x588   :  { %v4244_v31 = vadd.f32 %v7254_v21, %v4208_v40  ;;  %v3718_v40 = vmul.f32 0.01, %v3654_v54 }
 0x589   :  { %5497 = vmatmul.msk.f32.gmra.mxu1 %vm296_vm3, %v3745_v1  ;;  %5529 = vmatmul.msk.f32.gmra.mxu2 %vm296_vm3, %v3745_v1 }
 0x58a   :  { %5563 = vmatmul.msk.f32.gmra.mxu3 %vm296_vm3, %v3745_v1  ;;  %vm4276_vm5 = vcmp.ge.f32.partialorder %v4244_v31, 0.0  ;;  %v4308_v58 = vmul.f32 0.01, %v4244_v31 }
 0x58c   :  { %v4009_v60 = vpop.f32.mrf.mxu2  ;;  %v7293_v32 = vsel %vm4276_vm5, %v4244_v31, %v4308_v58 }
 0x58d   :  { %v4121_v59 = vpop.f32.mrf.mxu3  ;;  %5585 = vmatmul.msk.f32.gmra.mxu0 %vm1944_vm11, %v7293_v32 }
 0x58e   :  { %v4209_v29 = vadd.f32 %v4121_v59, %v4004_v6  ;;  %v3896_v25 = vpop.f32.mrf.mxu1  ;;  %v3655_v6 = vadd.f32 %v7118_v17, %v3541_v56  ;;  %v3750_v59 = vsel %vm3686_vm13, %v3654_v54, %v3718_v40 }
 0x58f   :  { %v4010_v33 = vadd.f32 %v4009_v60, %v3896_v25 }
 0x590   :  { %v4245_v47 = vadd.f32 %v7254_v21, %v4209_v29  ;;  %v3719_v25 = vmul.f32 0.01, %v3655_v6  ;;  %vm3687_vm15 = vcmp.ge.f32.partialorder %v3655_v6, 0.0 }
 0x591   :  { %5498 = vmatmul.msk.f32.gmra.mxu1 %vm296_vm3, %v3746_v48  ;;  %5530 = vmatmul.msk.f32.gmra.mxu2 %vm296_vm3, %v3746_v48 }
 0x592   :  { %5564 = vmatmul.msk.f32.gmra.mxu3 %vm296_vm3, %v3746_v48  ;;  %vm4277_vm1 = vcmp.ge.f32.partialorder %v4245_v47, 0.0  ;;  %v4309_v35 = vmul.f32 0.01, %v4245_v47 }
 0x594   :  { %v4012_v28 = vpop.f32.mrf.mxu2  ;;  %v7302_v23 = vsel %vm4277_vm1, %v4245_v47, %v4309_v35 }
 0x595   :  { %v4124_v55 = vpop.f32.mrf.mxu3  ;;  %5586 = vmatmul.msk.f32.gmra.mxu0 %vm1944_vm11, %v7302_v23 }
 0x596   :  { %v4210_v15 = vadd.f32 %v4124_v55, %v4007_v38  ;;  %v3899_v52 = vpop.f32.mrf.mxu1  ;;  %v3656_v38 = vadd.f32 %v7118_v17, %v7232_v49  ;;  %v3751_v55 = vsel %vm3687_vm15, %v3655_v6, %v3719_v25 }
 0x597   :  { %v4013_v16 = vadd.f32 %v4012_v28, %v3899_v52 }
 0x598   :  { %v4246_v61 = vadd.f32 %v7254_v21, %v4210_v15  ;;  %v3720_v52 = vmul.f32 0.01, %v3656_v38  ;;  %vm3688_vm4 = vcmp.ge.f32.partialorder %v3656_v38, 0.0 }
 0x599   :  { %5499 = vmatmul.msk.f32.gmra.mxu1 %vm296_vm3, %v3747_v18  ;;  %5531 = vmatmul.msk.f32.gmra.mxu2 %vm296_vm3, %v3747_v18 }
 0x59a   :  { %5565 = vmatmul.msk.f32.gmra.mxu3 %vm296_vm3, %v3747_v18  ;;  %vm4278_vm7 = vcmp.ge.f32.partialorder %v4246_v61, 0.0  ;;  %v4310_v45 = vmul.f32 0.01, %v4246_v61 }
 0x59c   :  { %v4015_v9 = vpop.f32.mrf.mxu2  ;;  %v7312_v3 = vsel %vm4278_vm7, %v4246_v61, %v4310_v45 }
 0x59d   :  { %v4127_v30 = vpop.f32.mrf.mxu3  ;;  %5587 = vmatmul.msk.f32.gmra.mxu0 %vm1944_vm11, %v7312_v3 }
 0x59e   :  { %v4211_v19 = vadd.f32 %v4127_v30, %v4010_v33  ;;  %v3902_v63 = vpop.f32.mrf.mxu1  ;;  %v3657_v33 = vadd.f32 %v7118_v17, %v7228_v0  ;;  %v3752_v30 = vsel %vm3688_vm4, %v3656_v38, %v3720_v52 }
 0x59f   :  { %v4016_v36 = vadd.f32 %v4015_v9, %v3902_v63 }
 0x5a0   :  { %v4247_v39 = vadd.f32 %v7254_v21, %v4211_v19  ;;  %v3721_v63 = vmul.f32 0.01, %v3657_v33  ;;  %vm3689_vm0 = vcmp.ge.f32.partialorder %v3657_v33, 0.0 }
 0x5a1   :  { %5500 = vmatmul.msk.f32.gmra.mxu1 %vm296_vm3, %v3748_v4  ;;  %5532 = vmatmul.msk.f32.gmra.mxu2 %vm296_vm3, %v3748_v4 }
 0x5a2   :  { %5566 = vmatmul.msk.f32.gmra.mxu3 %vm296_vm3, %v3748_v4  ;;  %vm4279_vm9 = vcmp.ge.f32.partialorder %v4247_v39, 0.0  ;;  %v4311_v34 = vmul.f32 0.01, %v4247_v39 }
 0x5a4   :  { %v4018_v10 = vpop.f32.mrf.mxu2  ;;  %v7324_v43 = vsel %vm4279_vm9, %v4247_v39, %v4311_v34 }
 0x5a5   :  { %v4130_v24 = vpop.f32.mrf.mxu3  ;;  %5588 = vmatmul.msk.f32.gmra.mxu0 %vm1944_vm11, %v7324_v43 }
 0x5a6   :  { %v4212_v41 = vadd.f32 %v4130_v24, %v4013_v16  ;;  %v3905_v12 = vpop.f32.mrf.mxu1  ;;  %v3753_v16 = vsel %vm3689_vm0, %v3657_v33, %v3721_v63  ;;  %v3722_v24 = vmul.f32 0.01, %v3658_v20 }
 0x5a7   :  { %v4019_v53 = vadd.f32 %v4018_v10, %v3905_v12 }
 0x5a8   :  { %v4248_v44 = vadd.f32 %v7254_v21, %v4212_v41 }
 0x5a9   :  { %5501 = vmatmul.msk.f32.gmra.mxu1 %vm296_vm3, %v3749_v26  ;;  %5533 = vmatmul.msk.f32.gmra.mxu2 %vm296_vm3, %v3749_v26 }
 0x5aa   :  { %5567 = vmatmul.msk.f32.gmra.mxu3 %vm296_vm3, %v3749_v26  ;;  %vm4280_vm12 = vcmp.ge.f32.partialorder %v4248_v44, 0.0  ;;  %v4312_v46 = vmul.f32 0.01, %v4248_v44 }
 0x5ac   :  { %v4021_v37 = vpop.f32.mrf.mxu2  ;;  %v7334_v31 = vsel %vm4280_vm12, %v4248_v44, %v4312_v46  ;;  %v3621_v44 = vpop.f32.mrf.mxu0 }
 0x5ad   :  { %v4133_v1 = vpop.f32.mrf.mxu3  ;;  %5589 = vmatmul.msk.f32.gmra.mxu0 %vm1944_vm11, %v7334_v31  ;;  %v3659_v40 = vadd.f32 %v7118_v17, %v3621_v44 }
 0x5ae   :  { %v4213_v13 = vadd.f32 %v4133_v1, %v4016_v36  ;;  %v3908_v58 = vpop.f32.mrf.mxu1 }
 0x5af   :  { %v4022_v51 = vadd.f32 %v4021_v37, %v3908_v58  ;;  %v3754_v37 = vsel %vm3690_vm6, %v3658_v20, %v3722_v24  ;;  %vm3691_vm8 = vcmp.ge.f32.partialorder %v3659_v40, 0.0 }
 0x5b0   :  { %v4249_v60 = vadd.f32 %v7254_v21, %v4213_v13  ;;  %v3723_v13 = vmul.f32 0.01, %v3659_v40 }
 0x5b1   :  { %5502 = vmatmul.msk.f32.gmra.mxu1 %vm296_vm3, %v3750_v59  ;;  %5534 = vmatmul.msk.f32.gmra.mxu2 %vm296_vm3, %v3750_v59 }
 0x5b2   :  { %5568 = vmatmul.msk.f32.gmra.mxu3 %vm296_vm3, %v3750_v59  ;;  %vm4281_vm14 = vcmp.ge.f32.partialorder %v4249_v60, 0.0  ;;  %v4313_v29 = vmul.f32 0.01, %v4249_v60  ;;  %v3755_v25 = vsel %vm3691_vm8, %v3659_v40, %v3723_v13 }
 0x5b4   :  { %v4024_v42 = vpop.f32.mrf.mxu2  ;;  %v7343_v47 = vsel %vm4281_vm14, %v4249_v60, %v4313_v29 }
 0x5b5   :  { %v4136_v48 = vpop.f32.mrf.mxu3  ;;  %5590 = vmatmul.msk.f32.gmra.mxu0 %vm1944_vm11, %v7343_v47 }
 0x5b6   :  { %v4214_v35 = vadd.f32 %v4136_v48, %v4019_v53  ;;  %v3911_v50 = vpop.f32.mrf.mxu1 }
 0x5b7   :  { %v4025_v5 = vadd.f32 %v4024_v42, %v3911_v50 }
 0x5b8   :  { %v4250_v28 = vadd.f32 %v7254_v21, %v4214_v35 }
 0x5b9   :  { %5503 = vmatmul.msk.f32.gmra.mxu1 %vm296_vm3, %v3751_v55  ;;  %5535 = vmatmul.msk.f32.gmra.mxu2 %vm296_vm3, %v3751_v55 }
 0x5ba   :  { %5569 = vmatmul.msk.f32.gmra.mxu3 %vm296_vm3, %v3751_v55  ;;  %vm4282_vm2 = vcmp.ge.f32.partialorder %v4250_v28, 0.0  ;;  %v4314_v15 = vmul.f32 0.01, %v4250_v28 }
 0x5bc   :  { %v4027_v61 = vpop.f32.mrf.mxu2  ;;  %v7353_v18 = vsel %vm4282_vm2, %v4250_v28, %v4314_v15 }
 0x5bd   :  { %v4139_v45 = vpop.f32.mrf.mxu3  ;;  %5591 = vmatmul.msk.f32.gmra.mxu0 %vm1944_vm11, %v7353_v18 }
 0x5be   :  { %v4215_v49 = vadd.f32 %v4139_v45, %v4022_v51  ;;  %v3914_v8 = vpop.f32.mrf.mxu1 }
 0x5bf   :  { %v4028_v41 = vadd.f32 %v4027_v61, %v3914_v8 }
 0x5c0   :  { %v4251_v9 = vadd.f32 %v7254_v21, %v4215_v49 }
 0x5c1   :  { %5504 = vmatmul.msk.f32.gmra.mxu1 %vm296_vm3, %v3752_v30  ;;  %5536 = vmatmul.msk.f32.gmra.mxu2 %vm296_vm3, %v3752_v30 }
 0x5c2   :  { %5570 = vmatmul.msk.f32.gmra.mxu3 %vm296_vm3, %v3752_v30  ;;  %vm4283_vm5 = vcmp.ge.f32.partialorder %v4251_v9, 0.0  ;;  %v4315_v19 = vmul.f32 0.01, %v4251_v9 }
 0x5c4   :  { %v4030_v39 = vpop.f32.mrf.mxu2  ;;  %v7363_v4 = vsel %vm4283_vm5, %v4251_v9, %v4315_v19 }
 0x5c5   :  { %v4142_v11 = vpop.f32.mrf.mxu3  ;;  %5592 = vmatmul.msk.f32.gmra.mxu0 %vm1944_vm11, %v7363_v4 }
 0x5c6   :  { %v4216_v0 = vadd.f32 %v4142_v11, %v4025_v5  ;;  %v3917_v34 = vpop.f32.mrf.mxu1 }
 0x5c7   :  { %v4031_v58 = vadd.f32 %v4030_v39, %v3917_v34 }
 0x5c8   :  { %v4252_v57 = vadd.f32 %v7254_v21, %v4216_v0 }
 0x5c9   :  { %5505 = vmatmul.msk.f32.gmra.mxu1 %vm296_vm3, %v3753_v16  ;;  %5537 = vmatmul.msk.f32.gmra.mxu2 %vm296_vm3, %v3753_v16 }
 0x5ca   :  { %5571 = vmatmul.msk.f32.gmra.mxu3 %vm296_vm3, %v3753_v16  ;;  %vm4284_vm1 = vcmp.ge.f32.partialorder %v4252_v57, 0.0  ;;  %v4316_v10 = vmul.f32 0.01, %v4252_v57 }
 0x5cc   :  { %v4033_v12 = vpop.f32.mrf.mxu2  ;;  %v7373_v54 = vsel %vm4284_vm1, %v4252_v57, %v4316_v10 }
 0x5cd   :  { %v4145_v26 = vpop.f32.mrf.mxu3  ;;  %5593 = vmatmul.msk.f32.gmra.mxu0 %vm1944_vm11, %v7373_v54 }
 0x5ce   :  { %v4217_v2 = vadd.f32 %v4145_v26, %v4028_v41  ;;  %v3920_v46 = vpop.f32.mrf.mxu1 }
 0x5cf   :  { %v4034_v42 = vadd.f32 %v4033_v12, %v3920_v46 }
 0x5d0   :  { %v4253_v36 = vadd.f32 %v7254_v21, %v4217_v2 }
 0x5d1   :  { %5506 = vmatmul.msk.f32.gmra.mxu1 %vm296_vm3, %v3754_v37  ;;  %5538 = vmatmul.msk.f32.gmra.mxu2 %vm296_vm3, %v3754_v37 }
 0x5d2   :  { %v4317_v1 = vmul.f32 0.01, %v4253_v36  ;;  %5572 = vmatmul.msk.f32.gmra.mxu3 %vm296_vm3, %v3754_v37  ;;  %vm4285_vm7 = vcmp.ge.f32.partialorder %v4253_v36, 0.0 }
 0x5d4   :  { %v4036_v56 = vpop.f32.mrf.mxu2  ;;  %v7382_v6 = vsel %vm4285_vm7, %v4253_v36, %v4317_v1 }
 0x5d5   :  { %v4148_v60 = vpop.f32.mrf.mxu3  ;;  %5594 = vmatmul.msk.f32.gmra.mxu0 %vm1944_vm11, %v7382_v6 }
 0x5d6   :  { %v4218_v17 = vadd.f32 %v4148_v60, %v4031_v58  ;;  %v3923_v59 = vpop.f32.mrf.mxu1 }
 0x5d7   :  { %v4037_v52 = vadd.f32 %v4036_v56, %v3923_v59 }
 0x5d8   :  { %v4254_v29 = vadd.f32 %v7254_v21, %v4218_v17 }
 0x5d9   :  { %5507 = vmatmul.msk.f32.gmra.mxu1 %vm296_vm3, %v3755_v25  ;;  %5653 = vmatmul.msk.f32.vlgmr.msrb.gmra.mxu2 %vm1944_vm11, %v7271_v7 }
 0x5da   :  { %v4318_v53 = vmul.f32 0.01, %v4254_v29  ;;  %5573 = vmatmul.msk.f32.gmra.mxu3 %vm296_vm3, %v3755_v25  ;;  %vm4286_vm9 = vcmp.ge.f32.partialorder %v4254_v29, 0.0 }
 0x5dc   :  { %v4039_v48 = vpop.f32.mrf.mxu2  ;;  %v7391_v35 = vsel %vm4286_vm9, %v4254_v29, %v4318_v53 }
 0x5dd   :  { %v4151_v50 = vpop.f32.mrf.mxu3  ;;  %5595 = vmatmul.msk.f32.gmra.mxu0 %vm1944_vm11, %v7391_v35 }
 0x5de   :  { %v4219_v38 = vadd.f32 %v4151_v50, %v4034_v42  ;;  %v3926_v28 = vpop.f32.mrf.mxu1 }
 0x5df   :  { %v4040_v30 = vadd.f32 %v4039_v48, %v3926_v28 }
 0x5e0   :  { %v4255_v55 = vadd.f32 %v7254_v21, %v4219_v38 }
 0x5e1   :  { %4613 = vmatmul.f32.vlgmr.msra.gmra.mxu1 %v5755_v14  ;;  %5654 = vmatmul.msk.f32.gmra.mxu2 %vm1944_vm11, %v7283_v27 }
 0x5e2   :  { %v4319_v15 = vmul.f32 0.01, %v4255_v55  ;;  %4201 = vmatmul.f32.gmra.mxu3 %v5755_v14  ;;  %vm4287_vm10 = vcmp.ge.f32.partialorder %v4255_v55, 0.0 }
 0x5e4   :  { %v4042_v51 = vpop.f32.mrf.mxu2  ;;  %v7405_v61 = vsel %vm4287_vm10, %v4255_v55, %v4319_v15 }
 0x5e5   :  { %v4154_v45 = vpop.f32.mrf.mxu3  ;;  %5596 = vmatmul.msk.f32.gmra.mxu0 %vm1944_vm11, %v7405_v61 }
 0x5e6   :  { %v4220_v49 = vadd.f32 %v4154_v45, %v4037_v52  ;;  %v3929_v8 = vpop.f32.mrf.mxu1 }
 0x5e7   :  { %v4043_v34 = vadd.f32 %v4042_v51, %v3929_v8 }
 0x5e8   :  { %v4256_v33 = vadd.f32 %v7254_v21, %v4220_v49 }
 0x5e9   :  { %5614 = vmatmul.msk.f32.gmra.mxu1 %vm1944_vm11, %v7261_v62  ;;  %5655 = vmatmul.msk.f32.gmra.mxu2 %vm1944_vm11, %v7293_v32 }
 0x5ea   :  { %v4320_v9 = vmul.f32 0.01, %v4256_v33  ;;  %vm4288_vm12 = vcmp.ge.f32.partialorder %v4256_v33, 0.0 }
 0x5ec   :  { %v4045_v19 = vpop.f32.mrf.mxu2  ;;  %v7414_v63 = vsel %vm4288_vm12, %v4256_v33, %v4320_v9 }
 0x5ed   :  { %v4157_v5 = vpop.f32.mrf.mxu3  ;;  %5597 = vmatmul.msk.f32.gmra.mxu0 %vm1944_vm11, %v7414_v63 }
 0x5ee   :  { %v4221_v39 = vadd.f32 %v4157_v5, %v4040_v30  ;;  %v3932_v11 = vpop.f32.mrf.mxu1 }
 0x5ef   :  { %v4046_v12 = vadd.f32 %v4045_v19, %v3932_v11 }
 0x5f0   :  { %v4257_v0 = vadd.f32 %v7254_v21, %v4221_v39 }
 0x5f1   :  { %5615 = vmatmul.msk.f32.gmra.mxu1 %vm1944_vm11, %v7271_v7  ;;  %5656 = vmatmul.msk.f32.gmra.mxu2 %vm1944_vm11, %v7302_v23 }
 0x5f2   :  { %v4321_v62 = vmul.f32 0.01, %v4257_v0  ;;  %vm4289_vm13 = vcmp.ge.f32.partialorder %v4257_v0, 0.0  ;;  %v7472_v5 = vpop.f32.mrf.mxu0 }
 0x5f4   :  { %v4048_v20 = vpop.f32.mrf.mxu2  ;;  %v7423_v57 = vsel %vm4289_vm13, %v4257_v0, %v4321_v62 }
 0x5f5   :  { %v4160_v16 = vpop.f32.mrf.mxu3  ;;  %5598 = vmatmul.msk.f32.gmra.mxu0 %vm1944_vm11, %v7423_v57 }
 0x5f6   :  { %v4222_v10 = vadd.f32 %v4160_v16, %v4043_v34  ;;  %v3935_v24 = vpop.f32.mrf.mxu1 }
 0x5f7   :  { %v4049_v37 = vadd.f32 %v4048_v20, %v3935_v24 }
 0x5f8   :  { %v4258_v41 = vadd.f32 %v7254_v21, %v4222_v10 }
 0x5f9   :  { %5616 = vmatmul.msk.f32.gmra.mxu1 %vm1944_vm11, %v7283_v27  ;;  %5657 = vmatmul.msk.f32.gmra.mxu2 %vm1944_vm11, %v7312_v3 }
 0x5fa   :  { %v4322_v7 = vmul.f32 0.01, %v4258_v41  ;;  %vm4290_vm14 = vcmp.ge.f32.partialorder %v4258_v41, 0.0  ;;  %v7484_v24 = vpop.f32.mrf.mxu0 }
 0x5fc   :  { %v4051_v44 = vpop.f32.mrf.mxu2  ;;  %v7432_v26 = vsel %vm4290_vm14, %v4258_v41, %v4322_v7 }
 0x5fd   :  { %v4163_v2 = vpop.f32.mrf.mxu3  ;;  %5599 = vmatmul.msk.f32.gmra.mxu0 %vm1944_vm11, %v7432_v26 }
 0x5fe   :  { %v4223_v46 = vadd.f32 %v4163_v2, %v4046_v12  ;;  %v3938_v40 = vpop.f32.mrf.mxu1 }
 0x5ff   :  { %v4052_v59 = vadd.f32 %v4051_v44, %v3938_v40 }
 0x600   :  { %v4259_v36 = vadd.f32 %v7254_v21, %v4223_v46 }
 0x601   :  { %5617 = vmatmul.msk.f32.gmra.mxu1 %vm1944_vm11, %v7293_v32  ;;  %5658 = vmatmul.msk.f32.gmra.mxu2 %vm1944_vm11, %v7324_v43 }
 0x602   :  { %v4323_v27 = vmul.f32 0.01, %v4259_v36  ;;  %vm4291_vm15 = vcmp.ge.f32.partialorder %v4259_v36, 0.0 }
 0x604   :  { %v4054_v1 = vpop.f32.mrf.mxu2  ;;  %v7441_v13 = vsel %vm4291_vm15, %v4259_v36, %v4323_v27  ;;  %v7499_v36 = vpop.f32.mrf.mxu0 }
 0x605   :  { %v4166_v58 = vpop.f32.mrf.mxu3  ;;  %5600 = vmatmul.msk.f32.gmra.mxu0 %vm1944_vm11, %v7441_v13 }
 0x606   :  { %v4224_v56 = vadd.f32 %v4166_v58, %v4049_v37  ;;  %v3941_v60 = vpop.f32.mrf.mxu1 }
 0x607   :  { %v4055_v38 = vadd.f32 %v4054_v1, %v3941_v60 }
 0x608   :  { %v4260_v17 = vadd.f32 %v7254_v21, %v4224_v56 }
 0x609   :  { %5618 = vmatmul.msk.f32.gmra.mxu1 %vm1944_vm11, %v7302_v23  ;;  %5659 = vmatmul.msk.f32.gmra.mxu2 %vm1944_vm11, %v7334_v31 }
 0x60a   :  { %v4324_v32 = vmul.f32 0.01, %v4260_v17  ;;  %vm4292_vm2 = vcmp.ge.f32.partialorder %v4260_v17, 0.0 }
 0x60c   :  { %v4057_v29 = vpop.f32.mrf.mxu2  ;;  %v7450_v25 = vsel %vm4292_vm2, %v4260_v17, %v4324_v32 }
 0x60d   :  { %v4169_v53 = vpop.f32.mrf.mxu3  ;;  %5601 = vmatmul.msk.f32.gmra.mxu0 %vm1944_vm11, %v7450_v25 }
 0x60e   :  { %v4225_v42 = vadd.f32 %v4169_v53, %v4052_v59  ;;  %v3944_v48 = vpop.f32.mrf.mxu1  ;;  %v7512_v53 = vpop.f32.mrf.mxu0 }
 0x60f   :  { %v4058_v49 = vadd.f32 %v4057_v29, %v3944_v48 }
 0x610   :  { %v4261_v50 = vadd.f32 %v7254_v21, %v4225_v42 }
 0x611   :  { %5619 = vmatmul.msk.f32.gmra.mxu1 %vm1944_vm11, %v7312_v3  ;;  %5660 = vmatmul.msk.f32.gmra.mxu2 %vm1944_vm11, %v7343_v47 }
 0x612   :  { %v4325_v23 = vmul.f32 0.01, %v4261_v50  ;;  %vm4293_vm4 = vcmp.ge.f32.partialorder %v4261_v50, 0.0 }
 0x614   :  { %v4060_v28 = vpop.f32.mrf.mxu2  ;;  %v7459_v55 = vsel %vm4293_vm4, %v4261_v50, %v4325_v23 }
 0x615   :  { %v4172_v15 = vpop.f32.mrf.mxu3  ;;  %5602 = vmatmul.msk.f32.gmra.mxu0 %vm1944_vm11, %v7459_v55 }
 0x616   :  { %v4226_v52 = vadd.f32 %v4172_v15, %v4055_v38  ;;  %v3947_v51 = vpop.f32.mrf.mxu1 }
 0x617   :  { %v4061_v11 = vadd.f32 %v4060_v28, %v3947_v51 }
 0x618   :  { %v4262_v45 = vadd.f32 %v7254_v21, %v4226_v52 }
 0x619   :  { %5620 = vmatmul.msk.f32.gmra.mxu1 %vm1944_vm11, %v7324_v43  ;;  %5661 = vmatmul.msk.f32.gmra.mxu2 %vm1944_vm11, %v7353_v18 }
 0x61a   :  { %v4326_v3 = vmul.f32 0.01, %v4262_v45  ;;  %vm4294_vm5 = vcmp.ge.f32.partialorder %v4262_v45, 0.0 }
 0x61c   :  { %v4063_v8 = vpop.f32.mrf.mxu2  ;;  %v7468_v33 = vsel %vm4294_vm5, %v4262_v45, %v4326_v3  ;;  %v7530_v45 = vpop.f32.mrf.mxu0 }
 0x61d   :  { %v4175_v9 = vpop.f32.mrf.mxu3  ;;  %5603 = vmatmul.msk.f32.gmra.mxu0 %vm1944_vm11, %v7468_v33 }
 0x61e   :  { %v4227_v30 = vadd.f32 %v4175_v9, %v4058_v49  ;;  %v3950_v19 = vpop.f32.mrf.mxu1 }
 0x61f   :  { %v4064_v41 = vadd.f32 %v4063_v8, %v3950_v19  ;;  %v5050_v8 = vld [vmem:[%s7524_s30 + $0x78] sm:$0xff] }
 0x620   :  { %v4263_v39 = vadd.f32 %v7254_v21, %v4227_v30  ;;  %5055 = vmatpush.msra.mxu3 %v5050_v8 }
 0x621   :  { %5621 = vmatmul.msk.f32.gmra.mxu1 %vm1944_vm11, %v7334_v31  ;;  %5662 = vmatmul.msk.f32.gmra.mxu2 %vm1944_vm11, %v7363_v4 }
 0x622   :  { %v4327_v43 = vmul.f32 0.01, %v4263_v39  ;;  %vm4295_vm0 = vcmp.ge.f32.partialorder %v4263_v39, 0.0 }
 0x624   :  { %v4066_v0 = vpop.f32.mrf.mxu2  ;;  %v7479_v62 = vsel %vm4295_vm0, %v4263_v39, %v4327_v43 }
 0x625   :  { %v4178_v34 = vpop.f32.mrf.mxu3  ;;  %5604 = vmatmul.msk.f32.gmra.mxu0 %vm1944_vm11, %v7479_v62 }
 0x626   :  { %v4228_v20 = vadd.f32 %v4178_v34, %v4061_v11  ;;  %v3953_v16 = vpop.f32.mrf.mxu1 }
 0x627   :  { %v4067_v27 = vadd.f32 %v4066_v0, %v3953_v16  ;;  %v7543_v0 = vpop.f32.mrf.mxu0 }
 0x628   :  { %v4264_v10 = vadd.f32 %v7254_v21, %v4228_v20 }
 0x629   :  { %5622 = vmatmul.msk.f32.gmra.mxu1 %vm1944_vm11, %v7343_v47  ;;  %5663 = vmatmul.msk.f32.gmra.mxu2 %vm1944_vm11, %v7373_v54 }
 0x62a   :  { %v4328_v31 = vmul.f32 0.01, %v4264_v10  ;;  %vm4296_vm1 = vcmp.ge.f32.partialorder %v4264_v10, 0.0 }
 0x62c   :  { %v4069_v7 = vpop.f32.mrf.mxu2  ;;  %v7490_v12 = vsel %vm4296_vm1, %v4264_v10, %v4328_v31 }
 0x62d   :  { %v4181_v44 = vpop.f32.mrf.mxu3  ;;  %5605 = vmatmul.msk.f32.gmra.mxu0 %vm1944_vm11, %v7490_v12 }
 0x62e   :  { %v4229_v2 = vadd.f32 %v4181_v44, %v4064_v41  ;;  %v3956_v46 = vpop.f32.mrf.mxu1 }
 0x62f   :  { %v4070_v32 = vadd.f32 %v4069_v7, %v3956_v46  ;;  %v7559_v46 = vpop.f32.mrf.mxu0 }
 0x630   :  { %v4265_v40 = vadd.f32 %v7254_v21, %v4229_v2  ;;  %v5049_v2 = vld [vmem:[%s7524_s30 + $0x70] sm:$0xff] }
 0x631   :  { %5623 = vmatmul.msk.f32.gmra.mxu1 %vm1944_vm11, %v7353_v18  ;;  %5664 = vmatmul.msk.f32.gmra.mxu2 %vm1944_vm11, %v7382_v6 }
 0x632   :  { %v4329_v47 = vmul.f32 0.01, %v4265_v40  ;;  %vm4297_vm6 = vcmp.ge.f32.partialorder %v4265_v40, 0.0  ;;  %5056 = vmatpush.msra.mxu3 %v5049_v2  ;;  %v5047_v2 = vld [vmem:[%s7524_s30 + $0x60] sm:$0xff] }
 0x634   :  { %v4072_v37 = vpop.f32.mrf.mxu2  ;;  %v7501_v1 = vsel %vm4297_vm6, %v4265_v40, %v4329_v47 }
 0x635   :  { %v4184_v58 = vpop.f32.mrf.mxu3  ;;  %5606 = vmatmul.msk.f32.gmra.mxu0 %vm1944_vm11, %v7501_v1 }
 0x636   :  { %v4230_v56 = vadd.f32 %v4184_v58, %v4067_v27  ;;  %v3959_v60 = vpop.f32.mrf.mxu1 }
 0x637   :  { %v4073_v38 = vadd.f32 %v4072_v37, %v3959_v60 }
 0x638   :  { %v4266_v17 = vadd.f32 %v7254_v21, %v4230_v56 }
 0x639   :  { %5624 = vmatmul.msk.f32.gmra.mxu1 %vm1944_vm11, %v7363_v4  ;;  %5665 = vmatmul.msk.f32.gmra.mxu2 %vm1944_vm11, %v7391_v35 }
 0x63a   :  { %v4330_v18 = vmul.f32 0.01, %v4266_v17  ;;  %vm4298_vm7 = vcmp.ge.f32.partialorder %v4266_v17, 0.0 }
 0x63c   :  { %v4075_v59 = vpop.f32.mrf.mxu2  ;;  %v7510_v29 = vsel %vm4298_vm7, %v4266_v17, %v4330_v18 }
 0x63d   :  { %v4187_v42 = vpop.f32.mrf.mxu3  ;;  %5607 = vmatmul.msk.f32.gmra.mxu0 %vm1944_vm11, %v7510_v29 }
 0x63e   :  { %v4231_v48 = vadd.f32 %v4187_v42, %v4070_v32  ;;  %v3962_v50 = vpop.f32.mrf.mxu1  ;;  %v7572_v32 = vld [vmem:[%s7396_s26] ss:$0 sm:$0xff] }
 0x63f   :  { %v4076_v9 = vadd.f32 %v4075_v59, %v3962_v50  ;;  %v7576_v50 = vpop.f32.mrf.mxu0 }
 0x640   :  { %v4267_v23 = vadd.f32 %v7254_v21, %v4231_v48 }
 0x641   :  { %5625 = vmatmul.msk.f32.gmra.mxu1 %vm1944_vm11, %v7373_v54  ;;  %5666 = vmatmul.msk.f32.gmra.mxu2 %vm1944_vm11, %v7405_v61 }
 0x642   :  { %v4331_v4 = vmul.f32 0.01, %v4267_v23  ;;  %vm4299_vm8 = vcmp.ge.f32.partialorder %v4267_v23, 0.0 }
 0x644   :  { %v4078_v28 = vpop.f32.mrf.mxu2  ;;  %v7526_v15 = vsel %vm4299_vm8, %v4267_v23, %v4331_v4 }
 0x645   :  { %v4190_v52 = vpop.f32.mrf.mxu3  ;;  %5608 = vmatmul.msk.f32.gmra.mxu0 %vm1944_vm11, %v7526_v15 }
 0x646   :  { %v4232_v54 = vadd.f32 %v4190_v52, %v4073_v38  ;;  %v3965_v51 = vpop.f32.mrf.mxu1  ;;  %v5048_v52 = vld [vmem:[%s7524_s30 + $0x68] sm:$0xff] }
 0x647   :  { %v4079_v20 = vadd.f32 %v4078_v28, %v3965_v51  ;;  %5057 = vmatpush.msra.mxu3 %v5048_v52 }
 0x648   :  { %v4268_v3 = vadd.f32 %v7254_v21, %v4232_v54 }
 0x649   :  { %5626 = vmatmul.msk.f32.gmra.mxu1 %vm1944_vm11, %v7382_v6  ;;  %5667 = vmatmul.msk.f32.gmra.mxu2 %vm1944_vm11, %v7414_v63 }
 0x64a   :  { %v4332_v49 = vmul.f32 0.01, %v4268_v3  ;;  %vm4300_vm9 = vcmp.ge.f32.partialorder %v4268_v3, 0.0  ;;  %5058 = vmatpush.msra.mxu3 %v5047_v2 }
 0x64c   :  { %v4081_v30 = vpop.f32.mrf.mxu2  ;;  %v7538_v19 = vsel %vm4300_vm9, %v4268_v3, %v4332_v49 }
 0x64d   :  { %v4193_v39 = vpop.f32.mrf.mxu3  ;;  %5609 = vmatmul.msk.f32.gmra.mxu0 %vm1944_vm11, %v7538_v19 }
 0x64e   :  { %v4233_v43 = vadd.f32 %v4193_v39, %v4076_v9  ;;  %v3968_v11 = vpop.f32.mrf.mxu1 }
 0x64f   :  { %v4082_v40 = vadd.f32 %v4081_v30, %v3968_v11 }
 0x650   :  { %v4269_v6 = vadd.f32 %v7254_v21, %v4233_v43 }
 0x651   :  { %5627 = vmatmul.msk.f32.gmra.mxu1 %vm1944_vm11, %v7391_v35  ;;  %5668 = vmatmul.msk.f32.gmra.mxu2 %vm1944_vm11, %v7423_v57 }
 0x652   :  { %v4333_v34 = vmul.f32 0.01, %v4269_v6  ;;  %vm4301_vm10 = vcmp.ge.f32.partialorder %v4269_v6, 0.0 }
 0x654   :  { %v4084_v16 = vpop.f32.mrf.mxu2  ;;  %v7549_v10 = vsel %vm4301_vm10, %v4269_v6, %v4333_v34 }
 0x655   :  { %v4196_v31 = vpop.f32.mrf.mxu3  ;;  %5610 = vmatmul.msk.f32.gmra.mxu0 %vm1944_vm11, %v7549_v10 }
 0x656   :  { %v4234_v41 = vadd.f32 %v4196_v31, %v4079_v20  ;;  %v3971_v7 = vpop.f32.mrf.mxu1 }
 0x657   :  { %v4085_v59 = vadd.f32 %v4084_v16, %v3971_v7 }
 0x658   :  { %v4270_v44 = vadd.f32 %v7254_v21, %v4234_v41 }
 0x659   :  { %5628 = vmatmul.msk.f32.gmra.mxu1 %vm1944_vm11, %v7405_v61  ;;  %5669 = vmatmul.msk.f32.gmra.mxu2 %vm1944_vm11, %v7432_v26 }
 0x65a   :  { %v4334_v35 = vmul.f32 0.01, %v4270_v44  ;;  %vm4302_vm12 = vcmp.ge.f32.partialorder %v4270_v44, 0.0 }
 0x65c   :  { %v7561_v47 = vsel %vm4302_vm12, %v4270_v44, %v4334_v35  ;;  %v4736_v27 = vpop.f32.mrf.mxu2 }
 0x65d   :  { %v4199_v37 = vpop.f32.mrf.mxu3  ;;  %5611 = vmatmul.msk.f32.gmra.mxu0 %vm1944_vm11, %v7561_v47 }
 0x65e   :  { %v4235_v58 = vadd.f32 %v4199_v37, %v4082_v40  ;;  %v4614_v56 = vpop.f32.mrf.mxu1 }
 0x65f   :  { %v4615_v61 = vadd.f32 %v4614_v56, %v7472_v5 }
 0x660   :  { %v4271_v60 = vadd.f32 %v7254_v21, %v4235_v58 }
 0x661   :  { %5629 = vmatmul.msk.f32.gmra.mxu1 %vm1944_vm11, %v7414_v63  ;;  %5670 = vmatmul.msk.f32.gmra.mxu2 %vm1944_vm11, %v7441_v13  ;;  %v4832_v18 = vadd.f32 %v4736_v27, %v4615_v61 }
 0x662   :  { %v4335_v17 = vmul.f32 0.01, %v4271_v60  ;;  %vm4303_vm13 = vcmp.ge.f32.partialorder %v4271_v60, 0.0 }
 0x663   :  { %v4868_v4 = vadd.f32 %v7572_v32, %v4832_v18 }
 0x664   :  { %v7574_v42 = vsel %vm4303_vm13, %v4271_v60, %v4335_v17  ;;  %v4739_v48 = vpop.f32.mrf.mxu2 }
 0x665   :  { %v4202_v5 = vpop.f32.mrf.mxu3  ;;  %5612 = vmatmul.msk.f32.gmra.mxu0 %vm1944_vm11, %v7574_v42  ;;  %v4932_v3 = vmul.f32 0.01, %v4868_v4  ;;  %vm4900_vm15 = vcmp.ge.f32.partialorder %v4868_v4, 0.0 }
 0x666   :  { %v4236_v63 = vadd.f32 %v4202_v5, %v4085_v59  ;;  %v4617_v23 = vpop.f32.mrf.mxu1 }
 0x667   :  { %v4618_v38 = vadd.f32 %v4617_v23, %v7484_v24  ;;  %v4964_v30 = vsel %vm4900_vm15, %v4868_v4, %v4932_v3 }
 0x668   :  { %v4272_v28 = vadd.f32 %v7254_v21, %v4236_v63  ;;  %v5046_v63 = vld [vmem:[%s7524_s30 + $0x58] sm:$0xff] }
 0x669   :  { %v4833_v54 = vadd.f32 %v4739_v48, %v4618_v38  ;;  %5630 = vmatmul.msk.f32.gmra.mxu1 %vm1944_vm11, %v7423_v57  ;;  %5671 = vmatmul.msk.f32.gmra.mxu2 %vm1944_vm11, %v7450_v25  ;;  %v7593_v57 = vpop.f32.mrf.mxu0 }
 0x66a   :  { %v4336_v51 = vmul.f32 0.01, %v4272_v28  ;;  %vm4304_vm14 = vcmp.ge.f32.partialorder %v4272_v28, 0.0  ;;  %5059 = vmatpush.msra.mxu3 %v5046_v63 }
 0x66b   :  { %v4869_v49 = vadd.f32 %v7572_v32, %v4833_v54 }
 0x66c   :  { %v7589_v8 = vsel %vm4304_vm14, %v4272_v28, %v4336_v51  ;;  %v4742_v24 = vpop.f32.mrf.mxu2 }
 0x66d   :  { %vm4901_vm2 = vcmp.ge.f32.partialorder %v4869_v49, 0.0  ;;  %v4933_v21 = vmul.f32 0.01, %v4869_v49  ;;  %5613 = vmatmul.msk.f32.gmra.mxu0 %vm1944_vm11, %v7589_v8 }
 0x66e   :  { %v4620_v9 = vpop.f32.mrf.mxu1 }
 0x66f   :  { %v4965_v39 = vsel %vm4901_vm2, %v4869_v49, %v4933_v21  ;;  %v4621_v43 = vadd.f32 %v4620_v9, %v7499_v36 }
 0x670   :  { %v4996_v11 = vadd.f32 %v4965_v39, %v4964_v30 }
 0x671   :  { %v4834_v6 = vadd.f32 %v4742_v24, %v4621_v43  ;;  %5631 = vmatmul.msk.f32.gmra.mxu1 %vm1944_vm11, %v7432_v26  ;;  %5672 = vmatmul.msk.f32.gmra.mxu2 %vm1944_vm11, %v7459_v55  ;;  %v7603_v36 = vpop.f32.mrf.mxu0  ;;  %v5045_v43 = vld [vmem:[%s7524_s30 + $0x50] sm:$0xff] }
 0x672   :  { %5060 = vmatpush.msra.mxu3 %v5045_v43  ;;  %v5042_v43 = vld [vmem:[%s7524_s30 + $0x38] sm:$0xff] }
 0x673   :  { %v4870_v34 = vadd.f32 %v7572_v32, %v4834_v6 }
 0x674   :  { %v4745_v20 = vpop.f32.mrf.mxu2 }
 0x675   :  { %vm4902_vm4 = vcmp.ge.f32.partialorder %v4870_v34, 0.0  ;;  %v4934_v16 = vmul.f32 0.01, %v4870_v34 }
 0x676   :  { %v4623_v31 = vpop.f32.mrf.mxu1 }
 0x677   :  { %v4966_v41 = vsel %vm4902_vm4, %v4870_v34, %v4934_v16  ;;  %v4624_v7 = vadd.f32 %v4623_v31, %v7512_v53 }
 0x678   :  { %v4997_v44 = vadd.f32 %v4996_v11, %v4966_v41 }
 0x679   :  { %v4835_v35 = vadd.f32 %v4745_v20, %v4624_v7  ;;  %5632 = vmatmul.msk.f32.gmra.mxu1 %vm1944_vm11, %v7441_v13  ;;  %5673 = vmatmul.msk.f32.gmra.mxu2 %vm1944_vm11, %v7468_v33  ;;  %v7615_v13 = vpop.f32.mrf.mxu0 }
 0x67b   :  { %v4871_v26 = vadd.f32 %v7572_v32, %v4835_v35 }
 0x67c   :  { %v4748_v40 = vpop.f32.mrf.mxu2 }
 0x67d   :  { %vm4903_vm5 = vcmp.ge.f32.partialorder %v4871_v26, 0.0  ;;  %v4935_v27 = vmul.f32 0.01, %v4871_v26 }
 0x67e   :  { %v4626_v37 = vpop.f32.mrf.mxu1 }
 0x67f   :  { %v4967_v53 = vsel %vm4903_vm5, %v4871_v26, %v4935_v27  ;;  %v4627_v58 = vadd.f32 %v4626_v37, %v7530_v45 }
 0x680   :  { %v4998_v56 = vadd.f32 %v4997_v44, %v4967_v53 }
 0x681   :  { %v4836_v61 = vadd.f32 %v4748_v40, %v4627_v58  ;;  %5633 = vmatmul.msk.f32.gmra.mxu1 %vm1944_vm11, %v7450_v25  ;;  %5674 = vmatmul.msk.f32.gmra.mxu2 %vm1944_vm11, %v7479_v62  ;;  %v7625_v38 = vpop.f32.mrf.mxu0 }
 0x683   :  { %v4872_v60 = vadd.f32 %v7572_v32, %v4836_v61 }
 0x684   :  { %v4751_v17 = vpop.f32.mrf.mxu2 }
 0x685   :  { %vm4904_vm0 = vcmp.ge.f32.partialorder %v4872_v60, 0.0  ;;  %v4936_v18 = vmul.f32 0.01, %v4872_v60 }
 0x686   :  { %v4629_v59 = vpop.f32.mrf.mxu1 }
 0x687   :  { %v4968_v48 = vsel %vm4904_vm0, %v4872_v60, %v4936_v18  ;;  %v4630_v5 = vadd.f32 %v4629_v59, %v7543_v0 }
 0x688   :  { %v4999_v45 = vadd.f32 %v4998_v56, %v4968_v48 }
 0x689   :  { %v4837_v23 = vadd.f32 %v4751_v17, %v4630_v5  ;;  %5634 = vmatmul.msk.f32.gmra.mxu1 %vm1944_vm11, %v7459_v55  ;;  %5675 = vmatmul.msk.f32.gmra.mxu2 %vm1944_vm11, %v7490_v12  ;;  %v7633_v9 = vpop.f32.mrf.mxu0 }
 0x68b   :  { %v4873_v25 = vadd.f32 %v7572_v32, %v4837_v23 }
 0x68c   :  { %v4754_v4 = vpop.f32.mrf.mxu2 }
 0x68d   :  { %vm4905_vm1 = vcmp.ge.f32.partialorder %v4873_v25, 0.0  ;;  %v4937_v28 = vmul.f32 0.01, %v4873_v25 }
 0x68e   :  { %v4632_v52 = vpop.f32.mrf.mxu1 }
 0x68f   :  { %v4969_v0 = vsel %vm4905_vm1, %v4873_v25, %v4937_v28  ;;  %v4633_v54 = vadd.f32 %v4632_v52, %v7559_v46 }
 0x690   :  { %v5000_v51 = vadd.f32 %v4999_v45, %v4969_v0 }
 0x691   :  { %v4838_v3 = vadd.f32 %v4754_v4, %v4633_v54  ;;  %5635 = vmatmul.msk.f32.gmra.mxu1 %vm1944_vm11, %v7468_v33  ;;  %5676 = vmatmul.msk.f32.gmra.mxu2 %vm1944_vm11, %v7501_v1  ;;  %v4538_v41 = vpop.f32.mrf.mxu0 }
 0x693   :  { %v4874_v55 = vadd.f32 %v7572_v32, %v4838_v3 }
 0x694   :  { %v4757_v49 = vpop.f32.mrf.mxu2 }
 0x695   :  { %vm4906_vm6 = vcmp.ge.f32.partialorder %v4874_v55, 0.0  ;;  %v4938_v24 = vmul.f32 0.01, %v4874_v55 }
 0x696   :  { %v4635_v21 = vpop.f32.mrf.mxu1 }
 0x697   :  { %v4970_v30 = vsel %vm4906_vm6, %v4874_v55, %v4938_v24  ;;  %v4636_v39 = vadd.f32 %v4635_v21, %v7576_v50 }
 0x698   :  { %v5001_v46 = vadd.f32 %v5000_v51, %v4970_v30 }
 0x699   :  { %v4839_v11 = vadd.f32 %v4757_v49, %v4636_v39  ;;  %5636 = vmatmul.msk.f32.gmra.mxu1 %vm1944_vm11, %v7479_v62  ;;  %5677 = vmatmul.msk.f32.gmra.mxu2 %vm1944_vm11, %v7510_v29 }
 0x69b   :  { %v4875_v33 = vadd.f32 %v7572_v32, %v4839_v11 }
 0x69c   :  { %v4760_v6 = vpop.f32.mrf.mxu2 }
 0x69d   :  { %vm4907_vm7 = vcmp.ge.f32.partialorder %v4875_v33, 0.0  ;;  %v4939_v34 = vmul.f32 0.01, %v4875_v33 }
 0x69e   :  { %v4638_v20 = vpop.f32.mrf.mxu1 }
 0x69f   :  { %v4971_v16 = vsel %vm4907_vm7, %v4875_v33, %v4939_v34  ;;  %v4639_v50 = vadd.f32 %v4638_v20, %v7593_v57  ;;  %v5044_v57 = vld [vmem:[%s7524_s30 + $0x48] sm:$0xff] }
 0x6a0   :  { %v5002_v31 = vadd.f32 %v5001_v46, %v4971_v16  ;;  %5061 = vmatpush.msra.mxu3 %v5044_v57 }
 0x6a1   :  { %v4840_v7 = vadd.f32 %v4760_v6, %v4639_v50  ;;  %5637 = vmatmul.msk.f32.gmra.mxu1 %vm1944_vm11, %v7490_v12  ;;  %5678 = vmatmul.msk.f32.gmra.mxu2 %vm1944_vm11, %v7526_v15  ;;  %v4541_v12 = vpop.f32.mrf.mxu0 }
 0x6a3   :  { %v4876_v62 = vadd.f32 %v7572_v32, %v4840_v7 }
 0x6a4   :  { %v4763_v44 = vpop.f32.mrf.mxu2 }
 0x6a5   :  { %vm4908_vm8 = vcmp.ge.f32.partialorder %v4876_v62, 0.0  ;;  %v4940_v2 = vmul.f32 0.01, %v4876_v62 }
 0x6a6   :  { %v4641_v35 = vpop.f32.mrf.mxu1 }
 0x6a7   :  { %v4972_v26 = vsel %vm4908_vm8, %v4876_v62, %v4940_v2  ;;  %v4642_v40 = vadd.f32 %v4641_v35, %v7603_v36 }
 0x6a8   :  { %v5003_v27 = vadd.f32 %v5002_v31, %v4972_v26  ;;  %v5041_v26 = vld [vmem:[%s7524_s30 + $0x30] sm:$0xff] }
 0x6a9   :  { %v4841_v37 = vadd.f32 %v4763_v44, %v4642_v40  ;;  %5638 = vmatmul.msk.f32.gmra.mxu1 %vm1944_vm11, %v7501_v1  ;;  %5679 = vmatmul.msk.f32.gmra.mxu2 %vm1944_vm11, %v7538_v19  ;;  %v4544_v48 = vpop.f32.mrf.mxu0 }
 0x6ab   :  { %v4877_v53 = vadd.f32 %v7572_v32, %v4841_v37 }
 0x6ac   :  { %v4766_v58 = vpop.f32.mrf.mxu2 }
 0x6ad   :  { %vm4909_vm9 = vcmp.ge.f32.partialorder %v4877_v53, 0.0  ;;  %v4941_v56 = vmul.f32 0.01, %v4877_v53 }
 0x6ae   :  { %v4644_v61 = vpop.f32.mrf.mxu1 }
 0x6af   :  { %v4973_v60 = vsel %vm4909_vm9, %v4877_v53, %v4941_v56  ;;  %v4645_v36 = vadd.f32 %v4644_v61, %v7615_v13  ;;  %v5043_v13 = vld [vmem:[%s7524_s30 + $0x40] sm:$0xff] }
 0x6b0   :  { %v5004_v17 = vadd.f32 %v5003_v27, %v4973_v60  ;;  %5062 = vmatpush.msra.mxu3 %v5043_v13 }
 0x6b1   :  { %v4842_v18 = vadd.f32 %v4766_v58, %v4645_v36  ;;  %5639 = vmatmul.msk.f32.gmra.mxu1 %vm1944_vm11, %v7510_v29  ;;  %5680 = vmatmul.msk.f32.gmra.mxu2 %vm1944_vm11, %v7549_v10  ;;  %v4547_v54 = vpop.f32.mrf.mxu0 }
 0x6b2   :  { %5063 = vmatpush.msra.mxu3 %v5042_v43 }
 0x6b3   :  { %v4878_v1 = vadd.f32 %v7572_v32, %v4842_v18 }
 0x6b4   :  { %v4769_v59 = vpop.f32.mrf.mxu2  ;;  %5064 = vmatpush.msra.mxu3 %v5041_v26 }
 0x6b5   :  { %vm4910_vm10 = vcmp.ge.f32.partialorder %v4878_v1, 0.0  ;;  %v4942_v5 = vmul.f32 0.01, %v4878_v1 }
 0x6b6   :  { %v4647_v45 = vpop.f32.mrf.mxu1 }
 0x6b7   :  { %v4974_v63 = vsel %vm4910_vm10, %v4878_v1, %v4942_v5  ;;  %v4648_v23 = vadd.f32 %v4647_v45, %v7625_v38 }
 0x6b8   :  { %v5005_v25 = vadd.f32 %v5004_v17, %v4974_v63 }
 0x6b9   :  { %v4843_v4 = vadd.f32 %v4769_v59, %v4648_v23  ;;  %5640 = vmatmul.msk.f32.gmra.mxu1 %vm1944_vm11, %v7526_v15  ;;  %5681 = vmatmul.msk.f32.gmra.mxu2 %vm1944_vm11, %v7561_v47  ;;  %v4550_v11 = vpop.f32.mrf.mxu0 }
 0x6bb   :  { %v4879_v29 = vadd.f32 %v7572_v32, %v4843_v4 }
 0x6bc   :  { %v4772_v28 = vpop.f32.mrf.mxu2 }
 0x6bd   :  { %vm4911_vm12 = vcmp.ge.f32.partialorder %v4879_v29, 0.0  ;;  %v4943_v52 = vmul.f32 0.01, %v4879_v29 }
 0x6be   :  { %v4650_v0 = vpop.f32.mrf.mxu1 }
 0x6bf   :  { %v4975_v51 = vsel %vm4911_vm12, %v4879_v29, %v4943_v52  ;;  %v4651_v38 = vadd.f32 %v4650_v0, %v7633_v9 }
 0x6c0   :  { %v5006_v3 = vadd.f32 %v5005_v25, %v4975_v51 }
 0x6c1   :  { %v4844_v55 = vadd.f32 %v4772_v28, %v4651_v38  ;;  %5641 = vmatmul.msk.f32.gmra.mxu1 %vm1944_vm11, %v7538_v19  ;;  %5682 = vmatmul.msk.f32.gmra.mxu2 %vm1944_vm11, %v7574_v42 }
 0x6c3   :  { %v4880_v15 = vadd.f32 %v7572_v32, %v4844_v55 }
 0x6c4   :  { %v4775_v49 = vpop.f32.mrf.mxu2 }
 0x6c5   :  { %vm4912_vm13 = vcmp.ge.f32.partialorder %v4880_v15, 0.0  ;;  %v4944_v24 = vmul.f32 0.01, %v4880_v15 }
 0x6c6   :  { %v4653_v21 = vpop.f32.mrf.mxu1 }
 0x6c7   :  { %v4976_v30 = vsel %vm4912_vm13, %v4880_v15, %v4944_v24  ;;  %v4654_v39 = vadd.f32 %v4653_v21, %v4538_v41 }
 0x6c8   :  { %v5007_v46 = vadd.f32 %v5006_v3, %v4976_v30 }
 0x6c9   :  { %v4845_v9 = vadd.f32 %v4775_v49, %v4654_v39  ;;  %5642 = vmatmul.msk.f32.gmra.mxu1 %vm1944_vm11, %v7549_v10  ;;  %5683 = vmatmul.msk.f32.gmra.mxu2 %vm1944_vm11, %v7589_v8  ;;  %v4553_v10 = vpop.f32.mrf.mxu0  ;;  %v5039_v49 = vld [vmem:[%s7524_s30 + $0x20] sm:$0xff] }
 0x6cb   :  { %v4881_v19 = vadd.f32 %v7572_v32, %v4845_v9 }
 0x6cc   :  { %v4778_v33 = vpop.f32.mrf.mxu2 }
 0x6cd   :  { %vm4913_vm14 = vcmp.ge.f32.partialorder %v4881_v19, 0.0  ;;  %v4945_v6 = vmul.f32 0.01, %v4881_v19 }
 0x6ce   :  { %v4656_v34 = vpop.f32.mrf.mxu1 }
 0x6cf   :  { %v4977_v20 = vsel %vm4913_vm14, %v4881_v19, %v4945_v6  ;;  %v4657_v16 = vadd.f32 %v4656_v34, %v4541_v12 }
 0x6d0   :  { %v5008_v50 = vadd.f32 %v5007_v46, %v4977_v20 }
 0x6d1   :  { %v4846_v31 = vadd.f32 %v4778_v33, %v4657_v16  ;;  %5643 = vmatmul.msk.f32.gmra.mxu1 %vm1944_vm11, %v7561_v47  ;;  %4828 = vmatmul.f32.gmra.mxu2 %v5755_v14  ;;  %v4556_v14 = vpop.f32.mrf.mxu0 }
 0x6d3   :  { %v4882_v8 = vadd.f32 %v7572_v32, %v4846_v31 }
 0x6d4   :  { %v4781_v41 = vpop.f32.mrf.mxu2 }
 0x6d5   :  { %vm4914_vm15 = vcmp.ge.f32.partialorder %v4882_v8, 0.0  ;;  %v4946_v7 = vmul.f32 0.01, %v4882_v8 }
 0x6d6   :  { %v4659_v62 = vpop.f32.mrf.mxu1 }
 0x6d7   :  { %v4978_v44 = vsel %vm4914_vm15, %v4882_v8, %v4946_v7  ;;  %v4660_v2 = vadd.f32 %v4659_v62, %v4544_v48  ;;  %v5040_v48 = vld [vmem:[%s7524_s30 + $0x28] sm:$0xff]  ;;  %v5038_v8 = vld [vmem:[%s7524_s30 + $0x18] sm:$0xff] }
 0x6d8   :  { %v5009_v35 = vadd.f32 %v5008_v50, %v4978_v44  ;;  %5065 = vmatpush.msra.mxu3 %v5040_v48 }
 0x6d9   :  { %v4847_v40 = vadd.f32 %v4781_v41, %v4660_v2  ;;  %5644 = vmatmul.msk.f32.gmra.mxu1 %vm1944_vm11, %v7574_v42  ;;  %v4559_v42 = vpop.f32.mrf.mxu0 }
 0x6da   :  { %5066 = vmatpush.msra.mxu3 %v5039_v49 }
 0x6db   :  { %v4883_v47 = vadd.f32 %v7572_v32, %v4847_v40 }
 0x6dc   :  { %v4784_v27 = vpop.f32.mrf.mxu2  ;;  %5067 = vmatpush.msra.mxu3 %v5038_v8 }
 0x6dd   :  { %vm4915_vm2 = vcmp.ge.f32.partialorder %v4883_v47, 0.0  ;;  %v4947_v57 = vmul.f32 0.01, %v4883_v47 }
 0x6de   :  { %v4662_v37 = vpop.f32.mrf.mxu1 }
 0x6df   :  { %v4979_v12 = vsel %vm4915_vm2, %v4883_v47, %v4947_v57  ;;  %v4663_v53 = vadd.f32 %v4662_v37, %v4547_v54  ;;  %v5036_v37 = vld [vmem:[%s7524_s30 + $0x8] sm:$0xff] }
 0x6e0   :  { %v5010_v58 = vadd.f32 %v5009_v35, %v4979_v12  ;;  %v5037_v35 = vld [vmem:[%s7524_s30 + $0x10] sm:$0xff] }
 0x6e1   :  { %v4848_v56 = vadd.f32 %v4784_v27, %v4663_v53  ;;  %v4562_v28 = vpop.f32.mrf.mxu0  ;;  %5068 = vmatpush.msra.mxu3 %v5037_v35 }
 0x6e3   :  { %v4884_v61 = vadd.f32 %v7572_v32, %v4848_v56  ;;  %5069 = vmatpush.msra.mxu3 %v5036_v37 }
 0x6e4   :  { %v4787_v60 = vpop.f32.mrf.mxu2 }
 0x6e5   :  { %vm4916_vm4 = vcmp.ge.f32.partialorder %v4884_v61, 0.0  ;;  %v4948_v36 = vmul.f32 0.01, %v4884_v61 }
 0x6e6   :  { %v4665_v17 = vpop.f32.mrf.mxu1 }
 0x6e7   :  { %v4980_v18 = vsel %vm4916_vm4, %v4884_v61, %v4948_v36  ;;  %v4666_v1 = vadd.f32 %v4665_v17, %v4550_v11  ;;  %v5035_v36 = vld [vmem:[%s7524_s30] sm:$0xff] }
 0x6e8   :  { %v5011_v59 = vadd.f32 %v5010_v58, %v4980_v18  ;;  %5070 = vmatpush.msra.mxu3 %v5035_v36 }
 0x6e9   :  { %v4849_v5 = vadd.f32 %v4787_v60, %v4666_v1  ;;  %v4565_v21 = vpop.f32.mrf.mxu0 }
 0x6eb   :  { %v4885_v45 = vadd.f32 %v7572_v32, %v4849_v5 }
 0x6ec   :  { %v4790_v63 = vpop.f32.mrf.mxu2 }
 0x6ed   :  { %vm4917_vm11 = vcmp.ge.f32.partialorder %v4885_v45, 0.0  ;;  %v4949_v23 = vmul.f32 0.01, %v4885_v45 }
 0x6ee   :  { %v4668_v25 = vpop.f32.mrf.mxu1 }
 0x6ef   :  { %v4981_v13 = vsel %vm4917_vm11, %v4885_v45, %v4949_v23  ;;  %v4669_v4 = vadd.f32 %v4668_v25, %v4553_v10 }
 0x6f0   :  { %v5012_v29 = vadd.f32 %v5011_v59, %v4981_v13 }
 0x6f1   :  { %v4850_v52 = vadd.f32 %v4790_v63, %v4669_v4  ;;  %v4568_v20 = vpop.f32.mrf.mxu0 }
 0x6f3   :  { %v4886_v0 = vadd.f32 %v7572_v32, %v4850_v52 }
 0x6f4   :  { %v4793_v54 = vpop.f32.mrf.mxu2 }
 0x6f5   :  { %vm4918_vm5 = vcmp.ge.f32.partialorder %v4886_v0, 0.0  ;;  %v4950_v51 = vmul.f32 0.01, %v4886_v0 }
 0x6f6   :  { %v4671_v38 = vpop.f32.mrf.mxu1 }
 0x6f7   :  { %v4982_v3 = vsel %vm4918_vm5, %v4886_v0, %v4950_v51  ;;  %v4672_v55 = vadd.f32 %v4671_v38, %v4556_v14  ;;  %v5115_v51 = vld [vmem:[%s7714_s13 + $0x30] sm:$0xff]  ;;  %v5081_v38 = vld [vmem:[%s7709_s8 + $0x18] sm:$0xff] }
 0x6f8   :  { %v5013_v15 = vadd.f32 %v5012_v29, %v4982_v3  ;;  %5101 = vmatpush.msrb.mxu3 %v5081_v38 }
 0x6f9   :  { %v4851_v24 = vadd.f32 %v4793_v54, %v4672_v55  ;;  %v4571_v62 = vpop.f32.mrf.mxu0  ;;  %v5116_v54 = vld [vmem:[%s7714_s13 + $0x38] sm:$0xff] }
 0x6fa   :  { %5132 = vmatpush.msra.mxu0 %v5116_v54 }
 0x6fb   :  { %v4887_v30 = vadd.f32 %v7572_v32, %v4851_v24 }
 0x6fc   :  { %v4796_v39 = vpop.f32.mrf.mxu2  ;;  %5133 = vmatpush.msra.mxu0 %v5115_v51 }
 0x6fd   :  { %vm4919_vm0 = vcmp.ge.f32.partialorder %v4887_v30, 0.0  ;;  %v4951_v46 = vmul.f32 0.01, %v4887_v30 }
 0x6fe   :  { %v4674_v43 = vpop.f32.mrf.mxu1 }
 0x6ff   :  { %v4983_v11 = vsel %vm4919_vm0, %v4887_v30, %v4951_v46  ;;  %v4675_v9 = vadd.f32 %v4674_v43, %v4559_v42 }
 0x700   :  { %v5014_v19 = vadd.f32 %v5013_v15, %v4983_v11 }
 0x701   :  { %v4852_v33 = vadd.f32 %v4796_v39, %v4675_v9  ;;  %v4574_v26 = vpop.f32.mrf.mxu0 }
 0x703   :  { %v4888_v6 = vadd.f32 %v7572_v32, %v4852_v33 }
 0x704   :  { %v4799_v34 = vpop.f32.mrf.mxu2 }
 0x705   :  { %vm4920_vm1 = vcmp.ge.f32.partialorder %v4888_v6, 0.0  ;;  %v4952_v16 = vmul.f32 0.01, %v4888_v6 }
 0x706   :  { %v4677_v50 = vpop.f32.mrf.mxu1 }
 0x707   :  { %v4984_v31 = vsel %vm4920_vm1, %v4888_v6, %v4952_v16  ;;  %v4678_v17 = vadd.f32 %v4677_v50, %v4562_v28  ;;  %vm5207_vm1 = vcmask 130048  }
 0x708   :  { %v7700_v10 = vadd.f32 %v5014_v19, %v4984_v31 }
 0x709   :  { %v4577_v27 = vpop.f32.mrf.mxu0  ;;  %v4853_v18 = vadd.f32 %v4799_v34, %v4678_v17 }
 0x70b   :  { %v4889_v63 = vadd.f32 %v7572_v32, %v4853_v18 }
 0x70c   :  { %v4802_v41 = vpop.f32.mrf.mxu2 }
 0x70d   :  { %v4953_v52 = vmul.f32 0.01, %v4889_v63  ;;  %vm4921_vm6 = vcmp.ge.f32.partialorder %v4889_v63, 0.0 }
 0x70e   :  { %v4680_v7 = vpop.f32.mrf.mxu1 }
 0x70f   :  { %v4681_v42 = vadd.f32 %v4680_v7, %v4565_v21  ;;  %v5776_v21 = vmov 32.0   ;;  %v4985_v43 = vsel %vm4921_vm6, %v4889_v63, %v4953_v52 }
 0x710   :  { %5746 = vrcp.f32 %v5776_v21  ;;  %v5016_v8 = vadd.f32 %v7700_v10, %v4985_v43  ;;  %v5111_v43 = vld [vmem:[%s7714_s13 + $0x10] sm:$0xff] }
 0x711   :  { %v4580_v53 = vpop.f32.mrf.mxu0  ;;  %v4854_v45 = vadd.f32 %v4802_v41, %v4681_v42 }
 0x713   :  { %v4890_v29 = vadd.f32 %v7572_v32, %v4854_v45 }
 0x714   :  { %v4805_v44 = vpop.f32.mrf.mxu2 }
 0x715   :  { %v4954_v30 = vmul.f32 0.01, %v4890_v29  ;;  %vm4922_vm7 = vcmp.ge.f32.partialorder %v4890_v29, 0.0 }
 0x716   :  { %v4683_v2 = vpop.f32.mrf.mxu1  ;;  %v5747_v31 = vpop.eup %5746 }
 0x717   :  { %v4684_v59 = vadd.f32 %v4683_v2, %v4568_v20  ;;  %v4986_v20 = vsel %vm4922_vm7, %v4890_v29, %v4954_v30  ;;  %vm5032_vm4 = vweird.f32 %v5747_v31  ;;  %v5079_v30 = vld [vmem:[%s7709_s8 + $0x8] sm:$0xff] }
 0x718   :  { %v5017_v2 = vadd.f32 %v5016_v8, %v4986_v20  ;;  %v5738_v20 = vld [vmem:[%s7059_s10] ss:$0 sm:$0xff]  ;;  %s5779_s10 = smov 27  }
 0x719   :  { %v4583_v60 = vpop.f32.mrf.mxu0  ;;  %v4855_v25 = vadd.f32 %v4805_v44, %v4684_v59  ;;  %s5263_s24 = sld [smem:[%s7771_s0 + %s5779_s10]]  }
 0x71b   :  { %v4891_v3 = vadd.f32 %v7572_v32, %v4855_v25 }
 0x71c   :  { %v4808_v40 = vpop.f32.mrf.mxu2 }
 0x71d   :  { %v4955_v11 = vmul.f32 0.01, %v4891_v3  ;;  %vm4923_vm8 = vcmp.ge.f32.partialorder %v4891_v3, 0.0 }
 0x71e   :  { %v4686_v47 = vpop.f32.mrf.mxu1 }
 0x71f   :  { %v4687_v48 = vadd.f32 %v4686_v47, %v4571_v62  ;;  %v4987_v41 = vsel %vm4923_vm8, %v4891_v3, %v4955_v11  ;;  %v5114_v11 = vld [vmem:[%s7714_s13 + $0x28] sm:$0xff] }
 0x720   :  { %v5018_v37 = vadd.f32 %v5017_v2, %v4987_v41  ;;  %5134 = vmatpush.msra.mxu0 %v5114_v11 }
 0x721   :  { %v4586_v23 = vpop.f32.mrf.mxu0  ;;  %v4856_v4 = vadd.f32 %v4808_v40, %v4687_v48 }
 0x723   :  { %v4892_v49 = vadd.f32 %v7572_v32, %v4856_v4 }
 0x724   :  { %v4811_v14 = vpop.f32.mrf.mxu2 }
 0x725   :  { %v4956_v6 = vmul.f32 0.01, %v4892_v49  ;;  %vm4924_vm9 = vcmp.ge.f32.partialorder %v4892_v49, 0.0 }
 0x726   :  { %v4689_v57 = vpop.f32.mrf.mxu1 }
 0x727   :  { %v4690_v13 = vadd.f32 %v4689_v57, %v4574_v26  ;;  %v4988_v35 = vsel %vm4924_vm9, %v4892_v49, %v4956_v6  ;;  %v5028_v57 = vmul.f32 32.0, %v5747_v31  ;;  %v5741_v6 = vld [vmem:[%s7692_s4] ss:$0 sm:$0xff] }
 0x729   :  { %v4857_v55 = vadd.f32 %v4811_v14, %v4690_v13  ;;  %v4589_v34 = vpop.f32.mrf.mxu0  ;;  %v5029_v17 = vsub.f32 1.0, %v5028_v57 }
 0x72b   :  { %v4893_v9 = vadd.f32 %v7572_v32, %v4857_v55  ;;  %v5030_v13 = vmul.f32 %v5747_v31, %v5029_v17 }
 0x72c   :  { %v4814_v12 = vpop.f32.mrf.mxu2 }
 0x72d   :  { %v4957_v7 = vmul.f32 0.01, %v4893_v9  ;;  %vm4925_vm10 = vcmp.ge.f32.partialorder %v4893_v9, 0.0  ;;  %v5031_v51 = vadd.f32 %v5747_v31, %v5030_v13 }
 0x72e   :  { %v4692_v58 = vpop.f32.mrf.mxu1 }
 0x72f   :  { %v4693_v28 = vadd.f32 %v4692_v58, %v4577_v27  ;;  %v5033_v49 = vsel %vm5032_vm4, %v5747_v31, %v5031_v51  ;;  %v2812_v31 = vadd.f32 %v5738_v20, %v7138_v22  ;;  %v5742_v22 = vld [vmem:[%s7734_s17] ss:$0 sm:$0xff] }
 0x731   :  { %v4858_v39 = vadd.f32 %v4814_v12, %v4693_v28  ;;  %v4989_v12 = vsel %vm4925_vm10, %v4893_v9, %v4957_v7  ;;  %v4592_v18 = vpop.f32.mrf.mxu0  ;;  %v5110_v9 = vld [vmem:[%s7714_s13 + $0x8] sm:$0xff]  ;;  %v2815_v41 = vmul.f32 0.01, %v2812_v31  ;;  %vm2814_vm0 = vcmp.ge.f32.partialorder %v2812_v31, 0.0 }
 0x733   :  { %v4894_v16 = vadd.f32 %v7572_v32, %v4858_v39  ;;  %v5078_v39 = vld [vmem:[%s7709_s8] sm:$0xff]  ;;  %v2816_v7 = vsel %vm2814_vm0, %v2812_v31, %v2815_v41 }
 0x734   :  { %v4817_v56 = vpop.f32.mrf.mxu2 }
 0x735   :  { %v4958_v47 = vmul.f32 0.01, %v4894_v16  ;;  %vm4926_vm12 = vcmp.ge.f32.partialorder %v4894_v16, 0.0 }
 0x736   :  { %v4695_v61 = vpop.f32.mrf.mxu1 }
 0x737   :  { %v4696_v15 = vadd.f32 %v4695_v61, %v4580_v53  ;;  %v4990_v61 = vsel %vm4926_vm12, %v4894_v16, %v4958_v47  ;;  %v5202_v47 = vld [vmem:[%s5265_s2 + $0x8] sm:$0xff] }
 0x739   :  { %v4859_v19 = vadd.f32 %v4817_v56, %v4696_v15  ;;  %v5019_v56 = vadd.f32 %v5018_v37, %v4988_v35  ;;  %v5171_v35 = vld [vmem:[%s5263_s24 + $0x10] sm:$0xff] }
 0x73b   :  { %v4895_v62 = vadd.f32 %v7572_v32, %v4859_v19  ;;  %v5020_v42 = vadd.f32 %v5019_v56, %v4989_v12  ;;  %v5109_v19 = vld [vmem:[%s7714_s13] sm:$0xff] }
 0x73c   :  { %v4820_v1 = vpop.f32.mrf.mxu2 }
 0x73d   :  { %v4959_v53 = vmul.f32 0.01, %v4895_v62  ;;  %vm4927_vm13 = vcmp.ge.f32.partialorder %v4895_v62, 0.0  ;;  %v5021_v48 = vadd.f32 %v5020_v42, %v4990_v61 }
 0x73e   :  { %v4698_v5 = vpop.f32.mrf.mxu1 }
 0x73f   :  { %v4699_v46 = vadd.f32 %v4698_v5, %v4583_v60 }
 0x741   :  { %v4860_v50 = vadd.f32 %v4820_v1, %v4699_v46  ;;  %v4991_v1 = vsel %vm4927_vm13, %v4895_v62, %v4959_v53  ;;  %v5112_v46 = vld [vmem:[%s7714_s13 + $0x18] sm:$0xff] }
 0x742   :  { %v5022_v4 = vadd.f32 %v5021_v48, %v4991_v1  ;;  %v5172_v62 = vld [vmem:[%s5263_s24 + $0x18] sm:$0xff] }
 0x743   :  { %v4896_v27 = vadd.f32 %v7572_v32, %v4860_v50 }
 0x744   :  { %v4823_v0 = vpop.f32.mrf.mxu2 }
 0x745   :  { %v4960_v60 = vmul.f32 0.01, %v4896_v27  ;;  %vm4928_vm14 = vcmp.ge.f32.partialorder %v4896_v27, 0.0 }
 0x746   :  { %v4701_v24 = vpop.f32.mrf.mxu1 }
 0x747   :  { %v4702_v33 = vadd.f32 %v4701_v24, %v4586_v23  ;;  %v4992_v63 = vsel %vm4928_vm14, %v4896_v27, %v4960_v60  ;;  %v5743_v27 = vld [vmem:[%s5262_s21] ss:$0 sm:$0xff] }
 0x748   :  { %v5023_v52 = vadd.f32 %v5022_v4, %v4992_v63 }
 0x749   :  { %v4861_v44 = vadd.f32 %v4823_v0, %v4702_v33  ;;  %v5113_v33 = vld [vmem:[%s7714_s13 + $0x20] sm:$0xff] }
 0x74a   :  { %5135 = vmatpush.msra.mxu0 %v5113_v33 }
 0x74b   :  { %v4897_v10 = vadd.f32 %v7572_v32, %v4861_v44 }
 0x74c   :  { %v4826_v26 = vpop.f32.mrf.mxu2  ;;  %5192 = vmatpush.msrb.mxu0 %v5172_v62 }
 0x74d   :  { %v4961_v59 = vmul.f32 0.01, %v4897_v10  ;;  %vm4929_vm15 = vcmp.ge.f32.partialorder %v4897_v10, 0.0 }
 0x74e   :  { %v4704_v40 = vpop.f32.mrf.mxu1  ;;  %5193 = vmatpush.msrb.mxu0 %v5171_v35 }
 0x74f   :  { %v4705_v14 = vadd.f32 %v4704_v40, %v4589_v34  ;;  %v4993_v29 = vsel %vm4929_vm15, %v4897_v10, %v4961_v59  ;;  %v5169_v40 = vld [vmem:[%s5263_s24] sm:$0xff] }
 0x750   :  { %v5024_v38 = vadd.f32 %v5023_v52, %v4993_v29  ;;  %v5201_v10 = vld [vmem:[%s5265_s2] sm:$0xff] }
 0x751   :  { %v4862_v58 = vadd.f32 %v4826_v26, %v4705_v14  ;;  %v5170_v26 = vld [vmem:[%s5263_s24 + $0x8] sm:$0xff] }
 0x752   :  { %5194 = vmatpush.msrb.mxu0 %v5170_v26 }
 0x753   :  { %v4898_v36 = vadd.f32 %v7572_v32, %v4862_v58  ;;  %v5744_v58 = vld [vmem:[%s5264_s28] ss:$0 sm:$0xff] }
 0x754   :  { %v4829_v45 = vpop.f32.mrf.mxu2  ;;  %5195 = vmatpush.msrb.mxu0 %v5169_v40 }
 0x755   :  { %v4962_v23 = vmul.f32 0.01, %v4898_v36  ;;  %vm4930_vm2 = vcmp.ge.f32.partialorder %v4898_v36, 0.0 }
 0x756   :  { %v4707_v5 = vpop.f32.mrf.mxu1 }
 0x757   :  { %v4708_v25 = vadd.f32 %v4707_v5, %v4592_v18  ;;  %v4994_v0 = vsel %vm4930_vm2, %v4898_v36, %v4962_v23  ;;  %v5745_v36 = vld [vmem:[%s5266_s6] ss:$0 sm:$0xff] }
 0x758   :  { %v5025_v55 = vadd.f32 %v5024_v38, %v4994_v0 }
 0x759   :  { %v4863_v28 = vadd.f32 %v4829_v45, %v4708_v25 }
 0x75b   :  { %v4899_v54 = vadd.f32 %v7572_v32, %v4863_v28  ;;  %v5080_v32 = vld [vmem:[%s7709_s8 + $0x10] sm:$0xff] }
 0x75c   :  { %5102 = vmatpush.msrb.mxu3 %v5080_v32 }
 0x75d   :  { %vm4931_vm11 = vcmp.ge.f32.partialorder %v4899_v54, 0.0  ;;  %v4963_v3 = vmul.f32 0.01, %v4899_v54 }
 0x75e   :  { %5103 = vmatpush.msrb.mxu3 %v5079_v30 }
 0x75f   :  { %v4995_v15 = vsel %vm4931_vm11, %v4899_v54, %v4963_v3 }
 0x760   :  { %v5026_v24 = vadd.f32 %v5025_v55, %v4995_v15  ;;  %5104 = vmatpush.msrb.mxu3 %v5078_v39 }
 0x762   :  { %v5034_v21 = vmul.f32 %v5033_v49, %v5026_v24 }
 0x764   :  { %5071 = vmatmul.f32.vlgmr.msra.gmra.mxu3 %v5034_v21 }
 0x765   :  { %5155 = vmatpush.msra.mxu3 %v5112_v46 }
 0x767   :  { %5156 = vmatpush.msra.mxu3 %v5111_v43 }
 0x769   :  { %5157 = vmatpush.msra.mxu3 %v5110_v9 }
 0x76b   :  { %5158 = vmatpush.msra.mxu3 %v5109_v19 }
 0x7e7   :  { %v5072_v34 = vpop.f32.mrf.mxu3 }
 0x7e8   :  { %v5073_v16 = vadd.f32 %v5741_v6, %v5072_v34 }
 0x7ea   :  { %vm5075_vm5 = vcmp.ge.f32.partialorder %v5073_v16, 0.0  ;;  %v5076_v50 = vmul.f32 0.01, %v5073_v16 }
 0x7ec   :  { %v5077_v8 = vsel %vm5075_vm5, %v5073_v16, %v5076_v50 }
 0x7ed   :  { %5684 = vmatmul.msk.f32.vlgmr.msrb.gmra.mxu3 %vm296_vm3, %v5077_v8 }
 0x7ee   :  { %5225 = vmatpush.msrb.mxu3 %v5202_v47 }
 0x7f0   :  { %5226 = vmatpush.msrb.mxu3 %v5201_v10 }
 0x7f5   :  { %5686 = vmatmul.msk.f32.vlgmr.msra.gmra.mxu3 %vm296_vm3, %v2816_v7 }
 0x870   :  { %v5106_v44 = vpop.f32.mrf.mxu3 }
 0x871   :  { %v5107_v2 = vadd.f32 %v5742_v22, %v5106_v44 }
 0x873   :  { %5685 = vmatmul.msk.f32.vlgmr.msra.gmra.mxu0 %vm296_vm3, %v5107_v2 }
 0x878   :  { %v5160_v14 = vpop.f32.mrf.mxu3 }
 0x8f0   :  { %v5137_v57 = vpop.f32.mrf.mxu0 }
 0x8f1   :  { %v5161_v37 = vadd.f32 %v5160_v14, %v5137_v57 }
 0x8f3   :  { %v5167_v12 = vadd.f32 %v5743_v27, %v5161_v37 }
 0x8f5   :  { %v5168_v53 = vmax.f32 %v5167_v12, 0.0 }
 0x8f7   :  { %5687 = vmatmul.msk.f32.vlgmr.msrb.gmra.mxu0 %vm296_vm3, %v5168_v53  ;;  %vm5231_vm3 = vcmask 31744  }
 0x974   :  { %v5197_v56 = vpop.f32.mrf.mxu0 }
 0x975   :  { %v5198_v61 = vadd.f32 %v5744_v58, %v5197_v56 }
 0x977   :  { %v5200_v60 = vmax.f32 %v5198_v61, 0.0 }
 0x979   :  { %5688 = vmatmul.msk.f32.vlgmr.msrb.gmra.mxu3 %vm5207_vm1, %v5200_v60 }
 0x9fc   :  { %v5228_v17 = vpop.f32.mrf.mxu3 }
 0x9fd   :  { %v5229_v42 = vadd.f32 %v5745_v36, %v5228_v17 }
 0x9ff   :  { %5232 = vst.msk [vmem:[%s5267_s11] sm:$0xff] %vm5231_vm3, %v5229_v42 }

</bundles_post_ra>
